<compile_context>
chip_gen: v5e
topology: v5e:2x2
jax: 0.10.0
libtpu: 0.0.40
codegen_flags: <defaults>
</compile_context>

<pallas_src>
import functools

import jax
import jax.numpy as jnp
from jax import lax
from jax.experimental import pallas as pl
from jax.experimental.pallas import tpu as pltpu


def _round_up(n: int, m: int) -> int:
    return ((n + m - 1) // m) * m


def _fused_mlp_kernel(*refs, n_layers: int):
    # refs = (x_ref, w0, b0, w1, b1, ..., o_ref)
    x_ref = refs[0]
    o_ref = refs[-1]
    wb = refs[1:-1]

    h = x_ref[...]                                   # (bm, in_p) f32
    for j in range(n_layers):
        w = wb[2 * j][...]                           # (prev_p, out_p), VMEM-resident
        b = wb[2 * j + 1][...]                       # (1, out_p)
        h = jnp.dot(h, w, preferred_element_type=jnp.float32,
                    precision=lax.Precision.HIGHEST) + b
        if j != n_layers - 1:
            h = jnp.tanh(h)                          # nonlinearity() == nn.Tanh()
    o_ref[...] = h.astype(o_ref.dtype)


def densenet_forward(x, params, *, bm: int = 256):
    """Fused forward pass.  x: (B, in_f); params: list of (W, b), W shaped (in, out)."""
    n_layers = len(params)
    assert n_layers >= 1
    B, in_f = x.shape
    out_f = params[-1][0].shape[1]

    # ---- lane-dense padding of feature axes (multiples of 128) -------------
    in_p = _round_up(in_f, 128)
    padded = []
    prev_p, prev_f = in_p, in_f
    for (w, b) in params:
        fi, fo = w.shape
        assert fi == prev_f
        fo_p = _round_up(fo, 128)
        w_p = jnp.zeros((prev_p, fo_p), x.dtype).at[:fi, :fo].set(w.astype(x.dtype))
        b_p = jnp.zeros((1, fo_p), x.dtype).at[0, :fo].set(b.astype(x.dtype))
        padded.append((w_p, b_p))
        prev_p, prev_f = fo_p, fo
    out_p = prev_p

    # ---- batch tiling (sublane axis): pad B up to a multiple of bm ---------
    bm = max(8, min(bm, _round_up(B, 8)))
    B_p = _round_up(B, bm)
    x_p = jnp.pad(x, ((0, B_p - B), (0, in_p - in_f)))
    grid = (B_p // bm,)

    in_specs = [pl.BlockSpec((bm, in_p), lambda i: (i, 0))]      # batch tile of x
    flat_inputs = [x_p]
    for (w_p, b_p) in padded:
        in_specs.append(pl.BlockSpec(w_p.shape, lambda i: (0, 0)))   # resident weight
        in_specs.append(pl.BlockSpec(b_p.shape, lambda i: (0, 0)))   # resident bias row
        flat_inputs += [w_p, b_p]

    kernel = functools.partial(_fused_mlp_kernel, n_layers=n_layers)
    out = pl.pallas_call(
        kernel,
        out_shape=jax.ShapeDtypeStruct((B_p, out_p), x.dtype),
        grid=grid,
        in_specs=in_specs,
        out_specs=pl.BlockSpec((bm, out_p), lambda i: (i, 0)),
        compiler_params=pltpu.CompilerParams(
            dimension_semantics=("parallel",)),   # megacore: shard batch tiles
    )(*flat_inputs)

    return out[:B, :out_f]


def init_densenet_params(key, layers):
    """Deterministic init mirroring nn.Linear default (uniform +-1/sqrt(fan_in)).
    Weights stored pre-transposed as (in, out) so the kernel does x @ W + b."""
    params = []
    for j in range(len(layers) - 1):
        fan_in, fan_out = layers[j], layers[j + 1]
        key, kw, kb = jax.random.split(key, 3)
        bound = 1.0 / jnp.sqrt(jnp.float32(fan_in))
        w = jax.random.uniform(kw, (fan_in, fan_out), jnp.float32, -bound, bound)
        b = jax.random.uniform(kb, (fan_out,), jnp.float32, -bound, bound)
        params.append((w, b))
    return params


if __name__ == "__main__":
    key = jax.random.PRNGKey(0)
    key, kx = jax.random.split(key)

    # DenseNet(layers=[16, 32, 32, 8], nonlinearity=nn.Tanh)
    layers = [16, 32, 32, 8]
    batch = 512          # bm=256 -> grid of 2 batch tiles (both TCs busy on v7x)

    params = init_densenet_params(key, layers)
    x = jax.random.normal(kx, (batch, layers[0]), jnp.float32)

    out = densenet_forward(x, params, bm=256)
    out = jax.block_until_ready(out)

    # sanity check against a plain-JAX reference (same precision)
    ref = x
    for j, (w, b) in enumerate(params):
        ref = jnp.dot(ref, w, precision=lax.Precision.HIGHEST) + b
        if j != len(params) - 1:
            ref = jnp.tanh(ref)
    assert out.shape == (batch, layers[-1])
    assert jnp.allclose(out, ref, atol=1e-5, rtol=1e-5)

    print("KERNEL_OK")
</pallas_src>

<mosaic_0001>
module attributes {stable_mosaic.version = 11 : i64} {
  func.func @_fused_mlp_kernel(%arg0: i32, %arg1: memref<256x128xf32, #tpu.memory_space<vmem>>, %arg2: memref<128x128xf32, #tpu.memory_space<vmem>>, %arg3: memref<1x128xf32, #tpu.memory_space<vmem>>, %arg4: memref<128x128xf32, #tpu.memory_space<vmem>>, %arg5: memref<1x128xf32, #tpu.memory_space<vmem>>, %arg6: memref<128x128xf32, #tpu.memory_space<vmem>>, %arg7: memref<1x128xf32, #tpu.memory_space<vmem>>, %arg8: memref<256x128xf32, #tpu.memory_space<vmem>>) attributes {dimension_semantics = [#tpu.dimension_semantics<parallel>], iteration_bounds = array<i64: 2>, scalar_prefetch = 0 : i64, scratch_operands = 0 : i64, tpu.core_type = #tpu.core_type<tc>, window_params = [{transform_indices = @transform_0, window_bounds = array<i64: 256, 128>}, {pipeline_mode = #tpu.pipeline_mode<synchronous>, transform_indices = @transform_1, window_bounds = array<i64: 128, 128>}, {pipeline_mode = #tpu.pipeline_mode<synchronous>, transform_indices = @transform_2, window_bounds = array<i64: 1, 128>}, {pipeline_mode = #tpu.pipeline_mode<synchronous>, transform_indices = @transform_3, window_bounds = array<i64: 128, 128>}, {pipeline_mode = #tpu.pipeline_mode<synchronous>, transform_indices = @transform_4, window_bounds = array<i64: 1, 128>}, {pipeline_mode = #tpu.pipeline_mode<synchronous>, transform_indices = @transform_5, window_bounds = array<i64: 128, 128>}, {pipeline_mode = #tpu.pipeline_mode<synchronous>, transform_indices = @transform_6, window_bounds = array<i64: 1, 128>}, {transform_indices = @transform_7, window_bounds = array<i64: 256, 128>}]} {
    %c0 = arith.constant 0 : index
    %c0_0 = arith.constant 0 : index
    %0 = vector.load %arg1[%c0, %c0_0] : memref<256x128xf32, #tpu.memory_space<vmem>>, vector<256x128xf32>
    %c0_1 = arith.constant 0 : index
    %c0_2 = arith.constant 0 : index
    %1 = vector.load %arg2[%c0_1, %c0_2] : memref<128x128xf32, #tpu.memory_space<vmem>>, vector<128x128xf32>
    %c0_3 = arith.constant 0 : index
    %c0_4 = arith.constant 0 : index
    %2 = vector.load %arg3[%c0_3, %c0_4] : memref<1x128xf32, #tpu.memory_space<vmem>>, vector<1x128xf32>
    %cst = arith.constant dense<0.000000e+00> : vector<256x128xf32>
    %3 = tpu.matmul %0, %1, %cst {dimension_numbers = #tpu.dot_dimension_numbers<[1], [0], [0], [1], [0, 0, 1, 1], [], []>, precision = #tpu.contract_precision<fp32>} : vector<256x128xf32>, vector<128x128xf32>, vector<256x128xf32> -> vector<256x128xf32>
    %4 = vector.broadcast %2 : vector<1x128xf32> to vector<256x128xf32>
    %5 = arith.addf %3, %4 : vector<256x128xf32>
    %6 = math.tanh %5 : vector<256x128xf32>
    %c0_5 = arith.constant 0 : index
    %c0_6 = arith.constant 0 : index
    %7 = vector.load %arg4[%c0_5, %c0_6] : memref<128x128xf32, #tpu.memory_space<vmem>>, vector<128x128xf32>
    %c0_7 = arith.constant 0 : index
    %c0_8 = arith.constant 0 : index
    %8 = vector.load %arg5[%c0_7, %c0_8] : memref<1x128xf32, #tpu.memory_space<vmem>>, vector<1x128xf32>
    %cst_9 = arith.constant dense<0.000000e+00> : vector<256x128xf32>
    %9 = tpu.matmul %6, %7, %cst_9 {dimension_numbers = #tpu.dot_dimension_numbers<[1], [0], [0], [1], [0, 0, 1, 1], [], []>, precision = #tpu.contract_precision<fp32>} : vector<256x128xf32>, vector<128x128xf32>, vector<256x128xf32> -> vector<256x128xf32>
    %10 = vector.broadcast %8 : vector<1x128xf32> to vector<256x128xf32>
    %11 = arith.addf %9, %10 : vector<256x128xf32>
    %12 = math.tanh %11 : vector<256x128xf32>
    %c0_10 = arith.constant 0 : index
    %c0_11 = arith.constant 0 : index
    %13 = vector.load %arg6[%c0_10, %c0_11] : memref<128x128xf32, #tpu.memory_space<vmem>>, vector<128x128xf32>
    %c0_12 = arith.constant 0 : index
    %c0_13 = arith.constant 0 : index
    %14 = vector.load %arg7[%c0_12, %c0_13] : memref<1x128xf32, #tpu.memory_space<vmem>>, vector<1x128xf32>
    %cst_14 = arith.constant dense<0.000000e+00> : vector<256x128xf32>
    %15 = tpu.matmul %12, %13, %cst_14 {dimension_numbers = #tpu.dot_dimension_numbers<[1], [0], [0], [1], [0, 0, 1, 1], [], []>, precision = #tpu.contract_precision<fp32>} : vector<256x128xf32>, vector<128x128xf32>, vector<256x128xf32> -> vector<256x128xf32>
    %16 = vector.broadcast %14 : vector<1x128xf32> to vector<256x128xf32>
    %17 = arith.addf %15, %16 : vector<256x128xf32>
    %c0_15 = arith.constant 0 : index
    %c0_16 = arith.constant 0 : index
    %18 = vector.load %arg8[%c0_15, %c0_16] : memref<256x128xf32, #tpu.memory_space<vmem>>, vector<256x128xf32>
    tpu.vector_store %arg8[%c0_15, %c0_16], %17 {strides = array<i32>} : memref<256x128xf32, #tpu.memory_space<vmem>>, vector<256x128xf32>,
    return
  }
  func.func @transform_0(%arg0: i32) -> (i32, i32) {
    %c0_i32 = arith.constant 0 : i32
    %c0_i32_0 = arith.constant 0 : i32
    return %arg0, %c0_i32 : i32, i32
  }
  func.func @transform_1(%arg0: i32) -> (i32, i32) {
    %c0_i32 = arith.constant 0 : i32
    %c0_i32_0 = arith.constant 0 : i32
    %c0_i32_1 = arith.constant 0 : i32
    return %c0_i32, %c0_i32_0 : i32, i32
  }
  func.func @transform_2(%arg0: i32) -> (i32, i32) {
    %c0_i32 = arith.constant 0 : i32
    %c0_i32_0 = arith.constant 0 : i32
    %c0_i32_1 = arith.constant 0 : i32
    return %c0_i32, %c0_i32_0 : i32, i32
  }
  func.func @transform_3(%arg0: i32) -> (i32, i32) {
    %c0_i32 = arith.constant 0 : i32
    %c0_i32_0 = arith.constant 0 : i32
    %c0_i32_1 = arith.constant 0 : i32
    return %c0_i32, %c0_i32_0 : i32, i32
  }
  func.func @transform_4(%arg0: i32) -> (i32, i32) {
    %c0_i32 = arith.constant 0 : i32
    %c0_i32_0 = arith.constant 0 : i32
    %c0_i32_1 = arith.constant 0 : i32
    return %c0_i32, %c0_i32_0 : i32, i32
  }
  func.func @transform_5(%arg0: i32) -> (i32, i32) {
    %c0_i32 = arith.constant 0 : i32
    %c0_i32_0 = arith.constant 0 : i32
    %c0_i32_1 = arith.constant 0 : i32
    return %c0_i32, %c0_i32_0 : i32, i32
  }
  func.func @transform_6(%arg0: i32) -> (i32, i32) {
    %c0_i32 = arith.constant 0 : i32
    %c0_i32_0 = arith.constant 0 : i32
    %c0_i32_1 = arith.constant 0 : i32
    return %c0_i32, %c0_i32_0 : i32, i32
  }
  func.func @transform_7(%arg0: i32) -> (i32, i32) {
    %c0_i32 = arith.constant 0 : i32
    %c0_i32_0 = arith.constant 0 : i32
    return %arg0, %c0_i32 : i32, i32
  }
}

</mosaic_0001>

<bundles_post_ra>
// kernel: tpu_custom_call.1
= control target key start
LH: loop header
LB: loop body
LE: loop exit
PB: predicated region body
PF: predicated region fallthrough
CT: control target
= control target key end

     0   :  { %s8284_s0 = inlined_call_operand.hbm [shape: f32[512,128], index: 0, kind: input, shape index: {}]   ;;  %s8285_s1 = inlined_call_operand.hbm [shape: f32[128,128], index: 1, kind: input, shape index: {}]   ;;  %s8286_s2 = inlined_call_operand.vmem [shape: f32[1,128], index: 2, kind: input, shape index: {}]   ;;  %s8287_s3 = inlined_call_operand.hbm [shape: f32[128,128], index: 3, kind: input, shape index: {}]   ;;  %s8288_s4 = inlined_call_operand.vmem [shape: f32[1,128], index: 4, kind: input, shape index: {}]   ;;  %s8289_s5 = inlined_call_operand.hbm [shape: f32[128,128], index: 5, kind: input, shape index: {}]   ;;  %s8290_s6 = inlined_call_operand.vmem [shape: f32[1,128], index: 6, kind: input, shape index: {}]   ;;  %s8291_s7 = inlined_call_operand.hbm [shape: f32[512,128], index: 7, kind: output, shape index: {}]  }
   0x1   :  { %8531 = sst [smem:[#allocation69_spill]] %s8285_s1 }
   0x2   :  { %12 = vsyncpa [#allocation3], 0 }
   0x3   :  { %14 = vsyncpa [#allocation3 + $0x1], 0 }
   0x4   :  { %15 = vsyncpa [#allocation6], 0 }
   0x5   :  { %16 = vsyncpa [#allocation9], 0 }
   0x6   :  { %17 = vsyncpa [#allocation4], 0 }
   0x7   :  { %19 = vsyncpa [#allocation4 + $0x1], 0  ;;  %s5074_s24 = smov 0   ;;  %s5076_s25 = smov 0  }
   0x8   :  { %s5078_s26 = smov 0   ;;  %s5080_s27 = smov 0  }
   0x9 LB: > { %s5095_s28 = sadd.s32 4294967295, %s5025_s27   ;;  %s4563_s29 = sadd.s32 4294967294, %s5025_s27   ;;  %s5025_s27 = sphi %s5080_s27, %s8954_s27   ;;  %s5021_s26 = sphi %s5078_s26, %s8953_s26   ;;  %s5017_s25 = sphi %s5076_s25, %s8952_s25   ;;  %s5013_s24 = sphi %s5074_s24, %s8951_s24  }
   0xa   : > { %p45_p0 = scmp.ne.s32.totalorder %s5017_s25, %s5013_s24  ;;  %p46_p1 = scmp.eq.s32.totalorder %s5095_s28, 0 }
   0xb   : > { %p195_p2 = scmp.eq.s32.totalorder %s5095_s28, 1  ;;  %p201_p3 = scmp.eq.s32.totalorder %s4563_s29, 1 }
   0xc   : > { %p5104_p4 = por %p46_p1, %p45_p0  ;;  %p4564_p5 = scmp.ge.s32.totalorder %s5025_s27, 1 }
   0xd   : > { %p5109_p6 = por %p201_p3, %p45_p0  ;;  %p208_p7 = scmp.lt.s32.totalorder %s5025_s27, 3 }
   0xe   : > { %s8534_s1 = sld [smem:[#allocation69_spill]]  ;;  %s5027_s13 = smov [#allocation5]  }
   0xf   : > { %p5117_p8 = pnand %p4564_p5, %p208_p7  ;;  %s221_s14 = sshll.u32 %s5027_s13, 4  ;;  %s222_s14 = int_to_ptr.vmem [resolvable:$true] %s221_s14 }
  0x10   : > { %s236_s18 = sshll.u32 %s8287_s3, 4  ;;  %s8292_s19 = smov 128   ;;  %s237_s18 = int_to_ptr.hbm [resolvable:$true] %s236_s18 }
  0x11   : > { %p4633_p9 = pneg %p5117_p8  ;;  %s8293_s20 = smov 8  }
  0x12   : > { %s5030_s21 = smov [#allocation7]   ;;  %s253_s9 = sshll.u32 %s8289_s5, 4  ;;  %s254_s9 = int_to_ptr.hbm [resolvable:$true] %s253_s9 }
  0x13   : > { %p5125_p10 = pnand %p4633_p9, %p46_p1  ;;  %s238_s22 = sshll.u32 %s5030_s21, 4  ;;  %s239_s22 = int_to_ptr.vmem [resolvable:$true] %s238_s22 }
  0x14   : > { %s219_s11 = sshll.u32 %s8534_s1, 4  ;;  %s5031_s10 = smov [#allocation8]   ;;  %s220_s11 = int_to_ptr.hbm [resolvable:$true] %s219_s11 }
  0x15   : > { %4636 = dma.hbm_to_vmem [thread:$0]  (!%p5125_p10), %s220_s11, 2048, %s222_s14, [#allocation6], %s8292_s19, %s8292_s19, %s8293_s20  }
  0x16   : > { %4639 = dma.hbm_to_vmem [thread:$0]  (!%p5125_p10), %s237_s18, 2048, %s239_s22, [#allocation6], %s8292_s19, %s8292_s19, %s8293_s20  }
  0x17   : > { %s255_s11 = sshll.u32 %s5031_s10, 4  ;;  %s5147_s13 = sadd.s32 1, %s5025_s27   ;;  %s256_s11 = int_to_ptr.vmem [resolvable:$true] %s255_s11 }
  0x18   : > { %4642 = dma.hbm_to_vmem [thread:$0]  (!%p5125_p10), %s254_s9, 2048, %s256_s11, [#allocation9], %s8292_s19, %s8292_s19, %s8293_s20  }
  0x19   : > { %s29_s14 = ssub.s32 %s5025_s27, %s5147_s13  ;;  %s32_s16 = sadd.s32 1, %s5021_s26 }
  0x1a   : > { %p30_p12 = scmp.eq.s32.totalorder %s29_s14, 0  ;;  %p39_p13 = scmp.ne.s32.totalorder %s5021_s26, %s5017_s25 }
  0x1b   : > { %p40_p0 = scmp.eq.s32.totalorder %s5025_s27, 0  ;;  %p4654_p5 = scmp.lt.s32.totalorder %s5025_s27, 2 }
  0x1c   : > { %s5161_s17 = scalar_select %p30_p12, %s5021_s26, %s32_s16  }
  0x1d   : > { %p5165_p3 = por %p195_p2, %p39_p13  ;;  %s272_s21 = sand.u32 1, %s5021_s26  }
  0x1e   : > { %s4583_s15 = sshll.u32 %s5025_s27, 8  ;;  %p41_p7 = por %p40_p0, %p39_p13 }
  0x1f   : > { %s4569_s22 = sshll.u32 %s272_s21, 8  ;;  %s281_s9 = scalar_lea.hbm %s8284_s0, %s4583_s15 }
  0x20   : > { %s282_s10 = sshll.u32 %s281_s9, 4  ;;  %s276_s11 = scalar_lea.vmem [#allocation2], %s4569_s22  ;;  %s283_s10 = int_to_ptr.hbm [resolvable:$true] %s282_s10 }
  0x21   : > { %s284_s14 = sshll.u32 %s276_s11, 4  ;;  %p5175_p9 = pnand %p4654_p5, %p41_p7  ;;  %s285_s14 = int_to_ptr.vmem [resolvable:$true] %s284_s14 }
  0x22   : > { %s273_s19 = scalar_lea.sflag [#allocation3], %s272_s21  ;;  %s4921_s20 = sshra.s32 %s283_s10, 4  ;;  %s4922_s20 = int_to_ptr.hbm [resolvable:$true] %s4921_s20 }
  0x23   : > { %s4923_s1 = scalar_lea.hbm %s4922_s20, 256  ;;  %p4925_p10 = pneg %p5175_p9 }
  0x24   : > { %p4924_p2 = scmp.ne.s32.totalorder %s4922_s20, %s4923_s1  ;;  %s4928_s22 = scalar_lea.hbm %s8284_s0, 512 }
  0x25   : > { %p4929_p0 = scmp.lt.s32.totalorder %s4922_s20, %s8284_s0  ;;  %p4930_p5 = scmp.lt.s32.totalorder %s4928_s22, %s4923_s1 }
  0x26   : > { %p4926_p12 = pnand %p4925_p10, %p4924_p2 }
  0x27   : > { %p4931_p7 = por %p4930_p5, %p4929_p0 }
  0x28   : > { %p4927_p13 = pneg %p4926_p12 }
  0x2a   : > { %p4932_p11 = pnand %p4931_p7, %p4927_p13 }
  0x2c   : > { %4935 = shalt.err (!%p4932_p11)
}
  0x2d   : > { %s8539_s21 = smov 8   ;;  %s8540_s11 = smov 128  }
  0x2e   : > { %4646 = dma.hbm_to_vmem [thread:$0]  (!%p5175_p9), %s283_s10, 4096, %s285_s14, %s273_s19, %s8540_s11, %s8540_s11, %s8539_s21  }
  0x2f   : > { %296 = sbr.rel (%p5117_p8) target bundleno = 1533 (0x5fd), region = 48 }
  0x34   : > { %s5195_s15 = sand.u32 1, %s5017_s25  }
  0x35   : > { %s4573_s1 = sshll.u32 %s5195_s15, 8  ;;  %s299_s20 = scalar_lea.sflag [#allocation3], %s5195_s15 }
  0x36   : > { %s5201_s23 = scalar_lea.vmem [#allocation2], %s4573_s1 }
  0x37   : > { %4996 = dma.done.wait (%p5104_p4), %s299_s20, 4096  }
  0x38   : > { %4998 = vsyncadd (%p5104_p4), %s299_s20, 4294963200 }
  0x39   : > { %5000 = dma.done.wait (%p46_p1), [#allocation6], 4096  }
  0x3a   : > { %5002 = vsyncadd (%p46_p1), [#allocation6], 4294963200 }
  0x3b   : > { %5004 = dma.done.wait (%p46_p1), [#allocation9], 2048  }
  0x3c   : > { %5006 = vsyncadd (%p46_p1), [#allocation9], 4294965248  ;;  %v398_v0 = vld [vmem:[#allocation5 + $0x78] sm:$0xff]  ;;  %v397_v1 = vld [vmem:[#allocation5 + $0x70] sm:$0xff]  ;;  %s8096_s11 = scalar_lea.vmem [#allocation10], %s4573_s1  ;;  %s4584_s1 = sshll.u32 %s5095_s28, 8 }
  0x3d   : > { %v396_v2 = vld [vmem:[#allocation5 + $0x68] sm:$0xff]  ;;  %v5215_v3 = vand.u32 4294901760, %v398_v0  ;;  %v5217_v4 = vand.u32 4294901760, %v397_v1  ;;  %v395_v6 = vld [vmem:[#allocation5 + $0x60] sm:$0xff]  ;;  %v394_v7 = vld [vmem:[#allocation5 + $0x58] sm:$0xff]  ;;  %s4457_s30 = scalar_lea.hbm %s8291_s7, %s4584_s1  ;;  %s4458_s12 = sshll.u32 %s8096_s11, 4  ;;  %s4459_s12 = int_to_ptr.vmem [resolvable:$true] %s4458_s12 }
  0x3e   : > { %v5219_v5 = vand.u32 4294901760, %v396_v2  ;;  %v393_v8 = vld [vmem:[#allocation5 + $0x50] sm:$0xff]  ;;  %v5221_v9 = vand.u32 4294901760, %v395_v6  ;;  %v5223_v10 = vand.u32 4294901760, %v394_v7  ;;  %v392_v12 = vld [vmem:[#allocation5 + $0x48] sm:$0xff]  ;;  %v391_v16 = vld [vmem:[#allocation5 + $0x40] sm:$0xff] }
  0x3f   : > { %v5225_v11 = vand.u32 4294901760, %v393_v8  ;;  %404 = vmatpush.msra.mxu0 %v5215_v3  ;;  %4585 = vmatpush.msra.mxu2 %v5215_v3  ;;  %v5230_v13 = vsub.f32 %v398_v0, %v5215_v3  ;;  %v5233_v14 = vsub.f32 %v397_v1, %v5217_v4  ;;  %v5238_v17 = vand.u32 4294901760, %v392_v12  ;;  %v390_v23 = vld [vmem:[#allocation5 + $0x38] sm:$0xff]  ;;  %v389_v30 = vld [vmem:[#allocation5 + $0x30] sm:$0xff]  ;;  %v388_v36 = vld [vmem:[#allocation5 + $0x28] sm:$0xff]  ;;  %s4460_s19 = sshll.u32 %s4457_s30, 4  ;;  %s4461_s19 = int_to_ptr.hbm [resolvable:$true] %s4460_s19 }
  0x40   : > { %v5236_v15 = vsub.f32 %v396_v2, %v5219_v5  ;;  %v5241_v18 = vsub.f32 %v395_v6, %v5221_v9  ;;  %v5244_v19 = vsub.f32 %v394_v7, %v5223_v10  ;;  %v5251_v24 = vand.u32 4294901760, %v391_v16  ;;  %v387_v40 = vld [vmem:[#allocation5 + $0x20] sm:$0xff]  ;;  %v386_v51 = vld [vmem:[#allocation5 + $0x18] sm:$0xff]  ;;  %v385_v54 = vld [vmem:[#allocation5 + $0x10] sm:$0xff]  ;;  %s4446_s28 = scalar_lea.sflag [#allocation4], %s5195_s15  ;;  %s4965_s10 = sshra.s32 %s4461_s19, 4  ;;  %s4966_s10 = int_to_ptr.hbm [resolvable:$true] %s4965_s10 }
  0x41   : > { %406 = vmatpush.msra.mxu0 %v5217_v4  ;;  %4586 = vmatpush.msra.mxu2 %v5217_v4  ;;  %v694_v20 = vand.u32 4294901760, %v5230_v13  ;;  %v700_v21 = vand.u32 4294901760, %v5233_v14  ;;  %v5255_v26 = vsub.f32 %v393_v8, %v5225_v11  ;;  %v5269_v32 = vand.u32 4294901760, %v390_v23  ;;  %v351_v43 = vld [vmem:[%s5201_s23] sm:$0xff]  ;;  %v384_v62 = vld [vmem:[#allocation5 + $0x8] sm:$0xff]  ;;  %s4967_s14 = scalar_lea.hbm %s4966_s10, 256  ;;  %p4972_p11 = scmp.lt.s32.totalorder %s4966_s10, %s8291_s7 }
  0x42   : > { %v706_v22 = vand.u32 4294901760, %v5236_v15  ;;  %v712_v25 = vand.u32 4294901760, %v5241_v18  ;;  %v718_v29 = vand.u32 4294901760, %v5244_v19  ;;  %v5272_v33 = vsub.f32 %v392_v12, %v5238_v17  ;;  %v367_v48 = vld [vmem:[%s5201_s23 + $0x80] sm:$0xff]  ;;  %p4968_p1 = scmp.ne.s32.totalorder %s4966_s10, %s4967_s14  ;;  %s4971_s29 = scalar_lea.hbm %s8291_s7, 512 }
  0x43   : > { %408 = vmatpush.msra.mxu0 %v5219_v5  ;;  %4587 = vmatpush.msra.mxu2 %v5219_v5  ;;  %v695_v27 = vsub.f32 %v5230_v13, %v694_v20  ;;  %v701_v28 = vsub.f32 %v5233_v14, %v700_v21  ;;  %v5279_v38 = vand.u32 4294901760, %v389_v30  ;;  %v8304_v39 = vand.u32 4294901760, %v5255_v26  ;;  %v383_v8 = vld [vmem:[#allocation5] sm:$0xff]  ;;  %p4973_p9 = scmp.lt.s32.totalorder %s4971_s29, %s4967_s14 }
  0x44   : > { %v707_v31 = vsub.f32 %v5236_v15, %v706_v22  ;;  %v713_v35 = vsub.f32 %v5241_v18, %v712_v25  ;;  %v5283_v41 = vsub.f32 %v391_v16, %v5251_v24  ;;  %v719_v42 = vsub.f32 %v5244_v19, %v718_v29  ;;  %p4969_p4 = pnand %p4968_p1, %p5165_p3 }
  0x45   : > { %410 = vmatpush.msra.mxu0 %v5221_v9  ;;  %4588 = vmatpush.msra.mxu2 %v5221_v9  ;;  %v696_v34 = vand.u32 4294901760, %v695_v27  ;;  %v702_v37 = vand.u32 4294901760, %v701_v28  ;;  %v5291_v45 = vand.u32 4294901760, %v388_v36  ;;  %v8302_v46 = vand.u32 4294901760, %v5272_v33  ;;  %p4974_p2 = por %p4973_p9, %p4972_p11 }
  0x46   : > { %v708_v44 = vand.u32 4294901760, %v707_v31  ;;  %v5295_v47 = vsub.f32 %v390_v23, %v5269_v32  ;;  %v714_v49 = vand.u32 4294901760, %v713_v35  ;;  %v5300_v50 = vand.u32 4294901760, %v387_v40  ;;  %v368_v35 = vld [vmem:[%s5201_s23 + $0x88] sm:$0xff]  ;;  %p4970_p8 = pneg %p4969_p4 }
  0x47   : > { %412 = vmatpush.msra.mxu0 %v5223_v10  ;;  %4589 = vmatpush.msra.mxu2 %v5223_v10  ;;  %v725_v52 = vsub.f32 %v5255_v26, %v8304_v39  ;;  %v8301_v53 = vand.u32 4294901760, %v5283_v41  ;;  %v5307_v55 = vsub.f32 %v389_v30, %v5279_v38  ;;  %v5309_v56 = vand.u32 4294901760, %v351_v43 }
  0x48   : > { %697 = vmatpush.msra.mxu1 %v696_v34  ;;  %4601 = vmatpush.msra.mxu3 %v696_v34  ;;  %v720_v57 = vand.u32 4294901760, %v719_v42  ;;  %v5313_v58 = vand.u32 4294901760, %v367_v48  ;;  %v731_v59 = vsub.f32 %v5272_v33, %v8302_v46  ;;  %v5318_v60 = vand.u32 4294901760, %v386_v51  ;;  %v352_v34 = vld [vmem:[%s5201_s23 + $0x8] sm:$0xff]  ;;  %p4975_p10 = pnand %p4974_p2, %p4970_p8 }
  0x49   : > { %414 = vmatpush.msra.mxu0 %v5225_v11  ;;  %4590 = vmatpush.msra.mxu2 %v5225_v11  ;;  %v8298_v61 = vand.u32 4294901760, %v5295_v47  ;;  %v5322_v63 = vsub.f32 %v388_v36, %v5291_v45  ;;  %v5326_v0 = vand.u32 4294901760, %v385_v54  ;;  %v5329_v1 = vsub.f32 %v387_v40, %v5300_v50 }
  0x4a   : > { %703 = vmatpush.msra.mxu1 %v702_v37  ;;  %4602 = vmatpush.msra.mxu3 %v702_v37  ;;  %v726_v2 = vand.u32 4294901760, %v725_v52  ;;  %v737_v6 = vsub.f32 %v5283_v41, %v8301_v53  ;;  %v8297_v7 = vand.u32 4294901760, %v5307_v55  ;;  %v5336_v12 = vsub.f32 %v351_v43, %v5309_v56 }
  0x4b   : > { %416 = vmatpush.msra.mxu0 %v5238_v17  ;;  %4591 = vmatpush.msra.mxu2 %v5238_v17  ;;  %v5340_v16 = vand.u32 4294901760, %v384_v62  ;;  %v5343_v23 = vsub.f32 %v367_v48, %v5313_v58  ;;  %v732_v27 = vand.u32 4294901760, %v731_v59  ;;  %v743_v28 = vsub.f32 %v5295_v47, %v8298_v61  ;;  %v369_v61 = vld [vmem:[%s5201_s23 + $0x90] sm:$0xff] }
  0x4c   : > { %709 = vmatpush.msra.mxu1 %v708_v44  ;;  %4603 = vmatpush.msra.mxu3 %v708_v44  ;;  %v8296_v30 = vand.u32 4294901760, %v5322_v63  ;;  %v5350_v31 = vsub.f32 %v386_v51, %v5318_v60  ;;  %v5356_v36 = vand.u32 4294901760, %v383_v8  ;;  %v8294_v37 = vand.u32 4294901760, %v5329_v1 }
  0x4d   : > { %418 = vmatpush.msra.mxu0 %v5251_v24  ;;  %4592 = vmatpush.msra.mxu2 %v5251_v24  ;;  %v738_v40 = vand.u32 4294901760, %v737_v6  ;;  %v749_v42 = vsub.f32 %v5307_v55, %v8297_v7  ;;  %v8295_v43 = vand.u32 4294901760, %v5336_v12  ;;  %v5364_v44 = vsub.f32 %v385_v54, %v5326_v0 }
  0x4e   : > { %715 = vmatpush.msra.mxu1 %v714_v49  ;;  %4604 = vmatpush.msra.mxu3 %v714_v49  ;;  %v8299_v48 = vand.u32 4294901760, %v5343_v23  ;;  %v5369_v49 = vand.u32 4294901760, %v352_v34  ;;  %v5371_v51 = vand.u32 4294901760, %v368_v35  ;;  %v744_v52 = vand.u32 4294901760, %v743_v28 }
  0x4f   : > { %420 = vmatpush.msra.mxu0 %v5269_v32  ;;  %4593 = vmatpush.msra.mxu2 %v5269_v32  ;;  %v8300_v54 = vand.u32 4294901760, %v5350_v31  ;;  %v5378_v59 = vsub.f32 %v384_v62, %v5340_v16  ;;  %v750_v6 = vand.u32 4294901760, %v749_v42  ;;  %v8303_v28 = vand.u32 4294901760, %v5364_v44 }
  0x50   : > { %721 = vmatpush.msra.mxu1 %v720_v57  ;;  %4605 = vmatpush.msra.mxu3 %v720_v57  ;;  %v755_v57 = vsub.f32 %v5322_v63, %v8296_v30  ;;  %v5390_v62 = vsub.f32 %v383_v8, %v5356_v36  ;;  %v5401_v42 = vsub.f32 %v368_v35, %v5371_v51  ;;  %v5421_v46 = vand.u32 4294901760, %v369_v61 }
  0x51   : > { %422 = vmatpush.msra.mxu0 %v5279_v38  ;;  %4594 = vmatpush.msra.mxu2 %v5279_v38  ;;  %v767_v8 = vsub.f32 %v5350_v31, %v8300_v54  ;;  %v8305_v7 = vand.u32 4294901760, %v5378_v59 }
  0x52   : > { %727 = vmatpush.msra.mxu1 %v726_v2  ;;  %4606 = vmatpush.msra.mxu3 %v726_v2  ;;  %v761_v2 = vsub.f32 %v5329_v1, %v8294_v37  ;;  %v566_v37 = vsub.f32 %v5343_v23, %v8299_v48  ;;  %v756_v30 = vand.u32 4294901760, %v755_v57  ;;  %v8306_v57 = vand.u32 4294901760, %v5390_v62 }
  0x53   : > { %424 = vmatpush.msra.mxu0 %v5291_v45  ;;  %4595 = vmatpush.msra.mxu2 %v5291_v45 }
  0x54   : > { %733 = vmatpush.msra.mxu1 %v732_v27  ;;  %4607 = vmatpush.msra.mxu3 %v732_v27  ;;  %v438_v27 = vsub.f32 %v5336_v12, %v8295_v43  ;;  %v353_v43 = vld [vmem:[%s5201_s23 + $0x10] sm:$0xff]  ;;  %v567_v54 = vand.u32 4294901760, %v566_v37 }
  0x55   : > { %426 = vmatpush.msra.mxu0 %v5300_v50  ;;  %4596 = vmatpush.msra.mxu2 %v5300_v50  ;;  %v5415_v48 = vand.u32 4294901760, %v353_v43 }
  0x56   : > { %739 = vmatpush.msra.mxu1 %v738_v40  ;;  %4608 = vmatpush.msra.mxu3 %v738_v40  ;;  %v5398_v40 = vsub.f32 %v352_v34, %v5369_v49  ;;  %v762_v34 = vand.u32 4294901760, %v761_v2  ;;  %v439_v35 = vand.u32 4294901760, %v438_v27  ;;  %v8307_v2 = vand.u32 4294901760, %v5401_v42 }
  0x57   : > { %428 = vmatpush.msra.mxu0 %v5318_v60  ;;  %4597 = vmatpush.msra.mxu2 %v5318_v60  ;;  %v779_v27 = vsub.f32 %v5378_v59, %v8305_v7  ;;  %v5432_v39 = vsub.f32 %v353_v43, %v5415_v48  ;;  %v370_v7 = vld [vmem:[%s5201_s23 + $0x98] sm:$0xff] }
  0x58   : > { %745 = vmatpush.msra.mxu1 %v744_v52  ;;  %4609 = vmatpush.msra.mxu3 %v744_v52  ;;  %v773_v52 = vsub.f32 %v5364_v44, %v8303_v28  ;;  %v8328_v53 = vand.u32 4294901760, %v5398_v40  ;;  %v785_v28 = vsub.f32 %v5390_v62, %v8306_v57 }
  0x59   : > { %430 = vmatpush.msra.mxu0 %v5326_v0  ;;  %4598 = vmatpush.msra.mxu2 %v5326_v0  ;;  %v780_v57 = vand.u32 4294901760, %v779_v27 }
  0x5a   : > { %751 = vmatpush.msra.mxu1 %v750_v6  ;;  %4610 = vmatpush.msra.mxu3 %v750_v6  ;;  %v768_v6 = vand.u32 4294901760, %v767_v8  ;;  %v774_v37 = vand.u32 4294901760, %v773_v52  ;;  %v574_v8 = vsub.f32 %v5401_v42, %v8307_v2  ;;  %v354_v52 = vld [vmem:[%s5201_s23 + $0x18] sm:$0xff]  ;;  %v786_v43 = vand.u32 4294901760, %v785_v28 }
  0x5b   : > { %432 = vmatpush.msra.mxu0 %v5340_v16  ;;  %4599 = vmatpush.msra.mxu2 %v5340_v16 }
  0x5c   : > { %757 = vmatpush.msra.mxu1 %v756_v30  ;;  %4611 = vmatpush.msra.mxu3 %v756_v30  ;;  %v446_v30 = vsub.f32 %v5398_v40, %v8328_v53 }
  0x5d   : > { %434 = vmatpush.msra.mxu0 %v5356_v36  ;;  %4600 = vmatpush.msra.mxu2 %v5356_v36 }
  0x5e   : > { %763 = vmatpush.msra.mxu1 %v762_v34  ;;  %4612 = vmatpush.msra.mxu3 %v762_v34  ;;  %v5441_v34 = vsub.f32 %v369_v61, %v5421_v46  ;;  %v447_v2 = vand.u32 4294901760, %v446_v30  ;;  %v575_v61 = vand.u32 4294901760, %v574_v8 }
  0x5f   : > { %440 = vmatmul.f32.vlgmr.msra.gmra.mxu0 %v439_v35  ;;  %568 = vmatmul.f32.vlgmr.msra.gmra.mxu2 %v567_v54  ;;  %v5448_v54 = vand.u32 4294901760, %v354_v52  ;;  %v5450_v35 = vand.u32 4294901760, %v370_v7 }
  0x60   : > { %769 = vmatpush.msra.mxu1 %v768_v6  ;;  %4613 = vmatpush.msra.mxu3 %v768_v6  ;;  %v8327_v6 = vand.u32 4294901760, %v5432_v39  ;;  %v8314_v27 = vand.u32 4294901760, %v5441_v34 }
  0x61   : > { %919 = vmatpush.msrb.mxu2 %v5230_v13  ;;  %1354 = vmatpush.msrb.mxu0 %v694_v20  ;;  %v5461_v13 = vsub.f32 %v354_v52, %v5448_v54  ;;  %v8542_v52 = vand.u32 4294901760, %v5272_v33 }
  0x62   : > { %775 = vmatpush.msra.mxu1 %v774_v37  ;;  %4614 = vmatpush.msra.mxu3 %v774_v37  ;;  %v454_v20 = vsub.f32 %v5432_v39, %v8327_v6 }
  0x63   : > { %922 = vmatpush.msrb.mxu2 %v5233_v14  ;;  %1358 = vmatpush.msrb.mxu0 %v700_v21  ;;  %v582_v14 = vsub.f32 %v5441_v34, %v8314_v27  ;;  %v5470_v21 = vsub.f32 %v370_v7, %v5450_v35  ;;  %v8324_v37 = vand.u32 4294901760, %v5461_v13 }
  0x64   : > { %781 = vmatpush.msra.mxu1 %v780_v57  ;;  %4615 = vmatpush.msra.mxu3 %v780_v57  ;;  %v455_v7 = vand.u32 4294901760, %v454_v20 }
  0x65   : > { %925 = vmatpush.msrb.mxu2 %v5236_v15  ;;  %1362 = vmatpush.msrb.mxu0 %v706_v22  ;;  %v355_v15 = vld [vmem:[%s5201_s23 + $0x20] sm:$0xff]  ;;  %v8313_v30 = vand.u32 4294901760, %v5470_v21 }
  0x66   : > { %787 = vmatpush.msra.mxu1 %v786_v43  ;;  %4616 = vmatpush.msra.mxu3 %v786_v43  ;;  %v371_v22 = vld [vmem:[%s5201_s23 + $0xa0] sm:$0xff]  ;;  %v5478_v28 = vand.u32 4294901760, %v355_v15 }
  0x67   : > { %448 = vmatmul.f32.gmra.mxu0 %v447_v2  ;;  %576 = vmatmul.f32.gmra.mxu2 %v575_v61  ;;  %v5480_v57 = vand.u32 4294901760, %v371_v22  ;;  %v583_v2 = vand.u32 4294901760, %v582_v14 }
  0x68   : > { %789 = vmatmul.f32.vlgmr.msra.gmra.mxu1 %v5309_v56  ;;  %853 = vmatmul.f32.vlgmr.msra.gmra.mxu3 %v5313_v58 }
  0x69   : > { %1127 = vmatpush.msrb.mxu3 %v5215_v3  ;;  %928 = vmatpush.msrb.mxu2 %v5241_v18  ;;  %v8541_v18 = vand.u32 4294901760, %v5255_v26 }
  0x6a   : > { %1366 = vmatpush.msrb.mxu0 %v712_v25  ;;  %1545 = vmatpush.msrb.mxu1 %v5215_v3  ;;  %v5495_v3 = vsub.f32 %v355_v15, %v5478_v28  ;;  %v5507_v25 = vsub.f32 %v371_v22, %v5480_v57  ;;  %v8543_v15 = vand.u32 4294901760, %v5283_v41  ;;  %v8544_v22 = vand.u32 4294901760, %v5295_v47 }
  0x6b   : > { %1129 = vmatpush.msrb.mxu3 %v5217_v4  ;;  %931 = vmatpush.msrb.mxu2 %v5244_v19  ;;  %v462_v19 = vsub.f32 %v5461_v13, %v8324_v37  ;;  %v380_v37 = vld [vmem:[%s5201_s23 + $0xe8] sm:$0xff] }
  0x6c   : > { %1370 = vmatpush.msrb.mxu0 %v718_v29  ;;  %1547 = vmatpush.msrb.mxu1 %v5217_v4  ;;  %v590_v4 = vsub.f32 %v5470_v21, %v8313_v30  ;;  %v356_v29 = vld [vmem:[%s5201_s23 + $0x28] sm:$0xff]  ;;  %v8312_v20 = vand.u32 4294901760, %v5507_v25  ;;  %v5749_v6 = vand.u32 4294901760, %v380_v37 }
  0x6d   : > { %1131 = vmatpush.msrb.mxu3 %v5219_v5  ;;  %934 = vmatpush.msrb.mxu2 %v5255_v26  ;;  %v372_v26 = vld [vmem:[%s5201_s23 + $0xa8] sm:$0xff]  ;;  %v5516_v8 = vand.u32 4294901760, %v356_v29  ;;  %v463_v43 = vand.u32 4294901760, %v462_v19 }
  0x6e   : > { %1374 = vmatpush.msrb.mxu0 %v8541_v18  ;;  %1549 = vmatpush.msrb.mxu1 %v5219_v5  ;;  %v8323_v5 = vand.u32 4294901760, %v5495_v3  ;;  %v591_v61 = vand.u32 4294901760, %v590_v4  ;;  %v5522_v14 = vand.u32 4294901760, %v372_v26  ;;  %v8545_v18 = vand.u32 4294901760, %v5307_v55  ;;  %8563 = vst [vmem:[#allocation26_spill] sm:$0xff] %v5749_v6 }
  0x6f   : > { %456 = vmatmul.f32.gmra.mxu0 %v455_v7  ;;  %584 = vmatmul.f32.gmra.mxu2 %v583_v2  ;;  %v357_v7 = vld [vmem:[%s5201_s23 + $0x30] sm:$0xff] }
  0x70   : > { %793 = vmatmul.f32.gmra.mxu1 %v5369_v49  ;;  %857 = vmatmul.f32.gmra.mxu3 %v5371_v51  ;;  %v373_v2 = vld [vmem:[%s5201_s23 + $0xb0] sm:$0xff] }
  0x71   : > { %1133 = vmatpush.msrb.mxu3 %v5221_v9  ;;  %937 = vmatpush.msrb.mxu2 %v5272_v33  ;;  %v5535_v33 = vsub.f32 %v356_v29, %v5516_v8  ;;  %v5557_v29 = vand.u32 4294901760, %v357_v7 }
  0x72   : > { %1378 = vmatpush.msrb.mxu0 %v8542_v52  ;;  %1551 = vmatpush.msrb.mxu1 %v5221_v9  ;;  %v470_v9 = vsub.f32 %v5495_v3, %v8323_v5  ;;  %v8546_v52 = vand.u32 4294901760, %v5322_v63  ;;  %v364_v5 = vld [vmem:[%s5201_s23 + $0x68] sm:$0xff] }
  0x73   : > { %1135 = vmatpush.msrb.mxu3 %v5223_v10  ;;  %940 = vmatpush.msrb.mxu2 %v5283_v41  ;;  %v5544_v41 = vsub.f32 %v372_v26, %v5522_v14  ;;  %v5559_v26 = vand.u32 4294901760, %v373_v2 }
  0x74   : > { %1382 = vmatpush.msrb.mxu0 %v8543_v15  ;;  %1553 = vmatpush.msrb.mxu1 %v5223_v10  ;;  %v598_v10 = vsub.f32 %v5507_v25, %v8312_v20 }
  0x75   : > { %1137 = vmatpush.msrb.mxu3 %v5225_v11  ;;  %943 = vmatpush.msrb.mxu2 %v5295_v47  ;;  %v8322_v47 = vand.u32 4294901760, %v5535_v33  ;;  %v8311_v4 = vand.u32 4294901760, %v5544_v41 }
  0x76   : > { %1386 = vmatpush.msrb.mxu0 %v8544_v22  ;;  %1555 = vmatpush.msrb.mxu1 %v5225_v11  ;;  %v471_v11 = vand.u32 4294901760, %v470_v9  ;;  %v599_v19 = vand.u32 4294901760, %v598_v10  ;;  %v8548_v9 = vand.u32 4294901760, %v5350_v31 }
  0x77   : > { %464 = vmatmul.f32.gmra.mxu0 %v463_v43  ;;  %592 = vmatmul.f32.gmra.mxu2 %v591_v61  ;;  %v5581_v43 = vsub.f32 %v373_v2, %v5559_v26  ;;  %v358_v61 = vld [vmem:[%s5201_s23 + $0x38] sm:$0xff] }
  0x78   : > { %797 = vmatmul.f32.gmra.mxu1 %v5415_v48  ;;  %861 = vmatmul.f32.gmra.mxu3 %v5421_v46  ;;  %v5589_v15 = vand.u32 4294901760, %v358_v61 }
  0x79   : > { %1139 = vmatpush.msrb.mxu3 %v5238_v17  ;;  %946 = vmatpush.msrb.mxu2 %v5307_v55  ;;  %v8547_v55 = vand.u32 4294901760, %v5329_v1 }
  0x7a   : > { %1390 = vmatpush.msrb.mxu0 %v8545_v18  ;;  %1557 = vmatpush.msrb.mxu1 %v5238_v17  ;;  %v478_v17 = vsub.f32 %v5535_v33, %v8322_v47 }
  0x7b   : > { %1141 = vmatpush.msrb.mxu3 %v5251_v24  ;;  %949 = vmatpush.msrb.mxu2 %v5322_v63  ;;  %v606_v63 = vsub.f32 %v5544_v41, %v8311_v4  ;;  %v362_v4 = vld [vmem:[%s5201_s23 + $0x58] sm:$0xff] }
  0x7c   : > { %1394 = vmatpush.msrb.mxu0 %v8546_v52  ;;  %1559 = vmatpush.msrb.mxu1 %v5251_v24  ;;  %v5578_v24 = vsub.f32 %v357_v7, %v5557_v29  ;;  %v8310_v7 = vand.u32 4294901760, %v5581_v43 }
  0x7d   : > { %1143 = vmatpush.msrb.mxu3 %v5269_v32  ;;  %952 = vmatpush.msrb.mxu2 %v5329_v1  ;;  %v374_v1 = vld [vmem:[%s5201_s23 + $0xb8] sm:$0xff]  ;;  %v607_v22 = vand.u32 4294901760, %v606_v63 }
  0x7e   : > { %1398 = vmatpush.msrb.mxu0 %v8547_v55  ;;  %1561 = vmatpush.msrb.mxu1 %v5269_v32  ;;  %v479_v32 = vand.u32 4294901760, %v478_v17  ;;  %v8320_v10 = vand.u32 4294901760, %v5578_v24  ;;  %v5596_v2 = vand.u32 4294901760, %v374_v1  ;;  %v8552_v17 = vand.u32 4294901760, %v5390_v62 }
  0x7f   : > { %472 = vmatmul.f32.gmra.mxu0 %v471_v11  ;;  %600 = vmatmul.f32.gmra.mxu2 %v599_v19  ;;  %v8550_v11 = vand.u32 4294901760, %v5364_v44  ;;  %v359_v19 = vld [vmem:[%s5201_s23 + $0x40] sm:$0xff] }
  0x80   : > { %801 = vmatmul.f32.gmra.mxu1 %v5448_v54  ;;  %865 = vmatmul.f32.gmra.mxu3 %v5450_v35  ;;  %8549 = vst [vmem:[#allocation15_spill] sm:$0xff] %v5596_v2  ;;  %v5618_v18 = vsub.f32 %v374_v1, %v5596_v2  ;;  %v5627_v52 = vand.u32 4294901760, %v359_v19 }
  0x81   : > { %1145 = vmatpush.msrb.mxu3 %v5279_v38  ;;  %955 = vmatpush.msrb.mxu2 %v5350_v31  ;;  %v8551_v31 = vand.u32 4294901760, %v5378_v59 }
  0x82   : > { %1402 = vmatpush.msrb.mxu0 %v8548_v9  ;;  %1563 = vmatpush.msrb.mxu1 %v5279_v38  ;;  %v5606_v38 = vsub.f32 %v358_v61, %v5589_v15  ;;  %v8309_v61 = vand.u32 4294901760, %v5618_v18 }
  0x83   : > { %1147 = vmatpush.msrb.mxu3 %v5291_v45  ;;  %958 = vmatpush.msrb.mxu2 %v5364_v44  ;;  %v486_v44 = vsub.f32 %v5578_v24, %v8320_v10 }
  0x84   : > { %1406 = vmatpush.msrb.mxu0 %v8550_v11  ;;  %1565 = vmatpush.msrb.mxu1 %v5291_v45  ;;  %v614_v45 = vsub.f32 %v5581_v43, %v8310_v7 }
  0x85   : > { %1149 = vmatpush.msrb.mxu3 %v5300_v50  ;;  %961 = vmatpush.msrb.mxu2 %v5378_v59  ;;  %v375_v59 = vld [vmem:[%s5201_s23 + $0xc0] sm:$0xff]  ;;  %v487_v55 = vand.u32 4294901760, %v486_v44 }
  0x86   : > { %1410 = vmatpush.msrb.mxu0 %v8551_v31  ;;  %1567 = vmatpush.msrb.mxu1 %v5300_v50  ;;  %v8318_v50 = vand.u32 4294901760, %v5606_v38  ;;  %v615_v63 = vand.u32 4294901760, %v614_v45  ;;  %v5633_v1 = vand.u32 4294901760, %v375_v59 }
  0x87   : > { %480 = vmatmul.f32.gmra.mxu0 %v479_v32  ;;  %608 = vmatmul.f32.gmra.mxu2 %v607_v22  ;;  %v622_v32 = vsub.f32 %v5618_v18, %v8309_v61  ;;  %v376_v22 = vld [vmem:[%s5201_s23 + $0xc8] sm:$0xff] }
  0x88   : > { %805 = vmatmul.f32.gmra.mxu1 %v5478_v28  ;;  %869 = vmatmul.f32.gmra.mxu3 %v5480_v57  ;;  %8553 = vst [vmem:[#allocation16_spill] sm:$0xff] %v5633_v1  ;;  %v5649_v9 = vsub.f32 %v375_v59, %v5633_v1 }
  0x89   : > { %1151 = vmatpush.msrb.mxu3 %v5318_v60  ;;  %964 = vmatpush.msrb.mxu2 %v5390_v62  ;;  %v494_v62 = vsub.f32 %v5606_v38, %v8318_v50  ;;  %v623_v31 = vand.u32 4294901760, %v622_v32  ;;  %v379_v50 = vld [vmem:[%s5201_s23 + $0xe0] sm:$0xff] }
  0x8a   : > { %1414 = vmatpush.msrb.mxu0 %v8552_v17  ;;  %1569 = vmatpush.msrb.mxu1 %v5318_v60  ;;  %v5642_v60 = vsub.f32 %v359_v19, %v5627_v52  ;;  %8554 = vst [vmem:[#allocation17_spill] sm:$0xff] %v5649_v9  ;;  %v8308_v44 = vand.u32 4294901760, %v5649_v9  ;;  %v5661_v19 = vand.u32 4294901760, %v376_v22 }
  0x8b   : > { %1153 = vmatpush.msrb.mxu3 %v5326_v0 }
  0x8c   : > { %1571 = vmatpush.msrb.mxu1 %v5326_v0  ;;  %v360_v0 = vld [vmem:[%s5201_s23 + $0x48] sm:$0xff]  ;;  %v8317_v11 = vand.u32 4294901760, %v5642_v60  ;;  %8555 = vst [vmem:[#allocation18_spill] sm:$0xff] %v5661_v19 }
  0x8d   : > { %1155 = vmatpush.msrb.mxu3 %v5340_v16  ;;  %v5659_v45 = vand.u32 4294901760, %v360_v0 }
  0x8e   : > { %1573 = vmatpush.msrb.mxu1 %v5340_v16  ;;  %v495_v16 = vand.u32 4294901760, %v494_v62  ;;  %v502_v59 = vsub.f32 %v5642_v60, %v8317_v11  ;;  %v377_v62 = vld [vmem:[%s5201_s23 + $0xd0] sm:$0xff] }
  0x8f   : > { %488 = vmatmul.f32.gmra.mxu0 %v487_v55  ;;  %616 = vmatmul.f32.gmra.mxu2 %v615_v63  ;;  %v5670_v17 = vsub.f32 %v360_v0, %v5659_v45  ;;  %v5673_v55 = vsub.f32 %v376_v22, %v5661_v19  ;;  %v361_v63 = vld [vmem:[%s5201_s23 + $0x50] sm:$0xff]  ;;  %v5683_v61 = vand.u32 4294901760, %v377_v62 }
  0x90   : > { %809 = vmatmul.f32.gmra.mxu1 %v5516_v8  ;;  %873 = vmatmul.f32.gmra.mxu3 %v5522_v14  ;;  %v503_v32 = vand.u32 4294901760, %v502_v59 }
  0x91   : > { %1157 = vmatpush.msrb.mxu3 %v5356_v36  ;;  %1575 = vmatpush.msrb.mxu1 %v5356_v36  ;;  %v630_v36 = vsub.f32 %v5649_v9, %v8308_v44  ;;  %8556 = vst [vmem:[#allocation19_spill] sm:$0xff] %v5673_v55  ;;  %v8316_v44 = vand.u32 4294901760, %v5670_v17  ;;  %v8315_v0 = vand.u32 4294901760, %v5673_v55 }
  0x92   : > { %8557 = vst [vmem:[#allocation20_spill] sm:$0xff] %v5683_v61 }
  0x93   : > { %v510_v7 = vsub.f32 %v5670_v17, %v8316_v44  ;;  %v638_v59 = vsub.f32 %v5673_v55, %v8315_v0  ;;  %v382_v55 = vld [vmem:[%s5201_s23 + $0xf8] sm:$0xff] }
  0x94   : > { %v5793_v9 = vand.u32 4294901760, %v382_v55 }
  0x95   : > { %v511_v20 = vand.u32 4294901760, %v510_v7  ;;  %v639_v30 = vand.u32 4294901760, %v638_v59  ;;  %v363_v59 = vld [vmem:[%s5201_s23 + $0x60] sm:$0xff] }
  0x96   : > { %v5725_v10 = vand.u32 4294901760, %v363_v59  ;;  %8567 = vst [vmem:[#allocation30_spill] sm:$0xff] %v5793_v9 }
  0x97   : > { %496 = vmatmul.f32.gmra.mxu0 %v495_v16  ;;  %624 = vmatmul.f32.gmra.mxu2 %v623_v31  ;;  %v5679_v16 = vand.u32 4294901760, %v361_v63  ;;  %v631_v31 = vand.u32 4294901760, %v630_v36  ;;  %v5695_v36 = vsub.f32 %v377_v62, %v5683_v61 }
  0x98   : > { %813 = vmatmul.f32.gmra.mxu1 %v5557_v29  ;;  %877 = vmatmul.f32.gmra.mxu3 %v5559_v26 }
  0x99   : > { %v5686_v22 = vsub.f32 %v361_v63, %v5679_v16  ;;  %8558 = vst [vmem:[#allocation21_spill] sm:$0xff] %v5695_v36  ;;  %v378_v63 = vld [vmem:[%s5201_s23 + $0xd8] sm:$0xff]  ;;  %v8321_v27 = vand.u32 4294901760, %v5695_v36 }
  0x9a   : > { %v5705_v0 = vand.u32 4294901760, %v378_v63 }
  0x9b   : > { %v646_v11 = vsub.f32 %v5695_v36, %v8321_v27  ;;  %v5727_v27 = vand.u32 4294901760, %v379_v50 }
  0x9c   : > { %8559 = vst [vmem:[#allocation22_spill] sm:$0xff] %v5705_v0  ;;  %v5717_v7 = vsub.f32 %v378_v63, %v5705_v0 }
  0x9d   : > { %8561 = vst [vmem:[#allocation24_spill] sm:$0xff] %v5727_v27 }
  0x9e   : > { %8560 = vst [vmem:[#allocation23_spill] sm:$0xff] %v5717_v7 }
  0x9f   : > { %504 = vmatmul.f32.gmra.mxu0 %v503_v32  ;;  %632 = vmatmul.f32.gmra.mxu2 %v631_v31  ;;  %v8319_v32 = vand.u32 4294901760, %v5686_v22  ;;  %v5702_v31 = vand.u32 4294901760, %v362_v4 }
  0xa0   : > { %817 = vmatmul.f32.gmra.mxu1 %v5589_v15  ;;  %881 = vmatmul.f32.gmra.mxu3 %v5596_v2  ;;  %v1751_v2 = vld [vmem:[#allocation7 + $0x70] sm:$0xff] }
  0xa1   : > { %v518_v62 = vsub.f32 %v5686_v22, %v8319_v32  ;;  %v5711_v44 = vsub.f32 %v362_v4, %v5702_v31 }
  0xa3   : > { %v519_v32 = vand.u32 4294901760, %v518_v62  ;;  %v8325_v4 = vand.u32 4294901760, %v5711_v44  ;;  %v5736_v62 = vsub.f32 %v363_v59, %v5725_v10 }
  0xa5   : > { %v526_v63 = vsub.f32 %v5711_v44, %v8325_v4 }
  0xa7   : > { %512 = vmatmul.f32.gmra.mxu0 %v511_v20  ;;  %640 = vmatmul.f32.gmra.mxu2 %v639_v30  ;;  %v647_v20 = vand.u32 4294901760, %v646_v11  ;;  %v8326_v30 = vand.u32 4294901760, %v5717_v7  ;;  %v5739_v11 = vsub.f32 %v379_v50, %v5727_v27 }
  0xa8   : > { %821 = vmatmul.f32.gmra.mxu1 %v5627_v52  ;;  %885 = vmatmul.f32.gmra.mxu3 %v5633_v1 }
  0xa9   : > { %v654_v47 = vsub.f32 %v5717_v7, %v8326_v30  ;;  %8562 = vst [vmem:[#allocation25_spill] sm:$0xff] %v5739_v11  ;;  %v8331_v30 = vand.u32 4294901760, %v5736_v62  ;;  %v8336_v59 = vand.u32 4294901760, %v5739_v11  ;;  %v365_v7 = vld [vmem:[%s5201_s23 + $0x70] sm:$0xff] }
  0xab   : > { %v655_v4 = vand.u32 4294901760, %v654_v47  ;;  %v534_v53 = vsub.f32 %v5736_v62, %v8331_v30  ;;  %v5761_v47 = vsub.f32 %v380_v37, %v5749_v6 }
  0xad   : > { %8564 = vst [vmem:[#allocation27_spill] sm:$0xff] %v5761_v47  ;;  %v535_v30 = vand.u32 4294901760, %v534_v53 }
  0xaf   : > { %520 = vmatmul.f32.gmra.mxu0 %v519_v32  ;;  %648 = vmatmul.f32.gmra.mxu2 %v647_v20  ;;  %v527_v32 = vand.u32 4294901760, %v526_v63  ;;  %v5745_v20 = vand.u32 4294901760, %v364_v5  ;;  %v662_v63 = vsub.f32 %v5739_v11, %v8336_v59 }
  0xb0   : > { %825 = vmatmul.f32.gmra.mxu1 %v5659_v45  ;;  %889 = vmatmul.f32.gmra.mxu3 %v5661_v19  ;;  %v8348_v19 = vand.u32 4294901760, %v5761_v47 }
  0xb1   : > { %v5752_v50 = vsub.f32 %v364_v5, %v5745_v20  ;;  %v381_v5 = vld [vmem:[%s5201_s23 + $0xf0] sm:$0xff]  ;;  %v663_v36 = vand.u32 4294901760, %v662_v63  ;;  %v366_v63 = vld [vmem:[%s5201_s23 + $0x78] sm:$0xff] }
  0xb2   : > { %v5771_v59 = vand.u32 4294901760, %v381_v5 }
  0xb4   : > { %8565 = vst [vmem:[#allocation28_spill] sm:$0xff] %v5771_v59  ;;  %v5783_v53 = vsub.f32 %v381_v5, %v5771_v59 }
  0xb6   : > { %8566 = vst [vmem:[#allocation29_spill] sm:$0xff] %v5783_v53 }
  0xb7   : > { %528 = vmatmul.f32.gmra.mxu0 %v527_v32  ;;  %656 = vmatmul.f32.gmra.mxu2 %v655_v4  ;;  %v8345_v4 = vand.u32 4294901760, %v5752_v50  ;;  %v5768_v32 = vand.u32 4294901760, %v365_v7 }
  0xb8   : > { %829 = vmatmul.f32.gmra.mxu1 %v5679_v16  ;;  %893 = vmatmul.f32.gmra.mxu3 %v5683_v61  ;;  %v670_v61 = vsub.f32 %v5761_v47, %v8348_v19  ;;  %v1752_v19 = vld [vmem:[#allocation7 + $0x78] sm:$0xff] }
  0xb9   : > { %v542_v37 = vsub.f32 %v5752_v50, %v8345_v4  ;;  %v5777_v11 = vsub.f32 %v365_v7, %v5768_v32 }
  0xba   : > { %v671_v7 = vand.u32 4294901760, %v670_v61  ;;  %v5805_v61 = vsub.f32 %v382_v55, %v5793_v9 }
  0xbb   : > { %v543_v1 = vand.u32 4294901760, %v542_v37  ;;  %v8354_v4 = vand.u32 4294901760, %v5777_v11 }
  0xbc   : > { %8568 = vst [vmem:[#allocation31_spill] sm:$0xff] %v5805_v61  ;;  %v8362_v55 = vand.u32 4294901760, %v5805_v61 }
  0xbd   : > { %v550_v5 = vsub.f32 %v5777_v11, %v8354_v4 }
  0xbf   : > { %536 = vmatmul.f32.gmra.mxu0 %v535_v30  ;;  %664 = vmatmul.f32.gmra.mxu2 %v663_v36  ;;  %v8353_v30 = vand.u32 4294901760, %v5783_v53  ;;  %v5791_v36 = vand.u32 4294901760, %v366_v63 }
  0xc0   : > { %833 = vmatmul.f32.gmra.mxu1 %v5702_v31  ;;  %897 = vmatmul.f32.gmra.mxu3 %v5705_v0  ;;  %v5807_v0 = vand.u32 4294901760, %v1752_v19 }
  0xc1   : > { %v678_v37 = vsub.f32 %v5783_v53, %v8353_v30  ;;  %v5802_v47 = vsub.f32 %v366_v63, %v5791_v36 }
  0xc2   : > { %8569 = vst [vmem:[#allocation32_spill] sm:$0xff] %v5807_v0  ;;  %1758 = vmatpush.msra.mxu2 %v5807_v0  ;;  %2481 = vmatpush.msra.mxu1 %v5807_v0 }
  0xc3   : > { %v679_v30 = vand.u32 4294901760, %v678_v37  ;;  %v8365_v63 = vand.u32 4294901760, %v5802_v47 }
  0xc7   : > { %544 = vmatmul.f32.gmra.mxu0 %v543_v1  ;;  %672 = vmatmul.f32.gmra.mxu2 %v671_v7  ;;  %v5813_v1 = vsub.f32 %v1752_v19, %v5807_v0  ;;  %v551_v7 = vand.u32 4294901760, %v550_v5  ;;  %v558_v19 = vsub.f32 %v5802_v47, %v8365_v63  ;;  %v686_v5 = vsub.f32 %v5805_v61, %v8362_v55 }
  0xc8   : > { %837 = vmatmul.f32.gmra.mxu1 %v5725_v10  ;;  %901 = vmatmul.f32.gmra.mxu3 %v5727_v27 }
  0xc9   : > { %v8364_v4 = vand.u32 4294901760, %v5813_v1  ;;  %2273 = vmatpush.msra.mxu0 %v5813_v1  ;;  %v559_v0 = vand.u32 4294901760, %v558_v19  ;;  %v687_v27 = vand.u32 4294901760, %v686_v5  ;;  %v5854_v5 = vld [vmem:[%s8286_s2] ss:$0 sm:$0xff] }
  0xcb   : > { %v2049_v53 = vsub.f32 %v5813_v1, %v8364_v4 }
  0xcd   : > { %v2050_v37 = vand.u32 4294901760, %v2049_v53 }
  0xcf   : > { %552 = vmatmul.f32.gmra.mxu0 %v551_v7  ;;  %680 = vmatmul.f32.gmra.mxu2 %v679_v30  ;;  %v5831_v30 = vand.u32 4294901760, %v1751_v2 }
  0xd0   : > { %841 = vmatmul.f32.gmra.mxu1 %v5745_v20  ;;  %905 = vmatmul.f32.gmra.mxu3 %v5749_v6 }
  0xd1   : > { %2051 = vmatpush.msra.mxu3 %v2050_v37  ;;  %8570 = vst [vmem:[#allocation33_spill] sm:$0xff] %v5831_v30  ;;  %1760 = vmatpush.msra.mxu2 %v5831_v30  ;;  %v5837_v53 = vsub.f32 %v1751_v2, %v5831_v30 }
  0xd2   : > { %2483 = vmatpush.msra.mxu1 %v5831_v30 }
  0xd3   : > { %v8363_v7 = vand.u32 4294901760, %v5837_v53  ;;  %2276 = vmatpush.msra.mxu0 %v5837_v53 }
  0xd7   : > { %560 = vmatmul.f32.gmra.mxu0 %v559_v0  ;;  %688 = vmatmul.f32.gmra.mxu2 %v687_v27  ;;  %v2055_v27 = vsub.f32 %v5837_v53, %v8363_v7  ;;  %v1750_v7 = vld [vmem:[#allocation7 + $0x68] sm:$0xff] }
  0xd8   : > { %845 = vmatmul.f32.gmra.mxu1 %v5768_v32  ;;  %909 = vmatmul.f32.gmra.mxu3 %v5771_v59 }
  0xd9   : > { %v2056_v0 = vand.u32 4294901760, %v2055_v27  ;;  %v5862_v27 = vand.u32 4294901760, %v1750_v7 }
  0xdb   : > { %2057 = vmatpush.msra.mxu3 %v2056_v0  ;;  %8571 = vst [vmem:[#allocation34_spill] sm:$0xff] %v5862_v27  ;;  %v8572_v0 = vand.u32 4294901760, %v5336_v12  ;;  %1762 = vmatpush.msra.mxu2 %v5862_v27  ;;  %v5870_v63 = vsub.f32 %v1750_v7, %v5862_v27 }
  0xdc   : > { %v5842_v19 = vpop.f32.mrf.mxu0  ;;  %2485 = vmatpush.msra.mxu1 %v5862_v27  ;;  %v8575_v27 = vand.u32 4294901760, %v5398_v40 }
  0xdd   : > { %8573 = vst [vmem:[#allocation35_spill] sm:$0xff] %v5870_v63  ;;  %v8376_v59 = vand.u32 4294901760, %v5870_v63  ;;  %2279 = vmatpush.msra.mxu0 %v5870_v63 }
  0xdf   : > { %967 = vmatmul.f32.vlgmr.msrb.gmra.mxu2 %v5336_v12  ;;  %1416 = vmatmul.f32.vlgmr.msrb.gmra.mxu0 %v5309_v56 }
  0xe0   : > { %849 = vmatmul.f32.gmra.mxu1 %v5791_v36  ;;  %913 = vmatmul.f32.gmra.mxu3 %v5793_v9 }
  0xe2   : > { %v569_v2 = vpop.f32.mrf.mxu2 }
  0xe3   : > { %v570_v4 = vadd.f32 %v5854_v5, %v569_v2 }
  0xe4   : > { %v5856_v37 = vpop.f32.mrf.mxu0 }
  0xe5   : > { %v5858_v55 = vpop.f32.mrf.mxu1 }
  0xe7   : > { %972 = vmatmul.f32.gmra.mxu2 %v5398_v40  ;;  %1420 = vmatmul.f32.gmra.mxu0 %v5369_v49 }
  0xe8   : > { %1161 = vmatmul.f32.vlgmr.msrb.gmra.mxu3 %v8572_v0  ;;  %1577 = vmatmul.f32.vlgmr.msrb.gmra.mxu1 %v5309_v56  ;;  %v2061_v56 = vsub.f32 %v5870_v63, %v8376_v59  ;;  %v1749_v63 = vld [vmem:[#allocation7 + $0x60] sm:$0xff] }
  0xea   : > { %v577_v9 = vpop.f32.mrf.mxu2  ;;  %v2062_v7 = vand.u32 4294901760, %v2061_v56 }
  0xeb   : > { %v854_v61 = vpop.f32.mrf.mxu3  ;;  %v578_v0 = vadd.f32 %v5854_v5, %v577_v9  ;;  %v5898_v9 = vand.u32 4294901760, %v1749_v63 }
  0xec   : > { %v5875_v30 = vadd.f32 %v854_v61, %v570_v4  ;;  %v5877_v2 = vpop.f32.mrf.mxu0  ;;  %2063 = vmatpush.msra.mxu3 %v2062_v7 }
  0xed   : > { %v5879_v12 = vpop.f32.mrf.mxu1  ;;  %8577 = vst [vmem:[#allocation38_spill] sm:$0xff] %v5898_v9  ;;  %1764 = vmatpush.msra.mxu2 %v5898_v9  ;;  %2487 = vmatpush.msra.mxu1 %v5898_v9 }
  0xee   : > { %8574 = vst [vmem:[#allocation36_spill] sm:$0xff] %v5875_v30 }
  0xef   : > { %977 = vmatmul.f32.gmra.mxu2 %v5432_v39  ;;  %1424 = vmatmul.f32.gmra.mxu0 %v5415_v48 }
  0xf0   : > { %1167 = vmatmul.f32.gmra.mxu3 %v8575_v27  ;;  %1581 = vmatmul.f32.gmra.mxu1 %v5369_v49  ;;  %v8578_v49 = vand.u32 4294901760, %v5432_v39  ;;  %v5906_v27 = vsub.f32 %v1749_v63, %v5898_v9 }
  0xf2   : > { %v585_v4 = vpop.f32.mrf.mxu2  ;;  %8579 = vst [vmem:[#allocation39_spill] sm:$0xff] %v5906_v27  ;;  %2282 = vmatpush.msra.mxu0 %v5906_v27 }
  0xf3   : > { %v858_v61 = vpop.f32.mrf.mxu3  ;;  %v586_v40 = vadd.f32 %v5854_v5, %v585_v4 }
  0xf4   : > { %v5890_v30 = vadd.f32 %v858_v61, %v578_v0  ;;  %v5892_v6 = vpop.f32.mrf.mxu0  ;;  %v8379_v0 = vand.u32 4294901760, %v5906_v27 }
  0xf5   : > { %v5894_v59 = vpop.f32.mrf.mxu1 }
  0xf6   : > { %8576 = vst [vmem:[#allocation37_spill] sm:$0xff] %v5890_v30  ;;  %v8581_v30 = vand.u32 4294901760, %v5461_v13 }
  0xf7   : > { %982 = vmatmul.f32.gmra.mxu2 %v5461_v13  ;;  %1428 = vmatmul.f32.gmra.mxu0 %v5448_v54 }
  0xf8   : > { %1173 = vmatmul.f32.gmra.mxu3 %v8578_v49  ;;  %1585 = vmatmul.f32.gmra.mxu1 %v5415_v48  ;;  %v2067_v48 = vsub.f32 %v5906_v27, %v8379_v0  ;;  %v1748_v27 = vld [vmem:[#allocation7 + $0x58] sm:$0xff] }
  0xfa   : > { %v593_v56 = vpop.f32.mrf.mxu2  ;;  %v2068_v63 = vand.u32 4294901760, %v2067_v48 }
  0xfb   : > { %v862_v7 = vpop.f32.mrf.mxu3  ;;  %v594_v49 = vadd.f32 %v5854_v5, %v593_v56  ;;  %v5934_v56 = vand.u32 4294901760, %v1748_v27 }
  0xfc   : > { %v5911_v61 = vadd.f32 %v862_v7, %v586_v40  ;;  %v5913_v4 = vpop.f32.mrf.mxu0  ;;  %2069 = vmatpush.msra.mxu3 %v2068_v63 }
  0xfd   : > { %v5915_v39 = vpop.f32.mrf.mxu1  ;;  %8583 = vst [vmem:[#allocation42_spill] sm:$0xff] %v5934_v56  ;;  %1766 = vmatpush.msra.mxu2 %v5934_v56  ;;  %2489 = vmatpush.msra.mxu1 %v5934_v56 }
  0xfe   : > { %8580 = vst [vmem:[#allocation40_spill] sm:$0xff] %v5911_v61 }
  0xff   : > { %987 = vmatmul.f32.gmra.mxu2 %v5495_v3  ;;  %1432 = vmatmul.f32.gmra.mxu0 %v5478_v28 }
 0x100   : > { %1179 = vmatmul.f32.gmra.mxu3 %v8581_v30  ;;  %1589 = vmatmul.f32.gmra.mxu1 %v5448_v54  ;;  %v8584_v54 = vand.u32 4294901760, %v5495_v3  ;;  %v5942_v30 = vsub.f32 %v1748_v27, %v5934_v56 }
 0x102   : > { %v601_v40 = vpop.f32.mrf.mxu2  ;;  %8585 = vst [vmem:[#allocation43_spill] sm:$0xff] %v5942_v30  ;;  %2285 = vmatpush.msra.mxu0 %v5942_v30 }
 0x103   : > { %v866_v7 = vpop.f32.mrf.mxu3  ;;  %v602_v13 = vadd.f32 %v5854_v5, %v601_v40 }
 0x104   : > { %v5926_v61 = vadd.f32 %v866_v7, %v594_v49  ;;  %v5928_v9 = vpop.f32.mrf.mxu0  ;;  %v8382_v49 = vand.u32 4294901760, %v5942_v30 }
 0x105   : > { %v5930_v0 = vpop.f32.mrf.mxu1 }
 0x106   : > { %8582 = vst [vmem:[#allocation41_spill] sm:$0xff] %v5926_v61  ;;  %v8587_v61 = vand.u32 4294901760, %v5535_v33 }
 0x107   : > { %992 = vmatmul.f32.gmra.mxu2 %v5535_v33  ;;  %1436 = vmatmul.f32.gmra.mxu0 %v5516_v8 }
 0x108   : > { %1185 = vmatmul.f32.gmra.mxu3 %v8584_v54  ;;  %1593 = vmatmul.f32.gmra.mxu1 %v5478_v28  ;;  %v2073_v28 = vsub.f32 %v5942_v30, %v8382_v49  ;;  %v1747_v30 = vld [vmem:[#allocation7 + $0x50] sm:$0xff] }
 0x10a   : > { %v609_v48 = vpop.f32.mrf.mxu2  ;;  %v2074_v27 = vand.u32 4294901760, %v2073_v28 }
 0x10b   : > { %v870_v63 = vpop.f32.mrf.mxu3  ;;  %v610_v54 = vadd.f32 %v5854_v5, %v609_v48  ;;  %v5970_v48 = vand.u32 4294901760, %v1747_v30 }
 0x10c   : > { %v5947_v7 = vadd.f32 %v870_v63, %v602_v13  ;;  %v5949_v40 = vpop.f32.mrf.mxu0  ;;  %2075 = vmatpush.msra.mxu3 %v2074_v27 }
 0x10d   : > { %v5951_v3 = vpop.f32.mrf.mxu1  ;;  %8589 = vst [vmem:[#allocation46_spill] sm:$0xff] %v5970_v48  ;;  %1768 = vmatpush.msra.mxu2 %v5970_v48  ;;  %2491 = vmatpush.msra.mxu1 %v5970_v48 }
 0x10e   : > { %8586 = vst [vmem:[#allocation44_spill] sm:$0xff] %v5947_v7 }
 0x10f   : > { %997 = vmatmul.f32.gmra.mxu2 %v5578_v24  ;;  %1440 = vmatmul.f32.gmra.mxu0 %v5557_v29 }
 0x110   : > { %1191 = vmatmul.f32.gmra.mxu3 %v8587_v61  ;;  %1597 = vmatmul.f32.gmra.mxu1 %v5516_v8  ;;  %v8590_v8 = vand.u32 4294901760, %v5578_v24  ;;  %v5978_v61 = vsub.f32 %v1747_v30, %v5970_v48 }
 0x112   : > { %v617_v13 = vpop.f32.mrf.mxu2  ;;  %8591 = vst [vmem:[#allocation47_spill] sm:$0xff] %v5978_v61  ;;  %2288 = vmatpush.msra.mxu0 %v5978_v61 }
 0x113   : > { %v874_v63 = vpop.f32.mrf.mxu3  ;;  %v618_v33 = vadd.f32 %v5854_v5, %v617_v13 }
 0x114   : > { %v5962_v7 = vadd.f32 %v874_v63, %v610_v54  ;;  %v5964_v56 = vpop.f32.mrf.mxu0  ;;  %v8385_v54 = vand.u32 4294901760, %v5978_v61 }
 0x115   : > { %v5966_v49 = vpop.f32.mrf.mxu1 }
 0x116   : > { %8588 = vst [vmem:[#allocation45_spill] sm:$0xff] %v5962_v7  ;;  %v8593_v7 = vand.u32 4294901760, %v5606_v38 }
 0x117   : > { %1002 = vmatmul.f32.gmra.mxu2 %v5606_v38  ;;  %1444 = vmatmul.f32.gmra.mxu0 %v5589_v15 }
 0x118   : > { %1197 = vmatmul.f32.gmra.mxu3 %v8590_v8  ;;  %1601 = vmatmul.f32.gmra.mxu1 %v5557_v29  ;;  %v2079_v29 = vsub.f32 %v5978_v61, %v8385_v54  ;;  %v1746_v61 = vld [vmem:[#allocation7 + $0x48] sm:$0xff] }
 0x11a   : > { %v625_v28 = vpop.f32.mrf.mxu2  ;;  %v2080_v30 = vand.u32 4294901760, %v2079_v29 }
 0x11b   : > { %v878_v27 = vpop.f32.mrf.mxu3  ;;  %v626_v8 = vadd.f32 %v5854_v5, %v625_v28  ;;  %v6006_v28 = vand.u32 4294901760, %v1746_v61 }
 0x11c   : > { %v5983_v63 = vadd.f32 %v878_v27, %v618_v33  ;;  %v5985_v13 = vpop.f32.mrf.mxu0  ;;  %2081 = vmatpush.msra.mxu3 %v2080_v30 }
 0x11d   : > { %v5987_v24 = vpop.f32.mrf.mxu1  ;;  %8595 = vst [vmem:[#allocation50_spill] sm:$0xff] %v6006_v28  ;;  %1770 = vmatpush.msra.mxu2 %v6006_v28  ;;  %2493 = vmatpush.msra.mxu1 %v6006_v28 }
 0x11e   : > { %8592 = vst [vmem:[#allocation48_spill] sm:$0xff] %v5983_v63 }
 0x11f   : > { %1007 = vmatmul.f32.gmra.mxu2 %v5642_v60  ;;  %1448 = vmatmul.f32.gmra.mxu0 %v5627_v52 }
 0x120   : > { %1203 = vmatmul.f32.gmra.mxu3 %v8593_v7  ;;  %1605 = vmatmul.f32.gmra.mxu1 %v5589_v15  ;;  %v8596_v15 = vand.u32 4294901760, %v5642_v60  ;;  %v6014_v7 = vsub.f32 %v1746_v61, %v6006_v28 }
 0x122   : > { %v633_v33 = vpop.f32.mrf.mxu2  ;;  %8597 = vst [vmem:[#allocation51_spill] sm:$0xff] %v6014_v7  ;;  %2291 = vmatpush.msra.mxu0 %v6014_v7 }
 0x123   : > { %v882_v27 = vpop.f32.mrf.mxu3  ;;  %v634_v38 = vadd.f32 %v5854_v5, %v633_v33 }
 0x124   : > { %v5998_v63 = vadd.f32 %v882_v27, %v626_v8  ;;  %v6000_v48 = vpop.f32.mrf.mxu0  ;;  %v8388_v8 = vand.u32 4294901760, %v6014_v7 }
 0x125   : > { %v6002_v54 = vpop.f32.mrf.mxu1 }
 0x126   : > { %8594 = vst [vmem:[#allocation49_spill] sm:$0xff] %v5998_v63  ;;  %v8599_v63 = vand.u32 4294901760, %v5670_v17 }
 0x127   : > { %1012 = vmatmul.f32.gmra.mxu2 %v5670_v17  ;;  %1452 = vmatmul.f32.gmra.mxu0 %v5659_v45 }
 0x128   : > { %1209 = vmatmul.f32.gmra.mxu3 %v8596_v15  ;;  %1609 = vmatmul.f32.gmra.mxu1 %v5627_v52  ;;  %v2085_v52 = vsub.f32 %v6014_v7, %v8388_v8  ;;  %v1745_v7 = vld [vmem:[#allocation7 + $0x40] sm:$0xff] }
 0x12a   : > { %v641_v29 = vpop.f32.mrf.mxu2  ;;  %v2086_v61 = vand.u32 4294901760, %v2085_v52 }
 0x12b   : > { %v886_v30 = vpop.f32.mrf.mxu3  ;;  %v642_v15 = vadd.f32 %v5854_v5, %v641_v29  ;;  %v6042_v29 = vand.u32 4294901760, %v1745_v7 }
 0x12c   : > { %v6019_v27 = vadd.f32 %v886_v30, %v634_v38  ;;  %v6021_v33 = vpop.f32.mrf.mxu0  ;;  %2087 = vmatpush.msra.mxu3 %v2086_v61 }
 0x12d   : > { %v6023_v60 = vpop.f32.mrf.mxu1  ;;  %8601 = vst [vmem:[#allocation54_spill] sm:$0xff] %v6042_v29  ;;  %1772 = vmatpush.msra.mxu2 %v6042_v29  ;;  %2495 = vmatpush.msra.mxu1 %v6042_v29 }
 0x12e   : > { %8598 = vst [vmem:[#allocation52_spill] sm:$0xff] %v6019_v27 }
 0x12f   : > { %1017 = vmatmul.f32.gmra.mxu2 %v5686_v22  ;;  %1456 = vmatmul.f32.gmra.mxu0 %v5679_v16 }
 0x130   : > { %1215 = vmatmul.f32.gmra.mxu3 %v8599_v63  ;;  %1613 = vmatmul.f32.gmra.mxu1 %v5659_v45  ;;  %v8602_v45 = vand.u32 4294901760, %v5686_v22  ;;  %v6050_v63 = vsub.f32 %v1745_v7, %v6042_v29 }
 0x132   : > { %v649_v38 = vpop.f32.mrf.mxu2  ;;  %8603 = vst [vmem:[#allocation55_spill] sm:$0xff] %v6050_v63  ;;  %2294 = vmatpush.msra.mxu0 %v6050_v63 }
 0x133   : > { %v890_v30 = vpop.f32.mrf.mxu3  ;;  %v650_v17 = vadd.f32 %v5854_v5, %v649_v38 }
 0x134   : > { %v6034_v27 = vadd.f32 %v890_v30, %v642_v15  ;;  %v6036_v28 = vpop.f32.mrf.mxu0  ;;  %v8391_v15 = vand.u32 4294901760, %v6050_v63 }
 0x135   : > { %v6038_v8 = vpop.f32.mrf.mxu1 }
 0x136   : > { %8600 = vst [vmem:[#allocation53_spill] sm:$0xff] %v6034_v27  ;;  %v8606_v27 = vand.u32 4294901760, %v5711_v44 }
 0x137   : > { %1022 = vmatmul.f32.gmra.mxu2 %v5711_v44  ;;  %1460 = vmatmul.f32.gmra.mxu0 %v5702_v31 }
 0x138   : > { %1221 = vmatmul.f32.gmra.mxu3 %v8602_v45  ;;  %1617 = vmatmul.f32.gmra.mxu1 %v5679_v16  ;;  %v2091_v16 = vsub.f32 %v6050_v63, %v8391_v15  ;;  %v1744_v63 = vld [vmem:[#allocation7 + $0x38] sm:$0xff] }
 0x13a   : > { %v657_v52 = vpop.f32.mrf.mxu2  ;;  %v2092_v7 = vand.u32 4294901760, %v2091_v16 }
 0x13b   : > { %v894_v61 = vpop.f32.mrf.mxu3  ;;  %v658_v45 = vadd.f32 %v5854_v5, %v657_v52 }
 0x13c   : > { %v6055_v30 = vadd.f32 %v894_v61, %v650_v17  ;;  %v6057_v38 = vpop.f32.mrf.mxu0  ;;  %2093 = vmatpush.msra.mxu3 %v2092_v7 }
 0x13d   : > { %8605 = vst [vmem:[#allocation57_spill] sm:$0xff] %v6057_v38  ;;  %v6059_v22 = vpop.f32.mrf.mxu1  ;;  %v6076_v38 = vand.u32 4294901760, %v1744_v63 }
 0x13e   : > { %8604 = vst [vmem:[#allocation56_spill] sm:$0xff] %v6055_v30 }
 0x13f   : > { %1027 = vmatmul.f32.gmra.mxu2 %v5736_v62  ;;  %1464 = vmatmul.f32.gmra.mxu0 %v5725_v10  ;;  %8608 = vst [vmem:[#allocation59_spill] sm:$0xff] %v6076_v38 }
 0x140   : > { %1227 = vmatmul.f32.gmra.mxu3 %v8606_v27  ;;  %1621 = vmatmul.f32.gmra.mxu1 %v5702_v31  ;;  %v8609_v31 = vand.u32 4294901760, %v5736_v62  ;;  %v6085_v27 = vsub.f32 %v1744_v63, %v6076_v38 }
 0x141   : > { %1774 = vmatpush.msra.mxu2 %v6076_v38  ;;  %2497 = vmatpush.msra.mxu1 %v6076_v38 }
 0x142   : > { %v665_v17 = vpop.f32.mrf.mxu2  ;;  %v8393_v16 = vand.u32 4294901760, %v6085_v27  ;;  %2297 = vmatpush.msra.mxu0 %v6085_v27 }
 0x143   : > { %v898_v61 = vpop.f32.mrf.mxu3  ;;  %v666_v44 = vadd.f32 %v5854_v5, %v665_v17 }
 0x144   : > { %v6070_v30 = vadd.f32 %v898_v61, %v658_v45  ;;  %v6072_v29 = vpop.f32.mrf.mxu0 }
 0x145   : > { %v6074_v15 = vpop.f32.mrf.mxu1 }
 0x146   : > { %8607 = vst [vmem:[#allocation58_spill] sm:$0xff] %v6070_v30 }
 0x147   : > { %1032 = vmatmul.f32.gmra.mxu2 %v5752_v50  ;;  %1468 = vmatmul.f32.gmra.mxu0 %v5745_v20 }
 0x148   : > { %1233 = vmatmul.f32.gmra.mxu3 %v8609_v31  ;;  %1625 = vmatmul.f32.gmra.mxu1 %v5725_v10  ;;  %v2097_v10 = vsub.f32 %v6085_v27, %v8393_v16  ;;  %v8611_v31 = vand.u32 4294901760, %v5752_v50  ;;  %v8614_v50 = vand.u32 4294901760, %v5777_v11 }
 0x14a   : > { %v673_v52 = vpop.f32.mrf.mxu2  ;;  %v2098_v63 = vand.u32 4294901760, %v2097_v10 }
 0x14b   : > { %v902_v7 = vpop.f32.mrf.mxu3  ;;  %v674_v61 = vadd.f32 %v5854_v5, %v673_v52 }
 0x14c   : > { %v6091_v45 = vadd.f32 %v902_v7, %v666_v44  ;;  %v6093_v17 = vpop.f32.mrf.mxu0  ;;  %2099 = vmatpush.msra.mxu3 %v2098_v63 }
 0x14d   : > { %v6098_v62 = vpop.f32.mrf.mxu1 }
 0x14e   : > { %8610 = vst [vmem:[#allocation60_spill] sm:$0xff] %v6091_v45 }
 0x14f   : > { %1037 = vmatmul.f32.gmra.mxu2 %v5777_v11  ;;  %1472 = vmatmul.f32.gmra.mxu0 %v5768_v32  ;;  %v1743_v11 = vld [vmem:[#allocation7 + $0x30] sm:$0xff] }
 0x150   : > { %1239 = vmatmul.f32.gmra.mxu3 %v8611_v31  ;;  %1629 = vmatmul.f32.gmra.mxu1 %v5745_v20 }
 0x152   : > { %v681_v44 = vpop.f32.mrf.mxu2 }
 0x153   : > { %v906_v7 = vpop.f32.mrf.mxu3  ;;  %v682_v52 = vadd.f32 %v5854_v5, %v681_v44  ;;  %v8617_v44 = vand.u32 4294901760, %v5802_v47 }
 0x154   : > { %v6106_v45 = vadd.f32 %v906_v7, %v674_v61  ;;  %v6108_v16 = vpop.f32.mrf.mxu0 }
 0x155   : > { %8613 = vst [vmem:[#allocation62_spill] sm:$0xff] %v6108_v16  ;;  %v6110_v30 = vpop.f32.mrf.mxu1 }
 0x156   : > { %8612 = vst [vmem:[#allocation61_spill] sm:$0xff] %v6106_v45 }
 0x157   : > { %1042 = vmatmul.f32.gmra.mxu2 %v5802_v47  ;;  %1476 = vmatmul.f32.gmra.mxu0 %v5791_v36 }
 0x158   : > { %1245 = vmatmul.f32.gmra.mxu3 %v8614_v50  ;;  %1633 = vmatmul.f32.gmra.mxu1 %v5768_v32  ;;  %v6130_v50 = vand.u32 4294901760, %v1743_v11 }
 0x15a   : > { %v689_v20 = vpop.f32.mrf.mxu2  ;;  %8618 = vst [vmem:[#allocation65_spill] sm:$0xff] %v6130_v50  ;;  %1776 = vmatpush.msra.mxu2 %v6130_v50  ;;  %2499 = vmatpush.msra.mxu1 %v6130_v50 }
 0x15b   : > { %v910_v10 = vpop.f32.mrf.mxu3  ;;  %v690_v7 = vadd.f32 %v5854_v5, %v689_v20  ;;  %v6140_v20 = vsub.f32 %v1743_v11, %v6130_v50 }
 0x15c   : > { %v6118_v63 = vadd.f32 %v910_v10, %v682_v52  ;;  %v6120_v61 = vpop.f32.mrf.mxu0  ;;  %v442_v10 = vadd.f32 %v5854_v5, %v5842_v19 }
 0x15d   : > { %v6122_v31 = vpop.f32.mrf.mxu1  ;;  %2300 = vmatpush.msra.mxu0 %v6140_v20 }
 0x15e   : > { %8615 = vst [vmem:[#allocation63_spill] sm:$0xff] %v6118_v63  ;;  %v791_v19 = vadd.f32 %v5858_v55, %v442_v10  ;;  %v8621_v55 = vand.u32 4294901760, %v5401_v42 }
 0x15f   : > { %8616 = vst [vmem:[#allocation64_spill] sm:$0xff] %v6122_v31  ;;  %1047 = vmatmul.f32.gmra.mxu2 %v5343_v23  ;;  %1480 = vmatmul.f32.gmra.mxu0 %v5313_v58  ;;  %v450_v31 = vadd.f32 %v5854_v5, %v5856_v37 }
 0x160   : > { %1251 = vmatmul.f32.gmra.mxu3 %v8617_v44  ;;  %1637 = vmatmul.f32.gmra.mxu1 %v5791_v36  ;;  %v8396_v36 = vand.u32 4294901760, %v6140_v20 }
 0x162   : > { %v968_v32 = vpop.f32.mrf.mxu2  ;;  %v2103_v44 = vsub.f32 %v6140_v20, %v8396_v36 }
 0x163   : > { %v914_v52 = vpop.f32.mrf.mxu3  ;;  %v969_v11 = vadd.f32 %v968_v32, %v791_v19  ;;  %v1742_v32 = vld [vmem:[#allocation7 + $0x28] sm:$0xff] }
 0x164   : > { %v6134_v63 = vadd.f32 %v914_v52, %v690_v7  ;;  %v6136_v45 = vpop.f32.mrf.mxu0  ;;  %v8620_v7 = vand.u32 4294901760, %v5343_v23  ;;  %v6170_v10 = vand.u32 4294901760, %v1742_v32 }
 0x165   : > { %v6143_v47 = vpop.f32.mrf.mxu1 }
 0x166   : > { %8619 = vst [vmem:[#allocation66_spill] sm:$0xff] %v6134_v63  ;;  %v2104_v63 = vand.u32 4294901760, %v2103_v44  ;;  %1778 = vmatpush.msra.mxu2 %v6170_v10  ;;  %2501 = vmatpush.msra.mxu1 %v6170_v10 }
 0x167   : > { %1052 = vmatmul.f32.gmra.mxu2 %v5401_v42  ;;  %1484 = vmatmul.f32.gmra.mxu0 %v5371_v51  ;;  %v6180_v42 = vsub.f32 %v1742_v32, %v6170_v10 }
 0x168   : > { %1257 = vmatmul.f32.gmra.mxu3 %v8620_v7  ;;  %1641 = vmatmul.f32.gmra.mxu1 %v5313_v58  ;;  %v795_v58 = vadd.f32 %v5879_v12, %v450_v31  ;;  %v8622_v31 = vand.u32 4294901760, %v5441_v34 }
 0x169   : > { %2105 = vmatpush.msra.mxu3 %v2104_v63  ;;  %v458_v63 = vadd.f32 %v5854_v5, %v5877_v2  ;;  %v8397_v12 = vand.u32 4294901760, %v6180_v42  ;;  %2303 = vmatpush.msra.mxu0 %v6180_v42 }
 0x16a   : > { %v973_v52 = vpop.f32.mrf.mxu2 }
 0x16b   : > { %v1162_v50 = vpop.f32.mrf.mxu3  ;;  %v974_v37 = vadd.f32 %v973_v52, %v795_v58  ;;  %v799_v2 = vadd.f32 %v5894_v59, %v458_v63  ;;  %v8623_v59 = vand.u32 4294901760, %v5470_v21 }
 0x16c   : > { %v6158_v38 = vadd.f32 %v1162_v50, %v969_v11  ;;  %v6160_v16 = vpop.f32.mrf.mxu0  ;;  %v2109_v11 = vsub.f32 %v6180_v42, %v8397_v12 }
 0x16d   : > { %v6162_v23 = vpop.f32.mrf.mxu1 }
 0x16f   : > { %1057 = vmatmul.f32.gmra.mxu2 %v5441_v34  ;;  %1488 = vmatmul.f32.gmra.mxu0 %v5421_v46 }
 0x170   : > { %1263 = vmatmul.f32.gmra.mxu3 %v8621_v55  ;;  %1645 = vmatmul.f32.gmra.mxu1 %v5371_v51  ;;  %v2110_v55 = vand.u32 4294901760, %v2109_v11  ;;  %v474_v11 = vadd.f32 %v5854_v5, %v5913_v4 }
 0x172   : > { %v978_v50 = vpop.f32.mrf.mxu2  ;;  %2111 = vmatpush.msra.mxu3 %v2110_v55  ;;  %v807_v4 = vadd.f32 %v5930_v0, %v474_v11  ;;  %v8625_v0 = vand.u32 4294901760, %v5544_v41 }
 0x173   : > { %v1168_v19 = vpop.f32.mrf.mxu3  ;;  %v979_v52 = vadd.f32 %v978_v50, %v799_v2  ;;  %v1741_v50 = vld [vmem:[#allocation7 + $0x20] sm:$0xff] }
 0x174   : > { %v6174_v7 = vadd.f32 %v1168_v19, %v974_v37  ;;  %v6176_v44 = vpop.f32.mrf.mxu0  ;;  %v466_v37 = vadd.f32 %v5854_v5, %v5892_v6  ;;  %v6210_v2 = vand.u32 4294901760, %v1741_v50 }
 0x175   : > { %v6183_v51 = vpop.f32.mrf.mxu1 }
 0x176   : > { %1780 = vmatpush.msra.mxu2 %v6210_v2  ;;  %2503 = vmatpush.msra.mxu1 %v6210_v2 }
 0x177   : > { %1062 = vmatmul.f32.gmra.mxu2 %v5470_v21  ;;  %1492 = vmatmul.f32.gmra.mxu0 %v5450_v35  ;;  %v6220_v21 = vsub.f32 %v1741_v50, %v6210_v2 }
 0x178   : > { %1269 = vmatmul.f32.gmra.mxu3 %v8622_v31  ;;  %1649 = vmatmul.f32.gmra.mxu1 %v5421_v46  ;;  %v803_v46 = vadd.f32 %v5915_v39, %v466_v37 }
 0x179   : > { %v8398_v39 = vand.u32 4294901760, %v6220_v21  ;;  %2306 = vmatpush.msra.mxu0 %v6220_v21 }
 0x17a   : > { %v983_v58 = vpop.f32.mrf.mxu2 }
 0x17b   : > { %v1174_v32 = vpop.f32.mrf.mxu3  ;;  %v984_v6 = vadd.f32 %v983_v58, %v803_v46  ;;  %v8624_v58 = vand.u32 4294901760, %v5507_v25 }
 0x17c   : > { %v6198_v19 = vadd.f32 %v1174_v32, %v979_v52  ;;  %v6200_v36 = vpop.f32.mrf.mxu0  ;;  %v2115_v32 = vsub.f32 %v6220_v21, %v8398_v39 }
 0x17d   : > { %v6202_v34 = vpop.f32.mrf.mxu1 }
 0x17f   : > { %1067 = vmatmul.f32.gmra.mxu2 %v5507_v25  ;;  %1496 = vmatmul.f32.gmra.mxu0 %v5480_v57 }
 0x180   : > { %1275 = vmatmul.f32.gmra.mxu3 %v8623_v59  ;;  %1653 = vmatmul.f32.gmra.mxu1 %v5450_v35  ;;  %v2116_v59 = vand.u32 4294901760, %v2115_v32  ;;  %v490_v32 = vadd.f32 %v5854_v5, %v5949_v40  ;;  %v8627_v40 = vld [vmem:[#allocation15_spill] sm:$0xff] }
 0x182   : > { %v988_v63 = vpop.f32.mrf.mxu2  ;;  %2117 = vmatpush.msra.mxu3 %v2116_v59 }
 0x183   : > { %v1180_v31 = vpop.f32.mrf.mxu3  ;;  %v989_v37 = vadd.f32 %v988_v63, %v807_v4  ;;  %v1740_v63 = vld [vmem:[#allocation7 + $0x18] sm:$0xff] }
 0x184   : > { %v6214_v52 = vadd.f32 %v1180_v31, %v984_v6  ;;  %v6216_v55 = vpop.f32.mrf.mxu0  ;;  %v482_v6 = vadd.f32 %v5854_v5, %v5928_v9  ;;  %v6250_v4 = vand.u32 4294901760, %v1740_v63 }
 0x185   : > { %v6223_v35 = vpop.f32.mrf.mxu1 }
 0x186   : > { %1782 = vmatpush.msra.mxu2 %v6250_v4  ;;  %2505 = vmatpush.msra.mxu1 %v6250_v4 }
 0x187   : > { %1072 = vmatmul.f32.gmra.mxu2 %v5544_v41  ;;  %1500 = vmatmul.f32.gmra.mxu0 %v5522_v14  ;;  %v6260_v41 = vsub.f32 %v1740_v63, %v6250_v4 }
 0x188   : > { %1281 = vmatmul.f32.gmra.mxu3 %v8624_v58  ;;  %1657 = vmatmul.f32.gmra.mxu1 %v5480_v57  ;;  %v811_v57 = vadd.f32 %v5951_v3, %v482_v6 }
 0x189   : > { %v8399_v3 = vand.u32 4294901760, %v6260_v41  ;;  %2309 = vmatpush.msra.mxu0 %v6260_v41 }
 0x18a   : > { %v993_v46 = vpop.f32.mrf.mxu2 }
 0x18b   : > { %v1186_v50 = vpop.f32.mrf.mxu3  ;;  %v994_v9 = vadd.f32 %v993_v46, %v811_v57  ;;  %v815_v46 = vadd.f32 %v5966_v49, %v490_v32  ;;  %v2121_v6 = vsub.f32 %v6260_v41, %v8399_v3  ;;  %v8631_v49 = vld [vmem:[#allocation17_spill] sm:$0xff] }
 0x18c   : > { %v6238_v31 = vadd.f32 %v1186_v50, %v989_v37  ;;  %v6240_v12 = vpop.f32.mrf.mxu0  ;;  %v8628_v50 = vand.u32 4294901760, %v5581_v43 }
 0x18d   : > { %v6242_v25 = vpop.f32.mrf.mxu1  ;;  %v2122_v63 = vand.u32 4294901760, %v2121_v6 }
 0x18f   : > { %1077 = vmatmul.f32.gmra.mxu2 %v5581_v43  ;;  %1504 = vmatmul.f32.gmra.mxu0 %v5559_v26 }
 0x190   : > { %1287 = vmatmul.f32.gmra.mxu3 %v8625_v0  ;;  %1661 = vmatmul.f32.gmra.mxu1 %v5522_v14 }
 0x191   : > { %2123 = vmatpush.msra.mxu3 %v2122_v63  ;;  %v506_v63 = vadd.f32 %v5854_v5, %v5985_v13  ;;  %v8637_v13 = vld [vmem:[#allocation18_spill] sm:$0xff] }
 0x192   : > { %v998_v11 = vpop.f32.mrf.mxu2 }
 0x193   : > { %v1192_v58 = vpop.f32.mrf.mxu3  ;;  %v999_v57 = vadd.f32 %v998_v11, %v815_v46  ;;  %v8633_v11 = vand.u32 4294901760, %v5618_v18  ;;  %v1739_v46 = vld [vmem:[#allocation7 + $0x10] sm:$0xff] }
 0x194   : > { %v6254_v37 = vadd.f32 %v1192_v58, %v994_v9  ;;  %v6256_v59 = vpop.f32.mrf.mxu0  ;;  %v498_v58 = vadd.f32 %v5854_v5, %v5964_v56  ;;  %v6290_v6 = vand.u32 4294901760, %v1739_v46 }
 0x195   : > { %8626 = vst [vmem:[#allocation67_spill] sm:$0xff] %v6256_v59  ;;  %v6263_v14 = vpop.f32.mrf.mxu1 }
 0x196   : > { %v819_v32 = vadd.f32 %v5987_v24, %v498_v58  ;;  %1784 = vmatpush.msra.mxu2 %v6290_v6  ;;  %2507 = vmatpush.msra.mxu1 %v6290_v6  ;;  %v823_v58 = vadd.f32 %v6002_v54, %v506_v63 }
 0x197   : > { %1082 = vmatmul.f32.gmra.mxu2 %v5618_v18  ;;  %1508 = vmatmul.f32.gmra.mxu0 %v8627_v40  ;;  %v6300_v18 = vsub.f32 %v1739_v46, %v6290_v6 }
 0x198   : > { %1293 = vmatmul.f32.gmra.mxu3 %v8628_v50  ;;  %1665 = vmatmul.f32.gmra.mxu1 %v5559_v26  ;;  %v8632_v26 = vld [vmem:[#allocation16_spill] sm:$0xff] }
 0x199   : > { %2312 = vmatpush.msra.mxu0 %v6300_v18 }
 0x19a   : > { %v1003_v0 = vpop.f32.mrf.mxu2 }
 0x19b   : > { %v1198_v9 = vpop.f32.mrf.mxu3  ;;  %v1004_v56 = vadd.f32 %v1003_v0, %v819_v32  ;;  %v8636_v0 = vld [vmem:[#allocation19_spill] sm:$0xff]  ;;  %v8638_v32 = vand.u32 4294901760, %v8631_v49 }
 0x19c   : > { %v6278_v39 = vadd.f32 %v1198_v9, %v999_v57  ;;  %v6280_v59 = vpop.f32.mrf.mxu0 }
 0x19d   : > { %8629 = vst [vmem:[#allocation15_spill] sm:$0xff] %v6280_v59  ;;  %v6282_v43 = vpop.f32.mrf.mxu1 }
 0x19e   : > { %8630 = vst [vmem:[#allocation68_spill] sm:$0xff] %v6282_v43 }
 0x19f   : > { %1087 = vmatmul.f32.gmra.mxu2 %v8631_v49  ;;  %1512 = vmatmul.f32.gmra.mxu0 %v8632_v26  ;;  %v8641_v49 = vld [vmem:[#allocation21_spill] sm:$0xff] }
 0x1a0   : > { %1299 = vmatmul.f32.gmra.mxu3 %v8633_v11  ;;  %1669 = vmatmul.f32.gmra.mxu1 %v8627_v40  ;;  %v8400_v40 = vand.u32 4294901760, %v6300_v18 }
 0x1a2   : > { %v1008_v50 = vpop.f32.mrf.mxu2  ;;  %v2127_v11 = vsub.f32 %v6300_v18, %v8400_v40 }
 0x1a3   : > { %v1204_v57 = vpop.f32.mrf.mxu3  ;;  %v1009_v46 = vadd.f32 %v1008_v50, %v823_v58  ;;  %v8643_v50 = vand.u32 4294901760, %v8636_v0  ;;  %v1738_v58 = vld [vmem:[#allocation7 + $0x8] sm:$0xff] }
 0x1a4   : > { %v6294_v9 = vadd.f32 %v1204_v57, %v1004_v56  ;;  %v6296_v3 = vpop.f32.mrf.mxu0  ;;  %v2128_v57 = vand.u32 4294901760, %v2127_v11 }
 0x1a5   : > { %8634 = vst [vmem:[#allocation17_spill] sm:$0xff] %v6296_v3  ;;  %v6303_v24 = vpop.f32.mrf.mxu1 }
 0x1a6   : > { %8635 = vst [vmem:[#allocation16_spill] sm:$0xff] %v6303_v24  ;;  %v514_v24 = vadd.f32 %v5854_v5, %v6000_v48  ;;  %2129 = vmatpush.msra.mxu3 %v2128_v57 }
 0x1a7   : > { %1092 = vmatmul.f32.gmra.mxu2 %v8636_v0  ;;  %1516 = vmatmul.f32.gmra.mxu0 %v8637_v13 }
 0x1a8   : > { %1305 = vmatmul.f32.gmra.mxu3 %v8638_v32  ;;  %1673 = vmatmul.f32.gmra.mxu1 %v8632_v26  ;;  %v8642_v26 = vld [vmem:[#allocation20_spill] sm:$0xff]  ;;  %v827_v63 = vadd.f32 %v6023_v60, %v514_v24  ;;  %v6330_v32 = vand.u32 4294901760, %v1738_v58 }
 0x1aa   : > { %v1013_v56 = vpop.f32.mrf.mxu2  ;;  %1786 = vmatpush.msra.mxu2 %v6330_v32  ;;  %v6340_v60 = vsub.f32 %v1738_v58, %v6330_v32  ;;  %2509 = vmatpush.msra.mxu1 %v6330_v32 }
 0x1ab   : > { %v1210_v3 = vpop.f32.mrf.mxu3  ;;  %v1014_v48 = vadd.f32 %v1013_v56, %v827_v63  ;;  %v8648_v63 = vand.u32 4294901760, %v8641_v49 }
 0x1ac   : > { %v6318_v59 = vadd.f32 %v1210_v3, %v1009_v46  ;;  %v6320_v43 = vpop.f32.mrf.mxu0  ;;  %v522_v46 = vadd.f32 %v5854_v5, %v6021_v33  ;;  %v8402_v0 = vand.u32 4294901760, %v6340_v60  ;;  %2315 = vmatpush.msra.mxu0 %v6340_v60  ;;  %v8647_v33 = vld [vmem:[#allocation22_spill] sm:$0xff] }
 0x1ad   : > { %8639 = vst [vmem:[#allocation19_spill] sm:$0xff] %v6320_v43  ;;  %v6322_v54 = vpop.f32.mrf.mxu1 }
 0x1ae   : > { %8640 = vst [vmem:[#allocation18_spill] sm:$0xff] %v6322_v54  ;;  %v831_v56 = vadd.f32 %v6038_v8, %v522_v46  ;;  %v530_v54 = vadd.f32 %v5854_v5, %v6036_v28  ;;  %v1418_v8 = vadd.f32 %v6120_v61, %v6158_v38  ;;  %v8650_v28 = vld [vmem:[#allocation25_spill] sm:$0xff]  ;;  %v8651_v38 = vld [vmem:[#allocation24_spill] sm:$0xff] }
 0x1af   : > { %1097 = vmatmul.f32.gmra.mxu2 %v8641_v49  ;;  %1520 = vmatmul.f32.gmra.mxu0 %v8642_v26 }
 0x1b0   : > { %1311 = vmatmul.f32.gmra.mxu3 %v8643_v50  ;;  %1677 = vmatmul.f32.gmra.mxu1 %v8637_v13  ;;  %v8646_v13 = vld [vmem:[#allocation23_spill] sm:$0xff]  ;;  %v2133_v50 = vsub.f32 %v6340_v60, %v8402_v0  ;;  %v835_v61 = vadd.f32 %v6059_v22, %v530_v54 }
 0x1b1   : > { %v8666_v0 = vld [vmem:[#allocation47_spill] sm:$0xff] }
 0x1b2   : > { %v1018_v3 = vpop.f32.mrf.mxu2 }
 0x1b3   : > { %v1216_v11 = vpop.f32.mrf.mxu3  ;;  %v1019_v58 = vadd.f32 %v1018_v3, %v831_v56  ;;  %v8649_v56 = vand.u32 4294901760, %v5813_v1  ;;  %v8653_v1 = vand.u32 4294901760, %v5837_v53 }
 0x1b4   : > { %v6334_v57 = vadd.f32 %v1216_v11, %v1014_v48  ;;  %v6336_v40 = vpop.f32.mrf.mxu0  ;;  %v2134_v11 = vand.u32 4294901760, %v2133_v50 }
 0x1b5   : > { %8644 = vst [vmem:[#allocation21_spill] sm:$0xff] %v6336_v40  ;;  %v6343_v24 = vpop.f32.mrf.mxu1  ;;  %v1737_v40 = vld [vmem:[#allocation7] sm:$0xff] }
 0x1b6   : > { %8645 = vst [vmem:[#allocation20_spill] sm:$0xff] %v6343_v24  ;;  %v6356_v43 = vand.u32 4294901760, %v1737_v40  ;;  %2135 = vmatpush.msra.mxu3 %v2134_v11 }
 0x1b7   : > { %1102 = vmatmul.f32.gmra.mxu2 %v8646_v13  ;;  %1524 = vmatmul.f32.gmra.mxu0 %v8647_v33 }
 0x1b8   : > { %1317 = vmatmul.f32.gmra.mxu3 %v8648_v63  ;;  %1681 = vmatmul.f32.gmra.mxu1 %v8642_v26  ;;  %v6370_v3 = vsub.f32 %v1737_v40, %v6356_v43  ;;  %v8652_v63 = vand.u32 4294901760, %v8646_v13  ;;  %v8656_v13 = vld [vmem:[#allocation57_spill] sm:$0xff] }
 0x1b9   : > { %1788 = vmatpush.msra.mxu2 %v6356_v43  ;;  %2511 = vmatpush.msra.mxu1 %v6356_v43 }
 0x1ba   : > { %v1023_v48 = vpop.f32.mrf.mxu2  ;;  %v8401_v40 = vand.u32 4294901760, %v6370_v3  ;;  %2318 = vmatpush.msra.mxu0 %v6370_v3 }
 0x1bb   : > { %v1222_v24 = vpop.f32.mrf.mxu3  ;;  %2708 = vmatpush.msrb.mxu2 %v8649_v56  ;;  %v1024_v50 = vadd.f32 %v1023_v48, %v835_v61 }
 0x1bc   : > { %v6362_v49 = vadd.f32 %v1222_v24, %v1019_v58  ;;  %v6364_v26 = vpop.f32.mrf.mxu0  ;;  %v1579_v24 = vadd.f32 %v6143_v47, %v1418_v8  ;;  %v2139_v22 = vsub.f32 %v6370_v3, %v8401_v40  ;;  %v8654_v47 = vld [vmem:[#allocation35_spill] sm:$0xff]  ;;  %v1422_v8 = vadd.f32 %v6136_v45, %v6174_v7 }
 0x1bd   : > { %v6366_v46 = vpop.f32.mrf.mxu1  ;;  %2712 = vmatpush.msrb.mxu2 %v8653_v1  ;;  %v8655_v54 = vand.u32 4294901760, %v8654_v47  ;;  %v8660_v40 = vld [vmem:[#allocation27_spill] sm:$0xff]  ;;  %v8661_v47 = vld [vmem:[#allocation26_spill] sm:$0xff]  ;;  %v8662_v45 = vand.u32 4294901760, %v8650_v28 }
 0x1be   : > { %4701 = vtanh.f32 %v1579_v24  ;;  %v2140_v61 = vand.u32 4294901760, %v2139_v22  ;;  %v1583_v24 = vadd.f32 %v6162_v23, %v1422_v8  ;;  %v8663_v7 = vld [vmem:[#allocation43_spill] sm:$0xff]  ;;  %v1426_v23 = vadd.f32 %v6160_v16, %v6198_v19 }
 0x1bf   : > { %1107 = vmatmul.f32.gmra.mxu2 %v8650_v28  ;;  %1528 = vmatmul.f32.gmra.mxu0 %v8651_v38 }
 0x1c0   : > { %1323 = vmatmul.f32.gmra.mxu3 %v8652_v63  ;;  %1685 = vmatmul.f32.gmra.mxu1 %v8647_v33  ;;  %v538_v33 = vadd.f32 %v5854_v5, %v8656_v13  ;;  %v8658_v63 = vld [vmem:[#allocation39_spill] sm:$0xff]  ;;  %4703 = vtanh.f32 %v1583_v24  ;;  %v1587_v19 = vadd.f32 %v6183_v51, %v1426_v23  ;;  %v8674_v24 = vand.u32 4294901760, %v8660_v40 }
 0x1c1   : > { %2716 = vmatpush.msrb.mxu2 %v8655_v54  ;;  %v8659_v1 = vand.u32 4294901760, %v8658_v63  ;;  %2141 = vmatpush.msra.mxu3 %v2140_v61  ;;  %v8665_v63 = vld [vmem:[#allocation32_spill] sm:$0xff]  ;;  %v8669_v61 = vld [vmem:[#allocation51_spill] sm:$0xff]  ;;  %v8679_v51 = vand.u32 4294901760, %v6085_v27  ;;  %v8681_v27 = vand.u32 4294901760, %v6140_v20  ;;  %v8685_v20 = vld [vmem:[#allocation50_spill] sm:$0xff] }
 0x1c2   : > { %v1028_v58 = vpop.f32.mrf.mxu2  ;;  %v839_v54 = vadd.f32 %v6074_v15, %v538_v33  ;;  %v546_v15 = vadd.f32 %v5854_v5, %v6072_v29  ;;  %v8668_v33 = vld [vmem:[#allocation33_spill] sm:$0xff]  ;;  %4705 = vtanh.f32 %v1587_v19 }
 0x1c3   : > { %v1228_v11 = vpop.f32.mrf.mxu3  ;;  %2720 = vmatpush.msrb.mxu2 %v8659_v1  ;;  %2899 = vmatpush.msrb.mxu3 %v8665_v63  ;;  %v8672_v29 = vld [vmem:[#allocation29_spill] sm:$0xff] }
 0x1c4   : > { %v6395_v56 = vadd.f32 %v1228_v11, %v1024_v50  ;;  %v6397_v53 = vpop.f32.mrf.mxu0  ;;  %v8664_v50 = vand.u32 4294901760, %v8663_v7  ;;  %v4702_v11 = vpop.eup %4701  ;;  %v1029_v22 = vadd.f32 %v1028_v58, %v839_v54  ;;  %v8673_v54 = vld [vmem:[#allocation28_spill] sm:$0xff]  ;;  %v843_v16 = vadd.f32 %v6098_v62, %v546_v15  ;;  %v8675_v7 = vld [vmem:[#allocation38_spill] sm:$0xff] }
 0x1c5   : > { %8657 = vst [vmem:[#allocation23_spill] sm:$0xff] %v6397_v53  ;;  %v6399_v48 = vpop.f32.mrf.mxu1  ;;  %v8667_v53 = vand.u32 4294901760, %v8666_v0  ;;  %2901 = vmatpush.msrb.mxu3 %v8668_v33  ;;  %v6424_v58 = vand.u32 4294901760, %v4702_v11  ;;  %v8670_v0 = vand.u32 4294901760, %v8669_v61  ;;  %v8678_v62 = vld [vmem:[#allocation42_spill] sm:$0xff] }
 0x1c6   : > { %2724 = vmatpush.msrb.mxu2 %v8664_v50  ;;  %v8676_v50 = vld [vmem:[#allocation55_spill] sm:$0xff]  ;;  %v4704_v63 = vpop.eup %4703 }
 0x1c7   : > { %1112 = vmatmul.f32.gmra.mxu2 %v8660_v40  ;;  %1532 = vmatmul.f32.gmra.mxu0 %v8661_v47  ;;  %v554_v40 = vadd.f32 %v5854_v5, %v6093_v17  ;;  %v6455_v23 = vand.u32 4294901760, %v4704_v63  ;;  %v8682_v5 = vld [vmem:[#allocation31_spill] sm:$0xff]  ;;  %v8683_v17 = vld [vmem:[#allocation30_spill] sm:$0xff] }
 0x1c8   : > { %1329 = vmatmul.f32.gmra.mxu3 %v8662_v45  ;;  %1689 = vmatmul.f32.gmra.mxu1 %v8651_v38  ;;  %v6439_v45 = vsub.f32 %v4702_v11, %v6424_v58 }
 0x1c9   : > { %2728 = vmatpush.msrb.mxu2 %v8667_v53  ;;  %v8671_v53 = vld [vmem:[#allocation34_spill] sm:$0xff] }
 0x1ca   : > { %v1033_v13 = vpop.f32.mrf.mxu2  ;;  %2903 = vmatpush.msrb.mxu3 %v8671_v53  ;;  %v8680_v53 = vld [vmem:[#allocation46_spill] sm:$0xff] }
 0x1cb   : > { %v1234_v1 = vpop.f32.mrf.mxu3  ;;  %2732 = vmatpush.msrb.mxu2 %v8670_v0  ;;  %v1791_v0 = vand.u32 4294901760, %v6439_v45 }
 0x1cc   : > { %v6419_v28 = vadd.f32 %v1234_v1, %v1029_v22  ;;  %v6421_v38 = vpop.f32.mrf.mxu0  ;;  %2905 = vmatpush.msrb.mxu3 %v8675_v7  ;;  %v8677_v22 = vand.u32 4294901760, %v8676_v50  ;;  %v1034_v1 = vadd.f32 %v1033_v13, %v843_v16  ;;  %v8684_v16 = vand.u32 4294901760, %v8672_v29  ;;  %v4706_v50 = vpop.eup %4705 }
 0x1cd   : > { %v6426_v8 = vpop.f32.mrf.mxu1  ;;  %v1792_v19 = vsub.f32 %v6439_v45, %v1791_v0  ;;  %v8686_v7 = vand.u32 4294901760, %v6180_v42  ;;  %v1434_v42 = vadd.f32 %v6200_v36, %v6238_v31  ;;  %v8692_v36 = vld [vmem:[#allocation64_spill] sm:$0xff] }
 0x1ce   : > { %2736 = vmatpush.msrb.mxu2 %v8677_v22  ;;  %2907 = vmatpush.msrb.mxu3 %v8678_v62 }
 0x1cf   : > { %1117 = vmatmul.f32.gmra.mxu2 %v8672_v29  ;;  %1536 = vmatmul.f32.gmra.mxu0 %v8673_v54  ;;  %v8688_v29 = vand.u32 4294901760, %v6220_v21  ;;  %v1793_v21 = vand.u32 4294901760, %v1792_v19 }
 0x1d0   : > { %1335 = vmatmul.f32.gmra.mxu3 %v8674_v24  ;;  %1693 = vmatmul.f32.gmra.mxu1 %v8661_v47  ;;  %v1430_v47 = vadd.f32 %v6176_v44, %v6214_v52  ;;  %v847_v44 = vadd.f32 %v6110_v30, %v554_v40  ;;  %v6472_v24 = vsub.f32 %v4704_v63, %v6455_v23  ;;  %v8689_v63 = vld [vmem:[#allocation62_spill] sm:$0xff] }
 0x1d1   : > { %2740 = vmatpush.msrb.mxu2 %v8679_v51  ;;  %2909 = vmatpush.msrb.mxu3 %v8680_v53  ;;  %v6490_v51 = vand.u32 4294901760, %v4706_v50  ;;  %v8690_v53 = vld [vmem:[#allocation59_spill] sm:$0xff] }
 0x1d2   : > { %v1038_v33 = vpop.f32.mrf.mxu2  ;;  %v1591_v52 = vadd.f32 %v6202_v34, %v1430_v47  ;;  %v8687_v34 = vld [vmem:[#allocation54_spill] sm:$0xff]  ;;  %v1799_v47 = vand.u32 4294901760, %v6472_v24 }
 0x1d3   : > { %v1240_v61 = vpop.f32.mrf.mxu3  ;;  %2744 = vmatpush.msrb.mxu2 %v8681_v27  ;;  %2911 = vmatpush.msrb.mxu3 %v8685_v20  ;;  %v1039_v22 = vadd.f32 %v1038_v33, %v847_v44  ;;  %v8691_v27 = vand.u32 4294901760, %v6260_v41  ;;  %v1595_v44 = vadd.f32 %v6223_v35, %v1434_v42  ;;  %v6506_v19 = vsub.f32 %v4706_v50, %v6490_v51  ;;  %v8694_v20 = vld [vmem:[#allocation65_spill] sm:$0xff] }
 0x1d4   : > { %v6451_v11 = vadd.f32 %v1240_v61, %v1034_v1  ;;  %v6453_v15 = vpop.f32.mrf.mxu0  ;;  %4707 = vtanh.f32 %v1591_v52  ;;  %v8693_v52 = vand.u32 4294901760, %v8682_v5  ;;  %v8695_v41 = vand.u32 4294901760, %v6300_v18 }
 0x1d5   : > { %v6457_v13 = vpop.f32.mrf.mxu1  ;;  %2748 = vmatpush.msrb.mxu2 %v8686_v7  ;;  %2913 = vmatpush.msrb.mxu3 %v8687_v34  ;;  %4709 = vtanh.f32 %v1595_v44 }
 0x1d7   : > { %1122 = vmatmul.f32.gmra.mxu2 %v8682_v5  ;;  %1540 = vmatmul.f32.gmra.mxu0 %v8683_v17  ;;  %v8697_v5 = vand.u32 4294901760, %v6340_v60 }
 0x1d8   : > { %1341 = vmatmul.f32.gmra.mxu3 %v8684_v16  ;;  %1697 = vmatmul.f32.gmra.mxu1 %v8673_v54  ;;  %v4829_v54 = vld [vmem:[%s8286_s2] ss:$0 sm:$0xff]  ;;  %v1800_v16 = vsub.f32 %v6472_v24, %v1799_v47 }
 0x1d9   : > { %2752 = vmatpush.msrb.mxu2 %v8688_v29  ;;  %v562_v61 = vadd.f32 %v4829_v54, %v8689_v63  ;;  %2915 = vmatpush.msrb.mxu3 %v8690_v53  ;;  %v1807_v63 = vand.u32 4294901760, %v6506_v19 }
 0x1da   : > { %v1043_v30 = vpop.f32.mrf.mxu2  ;;  %v1801_v54 = vand.u32 4294901760, %v1800_v16 }
 0x1db   : > { %v1246_v1 = vpop.f32.mrf.mxu3  ;;  %2756 = vmatpush.msrb.mxu2 %v8691_v27  ;;  %v851_v31 = vadd.f32 %v8692_v36, %v562_v61  ;;  %2917 = vmatpush.msrb.mxu3 %v8694_v20 }
 0x1dc   : > { %v6486_v62 = vadd.f32 %v1246_v1, %v1039_v22  ;;  %v6488_v33 = vpop.f32.mrf.mxu0  ;;  %v8696_v1 = vld [vmem:[#allocation36_spill] sm:$0xff] }
 0x1dd   : > { %v6492_v40 = vpop.f32.mrf.mxu1  ;;  %2760 = vmatpush.msrb.mxu2 %v8695_v41  ;;  %v1044_v7 = vadd.f32 %v1043_v30, %v851_v31  ;;  %2919 = vmatpush.msrb.mxu3 %v6170_v10  ;;  %v8698_v10 = vand.u32 4294901760, %v6370_v3 }
 0x1df   : > { %1794 = vmatmul.f32.vlgmr.msra.gmra.mxu2 %v1793_v21  ;;  %2321 = vmatmul.f32.vlgmr.msra.gmra.mxu0 %v6439_v45  ;;  %v4708_v45 = vpop.eup %4707 }
 0x1e0   : > { %1347 = vmatmul.f32.gmra.mxu3 %v8693_v52  ;;  %1701 = vmatmul.f32.gmra.mxu1 %v8683_v17  ;;  %v1438_v17 = vadd.f32 %v6216_v55, %v6254_v37  ;;  %v6521_v18 = vand.u32 4294901760, %v4708_v45  ;;  %v1808_v37 = vsub.f32 %v6506_v19, %v1807_v63  ;;  %v4710_v61 = vpop.eup %4709  ;;  %v8700_v52 = vld [vmem:[#allocation40_spill] sm:$0xff] }
 0x1e1   : > { %2764 = vmatpush.msrb.mxu2 %v8697_v5  ;;  %2921 = vmatpush.msrb.mxu3 %v6210_v2  ;;  %v8699_v2 = vld [vmem:[#allocation37_spill] sm:$0xff]  ;;  %v6543_v53 = vand.u32 4294901760, %v4710_v61 }
 0x1e2   : > { %v1048_v22 = vpop.f32.mrf.mxu2  ;;  %v1599_v55 = vadd.f32 %v6242_v25, %v1438_v17  ;;  %v1814_v60 = vsub.f32 %v4708_v45, %v6521_v18  ;;  %v1442_v25 = vadd.f32 %v6240_v12, %v6278_v39  ;;  %v8703_v17 = vld [vmem:[#allocation41_spill] sm:$0xff] }
 0x1e3   : > { %v1049_v35 = vadd.f32 %v1048_v22, %v8696_v1  ;;  %v1252_v34 = vpop.f32.mrf.mxu3  ;;  %2768 = vmatpush.msrb.mxu2 %v8698_v10  ;;  %2923 = vmatpush.msrb.mxu3 %v6250_v4  ;;  %v1809_v4 = vand.u32 4294901760, %v1808_v37  ;;  %v1822_v39 = vsub.f32 %v4710_v61, %v6543_v53 }
 0x1e4   : > { %v6517_v50 = vadd.f32 %v1252_v34, %v1044_v7  ;;  %v6519_v29 = vpop.f32.mrf.mxu0  ;;  %4711 = vtanh.f32 %v1599_v55  ;;  %v1815_v36 = vand.u32 4294901760, %v1814_v60  ;;  %v8704_v55 = vld [vmem:[#allocation15_spill] sm:$0xff] }
 0x1e5   : > { %v6523_v30 = vpop.f32.mrf.mxu1  ;;  %2925 = vmatpush.msrb.mxu3 %v6290_v6  ;;  %v1603_v6 = vadd.f32 %v6263_v14, %v1442_v25  ;;  %v1823_v22 = vand.u32 4294901760, %v1822_v39  ;;  %v1450_v37 = vadd.f32 %v8704_v55, %v6318_v59 }
 0x1e6   : > { %v1816_v12 = vsub.f32 %v1814_v60, %v1815_v36 }
 0x1e7   : > { %1802 = vmatmul.f32.gmra.mxu2 %v1801_v54  ;;  %2326 = vmatmul.f32.gmra.mxu0 %v6472_v24  ;;  %4713 = vtanh.f32 %v1603_v6 }
 0x1e8   : > { %2143 = vmatmul.f32.vlgmr.msra.gmra.mxu3 %v6424_v58  ;;  %2515 = vmatmul.f32.vlgmr.msra.gmra.mxu1 %v1791_v0  ;;  %v1817_v7 = vand.u32 4294901760, %v1816_v12 }
 0x1e9   : > { %2927 = vmatpush.msrb.mxu3 %v6330_v32  ;;  %v8701_v32 = vld [vmem:[#allocation67_spill] sm:$0xff] }
 0x1ea   : > { %v1053_v42 = vpop.f32.mrf.mxu2  ;;  %v4712_v31 = vpop.eup %4711  ;;  %v1446_v41 = vadd.f32 %v8701_v32, %v6294_v9 }
 0x1eb   : > { %v1054_v21 = vadd.f32 %v1053_v42, %v8699_v2  ;;  %v1258_v3 = vpop.f32.mrf.mxu3  ;;  %2929 = vmatpush.msrb.mxu3 %v6356_v43  ;;  %v6560_v45 = vand.u32 4294901760, %v4712_v31  ;;  %v8702_v43 = vld [vmem:[#allocation68_spill] sm:$0xff] }
 0x1ec   : > { %v6539_v24 = vadd.f32 %v1258_v3, %v1049_v35  ;;  %v6541_v0 = vpop.f32.mrf.mxu0  ;;  %v1607_v1 = vadd.f32 %v8702_v43, %v1446_v41  ;;  %v1824_v35 = vsub.f32 %v1822_v39, %v1823_v22  ;;  %v8705_v3 = vld [vmem:[#allocation16_spill] sm:$0xff] }
 0x1ed   : > { %v6545_v27 = vpop.f32.mrf.mxu1  ;;  %v1830_v9 = vsub.f32 %v4712_v31, %v6560_v45  ;;  %v4714_v34 = vpop.eup %4713  ;;  %v1611_v25 = vadd.f32 %v8705_v3, %v1450_v37  ;;  %v8706_v31 = vld [vmem:[#allocation44_spill] sm:$0xff]  ;;  %v8711_v37 = vld [vmem:[#allocation19_spill] sm:$0xff] }
 0x1ee   : > { %4715 = vtanh.f32 %v1607_v1  ;;  %v6574_v42 = vand.u32 4294901760, %v4714_v34  ;;  %v8709_v1 = vld [vmem:[#allocation18_spill] sm:$0xff] }
 0x1ef   : > { %1810 = vmatmul.f32.gmra.mxu2 %v1809_v4  ;;  %2331 = vmatmul.f32.gmra.mxu0 %v6506_v19  ;;  %4717 = vtanh.f32 %v1611_v25 }
 0x1f0   : > { %2147 = vmatmul.f32.gmra.mxu3 %v6455_v23  ;;  %2521 = vmatmul.f32.gmra.mxu1 %v1799_v47  ;;  %v1838_v59 = vsub.f32 %v4714_v34, %v6574_v42 }
 0x1f2   : > { %v1058_v44 = vpop.f32.mrf.mxu2  ;;  %v1839_v43 = vand.u32 4294901760, %v1838_v59 }
 0x1f3   : > { %v1059_v16 = vadd.f32 %v1058_v44, %v8700_v52  ;;  %v1264_v20 = vpop.f32.mrf.mxu3 }
 0x1f4   : > { %v6556_v19 = vadd.f32 %v1264_v20, %v1054_v21  ;;  %v6558_v14 = vpop.f32.mrf.mxu0  ;;  %v1831_v21 = vand.u32 4294901760, %v1830_v9  ;;  %v4716_v6 = vpop.eup %4715  ;;  %v1840_v34 = vsub.f32 %v1838_v59, %v1839_v43 }
 0x1f5   : > { %v6562_v47 = vpop.f32.mrf.mxu1  ;;  %v6588_v41 = vand.u32 4294901760, %v4716_v6 }
 0x1f6   : > { %v1832_v4 = vsub.f32 %v1830_v9, %v1831_v21 }
 0x1f7   : > { %1818 = vmatmul.f32.gmra.mxu2 %v1817_v7  ;;  %2336 = vmatmul.f32.gmra.mxu0 %v1814_v60  ;;  %8708 = vst [vmem:[#allocation22_spill] sm:$0xff] %v6588_v41 }
 0x1f8   : > { %2151 = vmatmul.f32.gmra.mxu3 %v6490_v51  ;;  %2527 = vmatmul.f32.gmra.mxu1 %v1807_v63  ;;  %v1825_v63 = vand.u32 4294901760, %v1824_v35 }
 0x1fa   : > { %v1063_v5 = vpop.f32.mrf.mxu2 }
 0x1fb   : > { %v1064_v54 = vadd.f32 %v1063_v5, %v8703_v17  ;;  %v1270_v10 = vpop.f32.mrf.mxu3  ;;  %v4718_v5 = vpop.eup %4717 }
 0x1fc   : > { %v6570_v61 = vadd.f32 %v1270_v10, %v1059_v16  ;;  %v6572_v60 = vpop.f32.mrf.mxu0  ;;  %v8707_v16 = vld [vmem:[#allocation17_spill] sm:$0xff]  ;;  %v6602_v25 = vand.u32 4294901760, %v4718_v5 }
 0x1fd   : > { %v6576_v2 = vpop.f32.mrf.mxu1  ;;  %v1454_v20 = vadd.f32 %v8707_v16, %v6334_v57  ;;  %v1846_v57 = vsub.f32 %v4716_v6, %v6588_v41  ;;  %v8713_v6 = vld [vmem:[#allocation20_spill] sm:$0xff] }
 0x1fe   : > { %8712 = vst [vmem:[#allocation25_spill] sm:$0xff] %v6602_v25 }
 0x1ff   : > { %1826 = vmatmul.f32.gmra.mxu2 %v1825_v63  ;;  %2341 = vmatmul.f32.gmra.mxu0 %v1822_v39  ;;  %v1615_v35 = vadd.f32 %v8709_v1, %v1454_v20  ;;  %v1458_v63 = vadd.f32 %v8711_v37, %v6362_v49  ;;  %v1854_v49 = vsub.f32 %v4718_v5, %v6602_v25  ;;  %v8714_v20 = vld [vmem:[#allocation48_spill] sm:$0xff] }
 0x200   : > { %2155 = vmatmul.f32.gmra.mxu3 %v6521_v18  ;;  %2533 = vmatmul.f32.gmra.mxu1 %v1815_v36  ;;  %v1833_v36 = vand.u32 4294901760, %v1832_v4 }
 0x201   : > { %4719 = vtanh.f32 %v1615_v35  ;;  %v8715_v35 = vld [vmem:[#allocation21_spill] sm:$0xff]  ;;  %v1855_v37 = vand.u32 4294901760, %v1854_v49 }
 0x202   : > { %v1068_v12 = vpop.f32.mrf.mxu2 }
 0x203   : > { %v1069_v44 = vadd.f32 %v1068_v12, %v8706_v31  ;;  %v1276_v52 = vpop.f32.mrf.mxu3  ;;  %v1847_v12 = vand.u32 4294901760, %v1846_v57  ;;  %v1619_v31 = vadd.f32 %v8713_v6, %v1458_v63  ;;  %v1856_v63 = vsub.f32 %v1854_v49, %v1855_v37  ;;  %v8717_v6 = vld [vmem:[#allocation49_spill] sm:$0xff] }
 0x204   : > { %v6584_v32 = vadd.f32 %v1276_v52, %v1064_v54  ;;  %v6586_v39 = vpop.f32.mrf.mxu0  ;;  %v8710_v54 = vld [vmem:[#allocation45_spill] sm:$0xff] }
 0x205   : > { %v6590_v7 = vpop.f32.mrf.mxu1  ;;  %v1848_v52 = vsub.f32 %v1846_v57, %v1847_v12  ;;  %4721 = vtanh.f32 %v1619_v31 }
 0x207   : > { %1834 = vmatmul.f32.gmra.mxu2 %v1833_v36  ;;  %2346 = vmatmul.f32.gmra.mxu0 %v1830_v9 }
 0x208   : > { %2159 = vmatmul.f32.gmra.mxu3 %v6543_v53  ;;  %2539 = vmatmul.f32.gmra.mxu1 %v1823_v22  ;;  %v1841_v22 = vand.u32 4294901760, %v1840_v34  ;;  %v1462_v34 = vadd.f32 %v8715_v35, %v6395_v56 }
 0x20a   : > { %v1073_v17 = vpop.f32.mrf.mxu2  ;;  %v1623_v5 = vadd.f32 %v6366_v46, %v1462_v34 }
 0x20b   : > { %v1074_v10 = vadd.f32 %v1073_v17, %v8710_v54  ;;  %v1282_v55 = vpop.f32.mrf.mxu3 }
 0x20c   : > { %v6598_v3 = vadd.f32 %v1282_v55, %v1069_v44  ;;  %v6600_v9 = vpop.f32.mrf.mxu0  ;;  %v4720_v44 = vpop.eup %4719  ;;  %4723 = vtanh.f32 %v1623_v5 }
 0x20d   : > { %v6604_v4 = vpop.f32.mrf.mxu1  ;;  %v6616_v54 = vand.u32 4294901760, %v4720_v44 }
 0x20f   : > { %1842 = vmatmul.f32.gmra.mxu2 %v1841_v22  ;;  %2351 = vmatmul.f32.gmra.mxu0 %v1838_v59  ;;  %8716 = vst [vmem:[#allocation24_spill] sm:$0xff] %v6616_v54  ;;  %v1862_v56 = vsub.f32 %v4720_v44, %v6616_v54 }
 0x210   : > { %2163 = vmatmul.f32.gmra.mxu3 %v6560_v45  ;;  %2545 = vmatmul.f32.gmra.mxu1 %v1831_v21  ;;  %v1849_v21 = vand.u32 4294901760, %v1848_v52  ;;  %v1466_v52 = vadd.f32 %v6364_v26, %v6419_v28 }
 0x211   : > { %v1863_v35 = vand.u32 4294901760, %v1862_v56 }
 0x212   : > { %v1078_v16 = vpop.f32.mrf.mxu2  ;;  %v1627_v44 = vadd.f32 %v6399_v48, %v1466_v52 }
 0x213   : > { %v1079_v36 = vadd.f32 %v1078_v16, %v8714_v20  ;;  %v1288_v1 = vpop.f32.mrf.mxu3  ;;  %v1864_v34 = vsub.f32 %v1862_v56, %v1863_v35 }
 0x214   : > { %v6612_v17 = vadd.f32 %v1288_v1, %v1074_v10  ;;  %v6614_v59 = vpop.f32.mrf.mxu0  ;;  %v4722_v10 = vpop.eup %4721  ;;  %4725 = vtanh.f32 %v1627_v44 }
 0x215   : > { %v6618_v55 = vpop.f32.mrf.mxu1  ;;  %v6630_v46 = vand.u32 4294901760, %v4722_v10  ;;  %v4724_v28 = vpop.eup %4723 }
 0x216   : > { %v6644_v48 = vand.u32 4294901760, %v4724_v28 }
 0x217   : > { %1850 = vmatmul.f32.gmra.mxu2 %v1849_v21  ;;  %2356 = vmatmul.f32.gmra.mxu0 %v1846_v57  ;;  %8718 = vst [vmem:[#allocation35_spill] sm:$0xff] %v6630_v46  ;;  %v1870_v26 = vsub.f32 %v4722_v10, %v6630_v46  ;;  %v8719_v21 = vld [vmem:[#allocation52_spill] sm:$0xff] }
 0x218   : > { %2167 = vmatmul.f32.gmra.mxu3 %v6574_v42  ;;  %2551 = vmatmul.f32.gmra.mxu1 %v1839_v43  ;;  %v1857_v43 = vand.u32 4294901760, %v1856_v63  ;;  %8721 = vst [vmem:[#allocation57_spill] sm:$0xff] %v6644_v48 }
 0x21a   : > { %v1083_v22 = vpop.f32.mrf.mxu2 }
 0x21b   : > { %v1084_v31 = vadd.f32 %v1083_v22, %v8717_v6  ;;  %v1294_v16 = vpop.f32.mrf.mxu3  ;;  %v8720_v6 = vld [vmem:[#allocation23_spill] sm:$0xff] }
 0x21c   : > { %v6626_v20 = vadd.f32 %v1294_v16, %v1079_v36  ;;  %v6628_v57 = vpop.f32.mrf.mxu0  ;;  %v1470_v63 = vadd.f32 %v8720_v6, %v6451_v11  ;;  %v1878_v11 = vsub.f32 %v4724_v28, %v6644_v48 }
 0x21d   : > { %v6632_v1 = vpop.f32.mrf.mxu1 }
 0x21e   : > { %v1631_v10 = vadd.f32 %v6426_v8, %v1470_v63 }
 0x21f   : > { %1858 = vmatmul.f32.gmra.mxu2 %v1857_v43  ;;  %2361 = vmatmul.f32.gmra.mxu0 %v1854_v49  ;;  %v1871_v43 = vand.u32 4294901760, %v1870_v26 }
 0x220   : > { %2171 = vmatmul.f32.gmra.mxu3 %v6588_v41  ;;  %2557 = vmatmul.f32.gmra.mxu1 %v1847_v12  ;;  %v1865_v12 = vand.u32 4294901760, %v1864_v34  ;;  %4727 = vtanh.f32 %v1631_v10  ;;  %v1474_v34 = vadd.f32 %v6421_v38, %v6486_v62 }
 0x221   : > { %v1872_v44 = vsub.f32 %v1870_v26, %v1871_v43 }
 0x222   : > { %v1088_v36 = vpop.f32.mrf.mxu2  ;;  %v1635_v28 = vadd.f32 %v6457_v13, %v1474_v34 }
 0x223   : > { %v1089_v5 = vadd.f32 %v1088_v36, %v8719_v21  ;;  %v1300_v22 = vpop.f32.mrf.mxu3  ;;  %v8722_v21 = vld [vmem:[#allocation53_spill] sm:$0xff] }
 0x224   : > { %v6640_v16 = vadd.f32 %v1300_v22, %v1084_v31  ;;  %v6642_v49 = vpop.f32.mrf.mxu0  ;;  %v4726_v31 = vpop.eup %4725  ;;  %4729 = vtanh.f32 %v1635_v28 }
 0x225   : > { %v6646_v52 = vpop.f32.mrf.mxu1  ;;  %v6658_v8 = vand.u32 4294901760, %v4726_v31 }
 0x226   : > { %v4728_v62 = vpop.eup %4727 }
 0x227   : > { %1866 = vmatmul.f32.gmra.mxu2 %v1865_v12  ;;  %2366 = vmatmul.f32.gmra.mxu0 %v1862_v56  ;;  %8723 = vst [vmem:[#allocation39_spill] sm:$0xff] %v6658_v8  ;;  %v1879_v12 = vand.u32 4294901760, %v1878_v11  ;;  %v1886_v38 = vsub.f32 %v4726_v31, %v6658_v8  ;;  %v6672_v13 = vand.u32 4294901760, %v4728_v62 }
 0x228   : > { %2175 = vmatmul.f32.gmra.mxu3 %v6602_v25  ;;  %2563 = vmatmul.f32.gmra.mxu1 %v1855_v37  ;;  %v1873_v37 = vand.u32 4294901760, %v1872_v44  ;;  %v1478_v44 = vadd.f32 %v6453_v15, %v6517_v50 }
 0x229   : > { %v1880_v10 = vsub.f32 %v1878_v11, %v1879_v12  ;;  %8725 = vst [vmem:[#allocation27_spill] sm:$0xff] %v6672_v13  ;;  %v1894_v15 = vsub.f32 %v4728_v62, %v6672_v13 }
 0x22a   : > { %v1093_v36 = vpop.f32.mrf.mxu2  ;;  %v1639_v31 = vadd.f32 %v6492_v40, %v1478_v44  ;;  %v4730_v50 = vpop.eup %4729 }
 0x22b   : > { %v1094_v22 = vadd.f32 %v1093_v36, %v8722_v21  ;;  %v1306_v6 = vpop.f32.mrf.mxu3  ;;  %v8724_v36 = vld [vmem:[#allocation56_spill] sm:$0xff]  ;;  %v6686_v40 = vand.u32 4294901760, %v4730_v50 }
 0x22c   : > { %v6654_v41 = vadd.f32 %v1306_v6, %v1089_v5  ;;  %v6656_v56 = vpop.f32.mrf.mxu0  ;;  %4731 = vtanh.f32 %v1639_v31 }
 0x22d   : > { %v6660_v63 = vpop.f32.mrf.mxu1  ;;  %8727 = vst [vmem:[#allocation26_spill] sm:$0xff] %v6686_v40 }
 0x22f   : > { %1874 = vmatmul.f32.gmra.mxu2 %v1873_v37  ;;  %2371 = vmatmul.f32.gmra.mxu0 %v1870_v26  ;;  %v1887_v37 = vand.u32 4294901760, %v1886_v38 }
 0x230   : > { %2179 = vmatmul.f32.gmra.mxu3 %v6616_v54  ;;  %2569 = vmatmul.f32.gmra.mxu1 %v1863_v35  ;;  %v1881_v35 = vand.u32 4294901760, %v1880_v10  ;;  %v1482_v10 = vadd.f32 %v6488_v33, %v6539_v24  ;;  %v1902_v33 = vsub.f32 %v4730_v50, %v6686_v40 }
 0x231   : > { %v1888_v28 = vsub.f32 %v1886_v38, %v1887_v37 }
 0x232   : > { %v1098_v5 = vpop.f32.mrf.mxu2  ;;  %v1643_v62 = vadd.f32 %v6523_v30, %v1482_v10  ;;  %v4732_v24 = vpop.eup %4731 }
 0x233   : > { %v1099_v21 = vadd.f32 %v1098_v5, %v8724_v36  ;;  %v1312_v6 = vpop.f32.mrf.mxu3  ;;  %v8726_v5 = vld [vmem:[#allocation58_spill] sm:$0xff]  ;;  %v6700_v30 = vand.u32 4294901760, %v4732_v24 }
 0x234   : > { %v6668_v25 = vadd.f32 %v1312_v6, %v1094_v22  ;;  %v6670_v26 = vpop.f32.mrf.mxu0  ;;  %4733 = vtanh.f32 %v1643_v62 }
 0x235   : > { %v6674_v34 = vpop.f32.mrf.mxu1  ;;  %8729 = vst [vmem:[#allocation43_spill] sm:$0xff] %v6700_v30 }
 0x237   : > { %1882 = vmatmul.f32.gmra.mxu2 %v1881_v35  ;;  %2376 = vmatmul.f32.gmra.mxu0 %v1878_v11  ;;  %v1895_v35 = vand.u32 4294901760, %v1894_v15 }
 0x238   : > { %2183 = vmatmul.f32.gmra.mxu3 %v6630_v46  ;;  %2575 = vmatmul.f32.gmra.mxu1 %v1871_v43  ;;  %v1889_v43 = vand.u32 4294901760, %v1888_v28  ;;  %v1486_v28 = vadd.f32 %v6519_v29, %v6556_v19  ;;  %v1910_v29 = vsub.f32 %v4732_v24, %v6700_v30 }
 0x239   : > { %v1896_v31 = vsub.f32 %v1894_v15, %v1895_v35 }
 0x23a   : > { %v1103_v22 = vpop.f32.mrf.mxu2  ;;  %v1647_v50 = vadd.f32 %v6545_v27, %v1486_v28  ;;  %v4734_v19 = vpop.eup %4733 }
 0x23b   : > { %v1104_v36 = vadd.f32 %v1103_v22, %v8726_v5  ;;  %v1318_v6 = vpop.f32.mrf.mxu3  ;;  %v8728_v22 = vld [vmem:[#allocation60_spill] sm:$0xff]  ;;  %v6714_v27 = vand.u32 4294901760, %v4734_v19 }
 0x23c   : > { %v6682_v54 = vadd.f32 %v1318_v6, %v1099_v21  ;;  %v6684_v11 = vpop.f32.mrf.mxu0  ;;  %4735 = vtanh.f32 %v1647_v50 }
 0x23d   : > { %v6688_v44 = vpop.f32.mrf.mxu1  ;;  %8731 = vst [vmem:[#allocation32_spill] sm:$0xff] %v6714_v27 }
 0x23f   : > { %1890 = vmatmul.f32.gmra.mxu2 %v1889_v43  ;;  %2381 = vmatmul.f32.gmra.mxu0 %v1886_v38  ;;  %v1903_v43 = vand.u32 4294901760, %v1902_v33 }
 0x240   : > { %2187 = vmatmul.f32.gmra.mxu3 %v6644_v48  ;;  %2581 = vmatmul.f32.gmra.mxu1 %v1879_v12  ;;  %v1897_v12 = vand.u32 4294901760, %v1896_v31  ;;  %v1490_v31 = vadd.f32 %v6541_v0, %v6570_v61  ;;  %v6721_v0 = vsub.f32 %v4734_v19, %v6714_v27 }
 0x241   : > { %v1904_v62 = vsub.f32 %v1902_v33, %v1903_v43 }
 0x242   : > { %v1108_v21 = vpop.f32.mrf.mxu2  ;;  %v1651_v24 = vadd.f32 %v6562_v47, %v1490_v31  ;;  %v4736_v61 = vpop.eup %4735  ;;  %v1919_v19 = vand.u32 4294901760, %v6721_v0 }
 0x243   : > { %v1109_v5 = vadd.f32 %v1108_v21, %v8728_v22  ;;  %v1324_v6 = vpop.f32.mrf.mxu3  ;;  %v8730_v21 = vld [vmem:[#allocation61_spill] sm:$0xff] }
 0x244   : > { %v6696_v46 = vadd.f32 %v1324_v6, %v1104_v36  ;;  %v6698_v38 = vpop.f32.mrf.mxu0  ;;  %4737 = vtanh.f32 %v1651_v24 }
 0x245   : > { %v6702_v10 = vpop.f32.mrf.mxu1 }
 0x247   : > { %1898 = vmatmul.f32.gmra.mxu2 %v1897_v12  ;;  %2386 = vmatmul.f32.gmra.mxu0 %v1894_v15  ;;  %v1911_v12 = vand.u32 4294901760, %v1910_v29 }
 0x248   : > { %2191 = vmatmul.f32.gmra.mxu3 %v6658_v8  ;;  %2587 = vmatmul.f32.gmra.mxu1 %v1887_v37  ;;  %v1905_v37 = vand.u32 4294901760, %v1904_v62  ;;  %v1494_v62 = vadd.f32 %v6558_v14, %v6584_v32  ;;  %v1920_v14 = vsub.f32 %v6721_v0, %v1919_v19 }
 0x249   : > { %v1912_v50 = vsub.f32 %v1910_v29, %v1911_v12 }
 0x24a   : > { %v1113_v36 = vpop.f32.mrf.mxu2 }
 0x24b   : > { %v1114_v22 = vadd.f32 %v1113_v36, %v8730_v21  ;;  %v1330_v6 = vpop.f32.mrf.mxu3  ;;  %v8732_v36 = vld [vmem:[#allocation63_spill] sm:$0xff]  ;;  %v1913_v31 = vand.u32 4294901760, %v1912_v50  ;;  %v1498_v50 = vadd.f32 %v6572_v60, %v6598_v3 }
 0x24c   : > { %v6710_v48 = vadd.f32 %v1330_v6, %v1109_v5  ;;  %v6712_v15 = vpop.f32.mrf.mxu0 }
 0x24d   : > { %v6716_v28 = vpop.f32.mrf.mxu1 }
 0x24f   : > { %1906 = vmatmul.f32.gmra.mxu2 %v1905_v37  ;;  %2391 = vmatmul.f32.gmra.mxu0 %v1902_v33  ;;  %v6728_v33 = vand.u32 4294901760, %v4736_v61 }
 0x250   : > { %2195 = vmatmul.f32.gmra.mxu3 %v6672_v13  ;;  %2593 = vmatmul.f32.gmra.mxu1 %v1895_v35 }
 0x251   : > { %v6739_v32 = vsub.f32 %v4736_v61, %v6728_v33  ;;  %v3106_v61 = vld [vmem:[#allocation8 + $0x78] sm:$0xff] }
 0x252   : > { %v1118_v5 = vpop.f32.mrf.mxu2 }
 0x253   : > { %v1119_v21 = vadd.f32 %v1118_v5, %v8732_v36  ;;  %v1336_v6 = vpop.f32.mrf.mxu3  ;;  %v1655_v5 = vadd.f32 %v6576_v2, %v1494_v62  ;;  %v8733_v36 = vld [vmem:[#allocation66_spill] sm:$0xff] }
 0x254   : > { %v6726_v37 = vadd.f32 %v1336_v6, %v1114_v22  ;;  %v6730_v47 = vpop.f32.mrf.mxu0  ;;  %v4738_v22 = vpop.eup %4737 }
 0x255   : > { %v6732_v35 = vpop.f32.mrf.mxu1  ;;  %4739 = vtanh.f32 %v1655_v5  ;;  %v6746_v2 = vand.u32 4294901760, %v4738_v22  ;;  %v1659_v5 = vadd.f32 %v6590_v7, %v1498_v50 }
 0x257   : > { %1914 = vmatmul.f32.gmra.mxu2 %v1913_v31  ;;  %2396 = vmatmul.f32.gmra.mxu0 %v1910_v29  ;;  %v1927_v31 = vand.u32 4294901760, %v6739_v32  ;;  %v6758_v3 = vsub.f32 %v4738_v22, %v6746_v2  ;;  %4741 = vtanh.f32 %v1659_v5 }
 0x258   : > { %2199 = vmatmul.f32.gmra.mxu3 %v6686_v40  ;;  %2599 = vmatmul.f32.gmra.mxu1 %v1903_v43  ;;  %v1921_v43 = vand.u32 4294901760, %v1920_v14 }
 0x259   : > { %v1928_v60 = vsub.f32 %v6739_v32, %v1927_v31 }
 0x25a   : > { %v1123_v24 = vpop.f32.mrf.mxu2 }
 0x25b   : > { %v1124_v6 = vadd.f32 %v1123_v24, %v8733_v36  ;;  %v1342_v13 = vpop.f32.mrf.mxu3  ;;  %v6752_v24 = vand.u32 4294901760, %v3106_v61 }
 0x25c   : > { %v6744_v29 = vadd.f32 %v1342_v13, %v1119_v21  ;;  %v2322_v40 = vpop.f32.mrf.mxu0 }
 0x25d   : > { %v6748_v62 = vpop.f32.mrf.mxu1  ;;  %8734 = vst [vmem:[#allocation47_spill] sm:$0xff] %v6752_v24  ;;  %3112 = vmatpush.msrb.mxu0 %v6752_v24  ;;  %v6762_v13 = vsub.f32 %v3106_v61, %v6752_v24  ;;  %3835 = vmatpush.msra.mxu3 %v6752_v24  ;;  %v1935_v61 = vand.u32 4294901760, %v6758_v3 }
 0x25f   : > { %1922 = vmatmul.f32.gmra.mxu2 %v1921_v43  ;;  %2401 = vmatmul.f32.gmra.mxu0 %v6721_v0  ;;  %8735 = vst [vmem:[#allocation33_spill] sm:$0xff] %v6762_v13  ;;  %v4740_v0 = vpop.eup %4739  ;;  %v8420_v7 = vand.u32 4294901760, %v6762_v13  ;;  %v1929_v43 = vand.u32 4294901760, %v1928_v60  ;;  %v1936_v5 = vsub.f32 %v6758_v3, %v1935_v61 }
 0x260   : > { %2203 = vmatmul.f32.gmra.mxu3 %v6700_v30  ;;  %2605 = vmatmul.f32.gmra.mxu1 %v1911_v12  ;;  %v1502_v12 = vadd.f32 %v6586_v39, %v6612_v17  ;;  %v6771_v36 = vand.u32 4294901760, %v4740_v0  ;;  %v6780_v30 = vld [vmem:[%s8288_s4] ss:$0 sm:$0xff] }
 0x261   : > { %3627 = vmatpush.msra.mxu2 %v6762_v13  ;;  %v3403_v24 = vsub.f32 %v6762_v13, %v8420_v7 }
 0x262   : > { %v1795_v21 = vpop.f32.mrf.mxu2  ;;  %v1663_v17 = vadd.f32 %v6604_v4, %v1502_v12  ;;  %v6787_v60 = vsub.f32 %v4740_v0, %v6771_v36  ;;  %v1937_v12 = vand.u32 4294901760, %v1936_v5  ;;  %v3105_v0 = vld [vmem:[#allocation8 + $0x70] sm:$0xff] }
 0x263   : > { %v1348_v14 = vpop.f32.mrf.mxu3  ;;  %v3404_v39 = vand.u32 4294901760, %v3403_v24  ;;  %v1796_v7 = vadd.f32 %v6780_v30, %v1795_v21 }
 0x264   : > { %v6769_v22 = vadd.f32 %v1348_v14, %v1124_v6  ;;  %v2327_v6 = vpop.f32.mrf.mxu0  ;;  %v4742_v14 = vpop.eup %4741  ;;  %4743 = vtanh.f32 %v1663_v17 }
 0x265   : > { %v2516_v50 = vpop.f32.mrf.mxu1  ;;  %3405 = vmatpush.msrb.mxu1 %v3404_v39  ;;  %v6792_v24 = vand.u32 4294901760, %v4742_v14  ;;  %v6796_v39 = vand.u32 4294901760, %v3105_v0 }
 0x267   : > { %1930 = vmatmul.f32.gmra.mxu2 %v1929_v43  ;;  %2406 = vmatmul.f32.gmra.mxu0 %v6739_v32  ;;  %v1506_v32 = vadd.f32 %v6600_v9, %v6626_v20 }
 0x268   : > { %2207 = vmatmul.f32.gmra.mxu3 %v6714_v27  ;;  %2611 = vmatmul.f32.gmra.mxu1 %v1919_v19  ;;  %v1943_v27 = vand.u32 4294901760, %v6787_v60 }
 0x269   : > { %v1667_v21 = vadd.f32 %v6618_v55, %v1506_v32  ;;  %3114 = vmatpush.msrb.mxu0 %v6796_v39  ;;  %3837 = vmatpush.msra.mxu3 %v6796_v39 }
 0x26a   : > { %v1803_v13 = vpop.f32.mrf.mxu2  ;;  %v1944_v20 = vsub.f32 %v6787_v60, %v1943_v27 }
 0x26b   : > { %v2144_v43 = vpop.f32.mrf.mxu3  ;;  %v1804_v55 = vadd.f32 %v6780_v30, %v1803_v13  ;;  %4745 = vtanh.f32 %v1667_v21 }
 0x26c   : > { %v2145_v4 = vadd.f32 %v2144_v43, %v1796_v7  ;;  %v6804_v7 = vsub.f32 %v4742_v14, %v6792_v24  ;;  %v2332_v5 = vpop.f32.mrf.mxu0 }
 0x26d   : > { %v2522_v19 = vpop.f32.mrf.mxu1 }
 0x26e   : > { %v2323_v8 = vadd.f32 %v2322_v40, %v2145_v4  ;;  %v6808_v40 = vsub.f32 %v3105_v0, %v6796_v39  ;;  %v1945_v4 = vand.u32 4294901760, %v1944_v20 }
 0x26f   : > { %1938 = vmatmul.f32.gmra.mxu2 %v1937_v12  ;;  %2411 = vmatmul.f32.gmra.mxu0 %v6758_v3  ;;  %v4744_v3 = vpop.eup %4743  ;;  %v1951_v12 = vand.u32 4294901760, %v6804_v7 }
 0x270   : > { %2211 = vmatmul.f32.gmra.mxu3 %v6728_v33  ;;  %2617 = vmatmul.f32.gmra.mxu1 %v1927_v31  ;;  %v6800_v9 = vadd.f32 %v2516_v50, %v2323_v8  ;;  %v8430_v8 = vand.u32 4294901760, %v6808_v40  ;;  %v1510_v50 = vadd.f32 %v6614_v59, %v6640_v16  ;;  %v6816_v43 = vand.u32 4294901760, %v4744_v3 }
 0x271   : > { %3630 = vmatpush.msra.mxu2 %v6808_v40  ;;  %v1952_v16 = vsub.f32 %v6804_v7, %v1951_v12 }
 0x272   : > { %8736 = vst [vmem:[#allocation51_spill] sm:$0xff] %v6800_v9  ;;  %v1811_v17 = vpop.f32.mrf.mxu2  ;;  %v3409_v13 = vsub.f32 %v6808_v40, %v8430_v8  ;;  %v1671_v21 = vadd.f32 %v6632_v1, %v1510_v50  ;;  %v6829_v20 = vsub.f32 %v4744_v3, %v6816_v43  ;;  %v1514_v1 = vadd.f32 %v6628_v57, %v6654_v41  ;;  %v3104_v3 = vld [vmem:[#allocation8 + $0x68] sm:$0xff] }
 0x273   : > { %v2148_v31 = vpop.f32.mrf.mxu3 }
 0x274   : > { %v2149_v14 = vadd.f32 %v2148_v31, %v1804_v55  ;;  %v3410_v9 = vand.u32 4294901760, %v3409_v13  ;;  %v4746_v55 = vpop.eup %4745  ;;  %4747 = vtanh.f32 %v1671_v21 }
 0x275   : > { %v2528_v32 = vpop.f32.mrf.mxu1  ;;  %v6834_v50 = vand.u32 4294901760, %v4746_v55 }
 0x276   : > { %v2328_v0 = vadd.f32 %v2327_v6, %v2149_v14  ;;  %3411 = vmatpush.msrb.mxu1 %v3410_v9  ;;  %v1812_v6 = vadd.f32 %v6780_v30, %v1811_v17  ;;  %v6838_v9 = vand.u32 4294901760, %v3104_v3  ;;  %v1675_v17 = vadd.f32 %v6646_v52, %v1514_v1 }
 0x277   : > { %1946 = vmatmul.f32.gmra.mxu2 %v1945_v4  ;;  %2416 = vmatmul.f32.gmra.mxu0 %v6787_v60  ;;  %v1959_v4 = vand.u32 4294901760, %v6829_v20  ;;  %v6846_v21 = vsub.f32 %v4746_v55, %v6834_v50 }
 0x278   : > { %2215 = vmatmul.f32.gmra.mxu3 %v6746_v2  ;;  %2623 = vmatmul.f32.gmra.mxu1 %v1935_v61  ;;  %v6825_v59 = vadd.f32 %v2522_v19, %v2328_v0  ;;  %v2337_v61 = vpop.f32.mrf.mxu0  ;;  %v1953_v19 = vand.u32 4294901760, %v1952_v16  ;;  %4749 = vtanh.f32 %v1675_v17 }
 0x279   : > { %v1960_v57 = vsub.f32 %v6829_v20, %v1959_v4  ;;  %3116 = vmatpush.msrb.mxu0 %v6838_v9  ;;  %3839 = vmatpush.msra.mxu3 %v6838_v9 }
 0x27a   : > { %v1819_v31 = vpop.f32.mrf.mxu2 }
 0x27b   : > { %v2152_v14 = vpop.f32.mrf.mxu3  ;;  %v1820_v52 = vadd.f32 %v6780_v30, %v1819_v31  ;;  %v1961_v1 = vand.u32 4294901760, %v1960_v57 }
 0x27c   : > { %v2153_v60 = vadd.f32 %v2152_v14, %v1812_v6 }
 0x27d   : > { %v2534_v0 = vpop.f32.mrf.mxu1 }
 0x27e   : > { %v2333_v13 = vadd.f32 %v2332_v5, %v2153_v60  ;;  %v6850_v5 = vsub.f32 %v3104_v3, %v6838_v9  ;;  %v1967_v60 = vand.u32 4294901760, %v6846_v21 }
 0x27f   : > { %1954 = vmatmul.f32.gmra.mxu2 %v1953_v19  ;;  %2421 = vmatmul.f32.gmra.mxu0 %v6804_v7  ;;  %v4748_v7 = vpop.eup %4747 }
 0x280   : > { %2219 = vmatmul.f32.gmra.mxu3 %v6771_v36  ;;  %2629 = vmatmul.f32.gmra.mxu1 %v1943_v27  ;;  %v6842_v41 = vadd.f32 %v2528_v32, %v2333_v13  ;;  %v8429_v27 = vand.u32 4294901760, %v6850_v5  ;;  %v1518_v32 = vadd.f32 %v6642_v49, %v6668_v25  ;;  %v6858_v14 = vand.u32 4294901760, %v4748_v7  ;;  %v2342_v13 = vpop.f32.mrf.mxu0 }
 0x281   : > { %3633 = vmatpush.msra.mxu2 %v6850_v5  ;;  %v1968_v57 = vsub.f32 %v6846_v21, %v1967_v60 }
 0x282   : > { %v1827_v16 = vpop.f32.mrf.mxu2  ;;  %v3415_v31 = vsub.f32 %v6850_v5, %v8429_v27  ;;  %v1679_v17 = vadd.f32 %v6660_v63, %v1518_v32  ;;  %v1522_v63 = vadd.f32 %v6656_v56, %v6682_v54 }
 0x283   : > { %v2156_v6 = vpop.f32.mrf.mxu3 }
 0x284   : > { %v2157_v55 = vadd.f32 %v2156_v6, %v1820_v52  ;;  %v3416_v3 = vand.u32 4294901760, %v3415_v31  ;;  %v6871_v52 = vsub.f32 %v4748_v7, %v6858_v14  ;;  %v1828_v6 = vadd.f32 %v6780_v30, %v1827_v16 }
 0x285   : > { %v2540_v49 = vpop.f32.mrf.mxu1  ;;  %4751 = vtanh.f32 %v1679_v17  ;;  %v1683_v16 = vadd.f32 %v6674_v34, %v1522_v63 }
 0x286   : > { %v2338_v19 = vadd.f32 %v2337_v61, %v2157_v55  ;;  %3417 = vmatpush.msrb.mxu1 %v3416_v3  ;;  %v4750_v61 = vpop.eup %4749 }
 0x287   : > { %1962 = vmatmul.f32.gmra.mxu2 %v1961_v1  ;;  %2426 = vmatmul.f32.gmra.mxu0 %v6829_v20  ;;  %v1975_v1 = vand.u32 4294901760, %v6871_v52  ;;  %4753 = vtanh.f32 %v1683_v16 }
 0x288   : > { %2223 = vmatmul.f32.gmra.mxu3 %v6792_v24  ;;  %2635 = vmatmul.f32.gmra.mxu1 %v1951_v12  ;;  %v6867_v25 = vadd.f32 %v2534_v0, %v2338_v19  ;;  %v6876_v12 = vand.u32 4294901760, %v4750_v61  ;;  %v1969_v0 = vand.u32 4294901760, %v1968_v57  ;;  %v3103_v19 = vld [vmem:[#allocation8 + $0x60] sm:$0xff]  ;;  %v2347_v54 = vpop.f32.mrf.mxu0 }
 0x289   : > { %v6880_v7 = vand.u32 4294901760, %v3103_v19  ;;  %v1976_v56 = vsub.f32 %v6871_v52, %v1975_v1 }
 0x28a   : > { %v1835_v55 = vpop.f32.mrf.mxu2  ;;  %v6888_v17 = vsub.f32 %v4750_v61, %v6876_v12  ;;  %v1526_v61 = vadd.f32 %v6670_v26, %v6696_v46 }
 0x28b   : > { %v2160_v20 = vpop.f32.mrf.mxu3  ;;  %3118 = vmatpush.msrb.mxu0 %v6880_v7  ;;  %3841 = vmatpush.msra.mxu3 %v6880_v7  ;;  %v1836_v34 = vadd.f32 %v6780_v30, %v1835_v55 }
 0x28c   : > { %v2161_v32 = vadd.f32 %v2160_v20, %v1828_v6  ;;  %v1687_v16 = vadd.f32 %v6688_v44, %v1526_v61  ;;  %v1530_v44 = vadd.f32 %v6684_v11, %v6710_v48 }
 0x28e   : > { %v2343_v31 = vadd.f32 %v2342_v13, %v2161_v32  ;;  %v6892_v13 = vsub.f32 %v3103_v19, %v6880_v7  ;;  %v1977_v32 = vand.u32 4294901760, %v1976_v56  ;;  %4755 = vtanh.f32 %v1687_v16 }
 0x28f   : > { %1970 = vmatmul.f32.gmra.mxu2 %v1969_v0  ;;  %2431 = vmatmul.f32.gmra.mxu0 %v6846_v21  ;;  %v4752_v21 = vpop.eup %4751  ;;  %v1983_v0 = vand.u32 4294901760, %v6888_v17 }
 0x290   : > { %2227 = vmatmul.f32.gmra.mxu3 %v6816_v43  ;;  %2641 = vmatmul.f32.gmra.mxu1 %v1959_v4  ;;  %v6884_v3 = vadd.f32 %v2540_v49, %v2343_v31  ;;  %v2546_v4 = vpop.f32.mrf.mxu1  ;;  %v8426_v6 = vand.u32 4294901760, %v6892_v13  ;;  %v6900_v63 = vand.u32 4294901760, %v4752_v21 }
 0x291   : > { %3636 = vmatpush.msra.mxu2 %v6892_v13  ;;  %v1984_v26 = vsub.f32 %v6888_v17, %v1983_v0 }
 0x292   : > { %v1843_v57 = vpop.f32.mrf.mxu2  ;;  %v3421_v55 = vsub.f32 %v6892_v13, %v8426_v6  ;;  %v6913_v56 = vsub.f32 %v4752_v21, %v6900_v63 }
 0x293   : > { %v2164_v49 = vpop.f32.mrf.mxu3 }
 0x294   : > { %v2165_v20 = vadd.f32 %v2164_v49, %v1836_v34  ;;  %v3422_v19 = vand.u32 4294901760, %v3421_v55  ;;  %v4754_v34 = vpop.eup %4753  ;;  %v1991_v55 = vand.u32 4294901760, %v6913_v56 }
 0x296   : > { %v2348_v31 = vadd.f32 %v2347_v54, %v2165_v20  ;;  %3423 = vmatpush.msrb.mxu1 %v3422_v19  ;;  %v1844_v54 = vadd.f32 %v6780_v30, %v1843_v57  ;;  %v2352_v20 = vpop.f32.mrf.mxu0  ;;  %v1691_v19 = vadd.f32 %v6702_v10, %v1530_v44  ;;  %v1992_v11 = vsub.f32 %v6913_v56, %v1991_v55 }
 0x297   : > { %1978 = vmatmul.f32.gmra.mxu2 %v1977_v32  ;;  %2436 = vmatmul.f32.gmra.mxu0 %v6871_v52  ;;  %v1985_v32 = vand.u32 4294901760, %v1984_v26 }
 0x298   : > { %2231 = vmatmul.f32.gmra.mxu3 %v6834_v50  ;;  %2647 = vmatmul.f32.gmra.mxu1 %v1967_v60  ;;  %v6909_v46 = vadd.f32 %v2546_v4, %v2348_v31  ;;  %v6918_v60 = vand.u32 4294901760, %v4754_v34  ;;  %v2552_v4 = vpop.f32.mrf.mxu1  ;;  %v3102_v31 = vld [vmem:[#allocation8 + $0x58] sm:$0xff]  ;;  %4757 = vtanh.f32 %v1691_v19 }
 0x299   : > { %v6922_v57 = vand.u32 4294901760, %v3102_v31 }
 0x29a   : > { %v1851_v49 = vpop.f32.mrf.mxu2  ;;  %8737 = vst [vmem:[#allocation34_spill] sm:$0xff] %v6918_v60  ;;  %v6930_v16 = vsub.f32 %v4754_v34, %v6918_v60  ;;  %v1534_v34 = vadd.f32 %v6698_v38, %v6726_v37 }
 0x29b   : > { %v2168_v52 = vpop.f32.mrf.mxu3  ;;  %3120 = vmatpush.msrb.mxu0 %v6922_v57  ;;  %v6934_v26 = vsub.f32 %v3102_v31, %v6922_v57  ;;  %3843 = vmatpush.msra.mxu3 %v6922_v57  ;;  %v1852_v10 = vadd.f32 %v6780_v30, %v1851_v49 }
 0x29c   : > { %v2169_v61 = vadd.f32 %v2168_v52, %v1844_v54  ;;  %v1695_v6 = vadd.f32 %v6716_v28, %v1534_v34 }
 0x29d   : > { %3639 = vmatpush.msra.mxu2 %v6934_v26 }
 0x29e   : > { %v2353_v21 = vadd.f32 %v2352_v20, %v2169_v61  ;;  %v2357_v61 = vpop.f32.mrf.mxu0  ;;  %4759 = vtanh.f32 %v1695_v6 }
 0x29f   : > { %1986 = vmatmul.f32.gmra.mxu2 %v1985_v32  ;;  %2441 = vmatmul.f32.gmra.mxu0 %v6888_v17  ;;  %v4756_v17 = vpop.eup %4755  ;;  %v1999_v32 = vand.u32 4294901760, %v6930_v16 }
 0x2a0   : > { %2235 = vmatmul.f32.gmra.mxu3 %v6858_v14  ;;  %2653 = vmatmul.f32.gmra.mxu1 %v1975_v1  ;;  %v6926_v48 = vadd.f32 %v2552_v4, %v2353_v21  ;;  %v8428_v1 = vand.u32 4294901760, %v6934_v26  ;;  %v6942_v44 = vand.u32 4294901760, %v4756_v17  ;;  %v1993_v4 = vand.u32 4294901760, %v1992_v11  ;;  %v2558_v31 = vpop.f32.mrf.mxu1 }
 0x2a1   : > { %v2000_v37 = vsub.f32 %v6930_v16, %v1999_v32 }
 0x2a2   : > { %v1859_v54 = vpop.f32.mrf.mxu2  ;;  %8738 = vst [vmem:[#allocation29_spill] sm:$0xff] %v6942_v44  ;;  %v3427_v49 = vsub.f32 %v6934_v26, %v8428_v1  ;;  %v2006_v11 = vsub.f32 %v4756_v17, %v6942_v44 }
 0x2a3   : > { %v2172_v20 = vpop.f32.mrf.mxu3 }
 0x2a4   : > { %v2173_v52 = vadd.f32 %v2172_v20, %v1852_v10  ;;  %v3428_v19 = vand.u32 4294901760, %v3427_v49  ;;  %v4758_v10 = vpop.eup %4757  ;;  %v1860_v20 = vadd.f32 %v6780_v30, %v1859_v54  ;;  %v3101_v49 = vld [vmem:[#allocation8 + $0x50] sm:$0xff] }
 0x2a5   : > { %v6960_v34 = vand.u32 4294901760, %v4758_v10  ;;  %v6963_v17 = vand.u32 4294901760, %v3101_v49 }
 0x2a6   : > { %v2358_v21 = vadd.f32 %v2357_v61, %v2173_v52  ;;  %3429 = vmatpush.msrb.mxu1 %v3428_v19 }
 0x2a7   : > { %1994 = vmatmul.f32.gmra.mxu2 %v1993_v4  ;;  %2446 = vmatmul.f32.gmra.mxu0 %v6913_v56  ;;  %v1538_v56 = vadd.f32 %v6712_v15, %v6744_v29  ;;  %8739 = vst [vmem:[#allocation28_spill] sm:$0xff] %v6960_v34  ;;  %v2007_v4 = vand.u32 4294901760, %v2006_v11  ;;  %v2014_v15 = vsub.f32 %v4758_v10, %v6960_v34 }
 0x2a8   : > { %2239 = vmatmul.f32.gmra.mxu3 %v6876_v12  ;;  %2659 = vmatmul.f32.gmra.mxu1 %v1983_v0  ;;  %v6951_v38 = vadd.f32 %v2558_v31, %v2358_v21  ;;  %v2001_v0 = vand.u32 4294901760, %v2000_v37  ;;  %v6970_v29 = vsub.f32 %v3101_v49, %v6963_v17  ;;  %v4760_v21 = vpop.eup %4759 }
 0x2a9   : > { %v1699_v54 = vadd.f32 %v6732_v35, %v1538_v56  ;;  %v2008_v6 = vsub.f32 %v2006_v11, %v2007_v4  ;;  %3122 = vmatpush.msrb.mxu0 %v6963_v17  ;;  %3845 = vmatpush.msra.mxu3 %v6963_v17  ;;  %v6980_v10 = vand.u32 4294901760, %v4760_v21 }
 0x2aa   : > { %v1867_v52 = vpop.f32.mrf.mxu2  ;;  %v8427_v35 = vand.u32 4294901760, %v6970_v29  ;;  %3642 = vmatpush.msra.mxu2 %v6970_v29 }
 0x2ab   : > { %v2176_v61 = vpop.f32.mrf.mxu3  ;;  %4761 = vtanh.f32 %v1699_v54  ;;  %8740 = vst [vmem:[#allocation38_spill] sm:$0xff] %v6980_v10 }
 0x2ac   : > { %v6958_v28 = vadd.f32 %v2176_v61, %v1860_v20  ;;  %v2009_v20 = vand.u32 4294901760, %v2008_v6  ;;  %v2015_v61 = vand.u32 4294901760, %v2014_v15 }
 0x2ae   : > { %v2016_v49 = vsub.f32 %v2014_v15, %v2015_v61 }
 0x2af   : > { %2002 = vmatmul.f32.gmra.mxu2 %v2001_v0  ;;  %2451 = vmatmul.f32.gmra.mxu0 %v6930_v16  ;;  %v1868_v16 = vadd.f32 %v6780_v30, %v1867_v52  ;;  %v3433_v52 = vsub.f32 %v6970_v29, %v8427_v35 }
 0x2b0   : > { %2243 = vmatmul.f32.gmra.mxu3 %v6900_v63  ;;  %2665 = vmatmul.f32.gmra.mxu1 %v1991_v55  ;;  %v1542_v55 = vadd.f32 %v6730_v47, %v6769_v22  ;;  %v2022_v47 = vsub.f32 %v4760_v21, %v6980_v10 }
 0x2b1   : > { %v3434_v56 = vand.u32 4294901760, %v3433_v52  ;;  %v4762_v22 = vpop.eup %4761 }
 0x2b2   : > { %v1875_v31 = vpop.f32.mrf.mxu2  ;;  %v1703_v0 = vadd.f32 %v6748_v62, %v1542_v55  ;;  %v2023_v52 = vand.u32 4294901760, %v2022_v47  ;;  %v3100_v62 = vld [vmem:[#allocation8 + $0x48] sm:$0xff] }
 0x2b3   : > { %v2180_v19 = vpop.f32.mrf.mxu3  ;;  %3435 = vmatpush.msrb.mxu1 %v3434_v56  ;;  %v1876_v54 = vadd.f32 %v6780_v30, %v1875_v31 }
 0x2b4   : > { %v6978_v37 = vadd.f32 %v2180_v19, %v1868_v16  ;;  %4763 = vtanh.f32 %v1703_v0  ;;  %v2024_v21 = vsub.f32 %v2022_v47, %v2023_v52 }
 0x2b7   : > { %2010 = vmatmul.f32.gmra.mxu2 %v2009_v20  ;;  %2456 = vmatmul.f32.gmra.mxu0 %v2006_v11  ;;  %v6991_v20 = vand.u32 4294901760, %v4762_v22  ;;  %v2017_v11 = vand.u32 4294901760, %v2016_v49 }
 0x2b8   : > { %2247 = vmatmul.f32.gmra.mxu3 %v6918_v60  ;;  %2671 = vmatmul.f32.gmra.mxu1 %v1999_v32  ;;  %v6993_v32 = vand.u32 4294901760, %v3100_v62 }
 0x2b9   : > { %8742 = vst [vmem:[#allocation42_spill] sm:$0xff] %v6991_v20  ;;  %v2030_v31 = vsub.f32 %v4762_v22, %v6991_v20  ;;  %v2025_v22 = vand.u32 4294901760, %v2024_v21 }
 0x2ba   : > { %v1883_v6 = vpop.f32.mrf.mxu2  ;;  %3124 = vmatpush.msrb.mxu0 %v6993_v32  ;;  %v6999_v55 = vsub.f32 %v3100_v62, %v6993_v32  ;;  %3847 = vmatpush.msra.mxu3 %v6993_v32  ;;  %v4764_v56 = vpop.eup %4763 }
 0x2bb   : > { %v2184_v16 = vpop.f32.mrf.mxu3  ;;  %v1884_v0 = vadd.f32 %v6780_v30, %v1883_v6 }
 0x2bc   : > { %v6989_v19 = vadd.f32 %v2184_v16, %v1876_v54  ;;  %v8435_v54 = vand.u32 4294901760, %v6999_v55  ;;  %3645 = vmatpush.msra.mxu2 %v6999_v55  ;;  %v7007_v16 = vand.u32 4294901760, %v4764_v56 }
 0x2be   : > { %8741 = vst [vmem:[#allocation55_spill] sm:$0xff] %v6989_v19  ;;  %v3439_v62 = vsub.f32 %v6999_v55, %v8435_v54  ;;  %v2038_v1 = vsub.f32 %v4764_v56, %v7007_v16 }
 0x2bf   : > { %2018 = vmatmul.f32.gmra.mxu2 %v2017_v11  ;;  %2461 = vmatmul.f32.gmra.mxu0 %v2014_v15  ;;  %8744 = vst [vmem:[#allocation31_spill] sm:$0xff] %v7007_v16  ;;  %v2031_v11 = vand.u32 4294901760, %v2030_v31 }
 0x2c0   : > { %2251 = vmatmul.f32.gmra.mxu3 %v6942_v44  ;;  %2677 = vmatmul.f32.gmra.mxu1 %v2007_v4  ;;  %v3440_v35 = vand.u32 4294901760, %v3439_v62  ;;  %v3099_v44 = vld [vmem:[#allocation8 + $0x40] sm:$0xff] }
 0x2c1   : > { %v2032_v6 = vsub.f32 %v2030_v31, %v2031_v11 }
 0x2c2   : > { %v1891_v49 = vpop.f32.mrf.mxu2  ;;  %3441 = vmatpush.msrb.mxu1 %v3440_v35 }
 0x2c3   : > { %v2188_v15 = vpop.f32.mrf.mxu3  ;;  %v2033_v8 = vand.u32 4294901760, %v2032_v6 }
 0x2c4   : > { %v7005_v4 = vadd.f32 %v2188_v15, %v1884_v0  ;;  %v1892_v0 = vadd.f32 %v6780_v30, %v1891_v49 }
 0x2c6   : > { %8743 = vst [vmem:[#allocation46_spill] sm:$0xff] %v7005_v4  ;;  %v2039_v4 = vand.u32 4294901760, %v2038_v1 }
 0x2c7   : > { %2026 = vmatmul.f32.gmra.mxu2 %v2025_v22  ;;  %2466 = vmatmul.f32.gmra.mxu0 %v2022_v47  ;;  %v7017_v47 = vand.u32 4294901760, %v3099_v44 }
 0x2c8   : > { %2255 = vmatmul.f32.gmra.mxu3 %v6960_v34  ;;  %2683 = vmatmul.f32.gmra.mxu1 %v2015_v61  ;;  %v2040_v61 = vsub.f32 %v2038_v1, %v2039_v4 }
 0x2c9   : > { %3126 = vmatpush.msrb.mxu0 %v7017_v47  ;;  %v7022_v35 = vsub.f32 %v3099_v44, %v7017_v47  ;;  %3849 = vmatpush.msra.mxu3 %v7017_v47 }
 0x2ca   : > { %v1899_v15 = vpop.f32.mrf.mxu2  ;;  %v2041_v22 = vand.u32 4294901760, %v2040_v61 }
 0x2cb   : > { %v2192_v27 = vpop.f32.mrf.mxu3  ;;  %3648 = vmatpush.msra.mxu2 %v7022_v35 }
 0x2cc   : > { %v7015_v21 = vadd.f32 %v2192_v27, %v1892_v0  ;;  %v1900_v27 = vadd.f32 %v6780_v30, %v1899_v15 }
 0x2ce   : > { %8745 = vst [vmem:[#allocation30_spill] sm:$0xff] %v7015_v21 }
 0x2cf   : > { %2034 = vmatmul.f32.gmra.mxu2 %v2033_v8  ;;  %2471 = vmatmul.f32.gmra.mxu0 %v2030_v31  ;;  %v8433_v8 = vand.u32 4294901760, %v7022_v35 }
 0x2d0   : > { %2259 = vmatmul.f32.gmra.mxu3 %v6980_v10  ;;  %2689 = vmatmul.f32.gmra.mxu1 %v2023_v52 }
 0x2d1   : > { %v3445_v52 = vsub.f32 %v7022_v35, %v8433_v8  ;;  %v3097_v8 = vld [vmem:[#allocation8 + $0x30] sm:$0xff] }
 0x2d2   : > { %v1907_v56 = vpop.f32.mrf.mxu2 }
 0x2d3   : > { %v2196_v49 = vpop.f32.mrf.mxu3  ;;  %v3446_v44 = vand.u32 4294901760, %v3445_v52  ;;  %v1908_v62 = vadd.f32 %v6780_v30, %v1907_v56 }
 0x2d4   : > { %v7028_v31 = vadd.f32 %v2196_v49, %v1900_v27  ;;  %v3098_v27 = vld [vmem:[#allocation8 + $0x38] sm:$0xff] }
 0x2d5   : > { %3447 = vmatpush.msrb.mxu1 %v3446_v44  ;;  %v7038_v61 = vand.u32 4294901760, %v3098_v27 }
 0x2d6   : > { %8746 = vst [vmem:[#allocation50_spill] sm:$0xff] %v7028_v31  ;;  %v8764_v31 = vld [vmem:[#allocation24_spill] sm:$0xff] }
 0x2d7   : > { %2042 = vmatmul.f32.gmra.mxu2 %v2041_v22  ;;  %2476 = vmatmul.f32.gmra.mxu0 %v2038_v1  ;;  %v7043_v1 = vsub.f32 %v3098_v27, %v7038_v61 }
 0x2d8   : > { %2263 = vmatmul.f32.gmra.mxu3 %v6991_v20  ;;  %2695 = vmatmul.f32.gmra.mxu1 %v2031_v11 }
 0x2d9   : > { %3128 = vmatpush.msrb.mxu0 %v7038_v61  ;;  %3851 = vmatpush.msra.mxu3 %v7038_v61  ;;  %v8434_v22 = vand.u32 4294901760, %v7043_v1 }
 0x2da   : > { %v1915_v6 = vpop.f32.mrf.mxu2  ;;  %3651 = vmatpush.msra.mxu2 %v7043_v1 }
 0x2db   : > { %v2200_v0 = vpop.f32.mrf.mxu3  ;;  %v1916_v11 = vadd.f32 %v6780_v30, %v1915_v6 }
 0x2dc   : > { %v7035_v15 = vadd.f32 %v2200_v0, %v1908_v62 }
 0x2de   : > { %8747 = vst [vmem:[#allocation54_spill] sm:$0xff] %v7035_v15 }
 0x2df   : > { %2770 = vmatmul.f32.vlgmr.msrb.gmra.mxu2 %v6424_v58 }
 0x2e0   : > { %2267 = vmatmul.f32.gmra.mxu3 %v7007_v16  ;;  %2701 = vmatmul.f32.gmra.mxu1 %v2039_v4  ;;  %v3451_v4 = vsub.f32 %v7043_v1, %v8434_v22 }
 0x2e2   : > { %v1923_v56 = vpop.f32.mrf.mxu2  ;;  %v3452_v44 = vand.u32 4294901760, %v3451_v4 }
 0x2e3   : > { %v2204_v49 = vpop.f32.mrf.mxu3  ;;  %v1924_v62 = vadd.f32 %v6780_v30, %v1923_v56 }
 0x2e4   : > { %v7049_v52 = vadd.f32 %v2204_v49, %v1916_v11  ;;  %3453 = vmatpush.msrb.mxu1 %v3452_v44  ;;  %v7060_v11 = vand.u32 4294901760, %v3097_v8 }
 0x2e6   : > { %8748 = vst [vmem:[#allocation62_spill] sm:$0xff] %v7049_v52  ;;  %3130 = vmatpush.msrb.mxu0 %v7060_v11  ;;  %v7065_v49 = vsub.f32 %v3097_v8, %v7060_v11  ;;  %3853 = vmatpush.msra.mxu3 %v7060_v11 }
 0x2e7   : > { %2774 = vmatmul.f32.gmra.mxu2 %v6455_v23 }
 0x2e8   : > { %2931 = vmatmul.f32.vlgmr.msrb.gmra.mxu3 %v6424_v58  ;;  %v8436_v44 = vand.u32 4294901760, %v7065_v49  ;;  %3654 = vmatpush.msra.mxu2 %v7065_v49 }
 0x2ea   : > { %v1931_v6 = vpop.f32.mrf.mxu2 }
 0x2eb   : > { %v2208_v0 = vpop.f32.mrf.mxu3  ;;  %v1932_v58 = vadd.f32 %v6780_v30, %v1931_v6 }
 0x2ec   : > { %v7057_v27 = vadd.f32 %v2208_v0, %v1924_v62 }
 0x2ee   : > { %8749 = vst [vmem:[#allocation59_spill] sm:$0xff] %v7057_v27  ;;  %v3096_v27 = vld [vmem:[#allocation8 + $0x28] sm:$0xff] }
 0x2ef   : > { %2778 = vmatmul.f32.gmra.mxu2 %v6490_v51 }
 0x2f0   : > { %2935 = vmatmul.f32.gmra.mxu3 %v6455_v23  ;;  %v3457_v23 = vsub.f32 %v7065_v49, %v8436_v44 }
 0x2f2   : > { %v1939_v56 = vpop.f32.mrf.mxu2  ;;  %v3458_v8 = vand.u32 4294901760, %v3457_v23 }
 0x2f3   : > { %v2212_v4 = vpop.f32.mrf.mxu3  ;;  %v1940_v6 = vadd.f32 %v6780_v30, %v1939_v56 }
 0x2f4   : > { %v7071_v62 = vadd.f32 %v2212_v4, %v1932_v58  ;;  %3459 = vmatpush.msrb.mxu1 %v3458_v8  ;;  %v7082_v58 = vand.u32 4294901760, %v3096_v27 }
 0x2f6   : > { %8750 = vst [vmem:[#allocation64_spill] sm:$0xff] %v7071_v62  ;;  %3132 = vmatpush.msrb.mxu0 %v7082_v58  ;;  %v7087_v4 = vsub.f32 %v3096_v27, %v7082_v58  ;;  %3855 = vmatpush.msra.mxu3 %v7082_v58 }
 0x2f7   : > { %2782 = vmatmul.f32.gmra.mxu2 %v6521_v18 }
 0x2f8   : > { %2939 = vmatmul.f32.gmra.mxu3 %v6490_v51  ;;  %3657 = vmatpush.msra.mxu2 %v7087_v4 }
 0x2fa   : > { %v1947_v0 = vpop.f32.mrf.mxu2 }
 0x2fb   : > { %v2216_v22 = vpop.f32.mrf.mxu3  ;;  %v1948_v51 = vadd.f32 %v6780_v30, %v1947_v0 }
 0x2fc   : > { %v7079_v54 = vadd.f32 %v2216_v22, %v1940_v6  ;;  %v8437_v22 = vand.u32 4294901760, %v7087_v4  ;;  %v7098_v6 = vpop.f32.mrf.mxu1 }
 0x2fe   : > { %8751 = vst [vmem:[#allocation65_spill] sm:$0xff] %v7079_v54 }
 0x2ff   : > { %2786 = vmatmul.f32.gmra.mxu2 %v6543_v53 }
 0x300   : > { %2943 = vmatmul.f32.gmra.mxu3 %v6521_v18  ;;  %v3463_v18 = vsub.f32 %v7087_v4, %v8437_v22 }
 0x302   : > { %v1955_v56 = vpop.f32.mrf.mxu2  ;;  %v3464_v27 = vand.u32 4294901760, %v3463_v18 }
 0x303   : > { %v2220_v23 = vpop.f32.mrf.mxu3  ;;  %v1956_v0 = vadd.f32 %v6780_v30, %v1955_v56 }
 0x304   : > { %v7093_v8 = vadd.f32 %v2220_v23, %v1948_v51  ;;  %3465 = vmatpush.msrb.mxu1 %v3464_v27  ;;  %v7105_v51 = vpop.f32.mrf.mxu0  ;;  %v3095_v23 = vld [vmem:[#allocation8 + $0x20] sm:$0xff] }
 0x305   : > { %v7108_v22 = vand.u32 4294901760, %v3095_v23 }
 0x306   : > { %8752 = vst [vmem:[#allocation36_spill] sm:$0xff] %v7093_v8  ;;  %v7110_v8 = vpop.f32.mrf.mxu1 }
 0x307   : > { %2790 = vmatmul.f32.gmra.mxu2 %v6560_v45  ;;  %8754 = vst [vmem:[#allocation40_spill] sm:$0xff] %v7110_v8  ;;  %3134 = vmatpush.msrb.mxu0 %v7108_v22  ;;  %v3091_v8 = vld [vmem:[#allocation8] sm:$0xff] }
 0x308   : > { %2947 = vmatmul.f32.gmra.mxu3 %v6543_v53  ;;  %v7115_v53 = vsub.f32 %v3095_v23, %v7108_v22 }
 0x309   : > { %3857 = vmatpush.msra.mxu3 %v7108_v22 }
 0x30a   : > { %v1963_v44 = vpop.f32.mrf.mxu2  ;;  %v8442_v27 = vand.u32 4294901760, %v7115_v53  ;;  %3660 = vmatpush.msra.mxu2 %v7115_v53 }
 0x30b   : > { %v2224_v54 = vpop.f32.mrf.mxu3 }
 0x30c   : > { %v7103_v62 = vadd.f32 %v2224_v54, %v1956_v0  ;;  %v1964_v54 = vadd.f32 %v6780_v30, %v1963_v44  ;;  %v7127_v52 = vpop.f32.mrf.mxu0 }
 0x30d   : > { %8757 = vst [vmem:[#allocation68_spill] sm:$0xff] %v7127_v52 }
 0x30e   : > { %8753 = vst [vmem:[#allocation37_spill] sm:$0xff] %v7103_v62  ;;  %v8756_v62 = vld [vmem:[#allocation22_spill] sm:$0xff]  ;;  %v7130_v44 = vpop.f32.mrf.mxu1 }
 0x30f   : > { %2794 = vmatmul.f32.gmra.mxu2 %v6574_v42  ;;  %8758 = vst [vmem:[#allocation41_spill] sm:$0xff] %v7130_v44 }
 0x310   : > { %2951 = vmatmul.f32.gmra.mxu3 %v6560_v45  ;;  %v3469_v45 = vsub.f32 %v7115_v53, %v8442_v27 }
 0x312   : > { %v1971_v56 = vpop.f32.mrf.mxu2  ;;  %v3470_v23 = vand.u32 4294901760, %v3469_v45 }
 0x313   : > { %v2228_v18 = vpop.f32.mrf.mxu3  ;;  %v1972_v16 = vadd.f32 %v6780_v30, %v1971_v56 }
 0x314   : > { %v7121_v0 = vadd.f32 %v2228_v18, %v1964_v54  ;;  %3471 = vmatpush.msrb.mxu1 %v3470_v23  ;;  %v3094_v18 = vld [vmem:[#allocation8 + $0x18] sm:$0xff]  ;;  %v7144_v45 = vpop.f32.mrf.mxu0 }
 0x315   : > { %v7136_v27 = vand.u32 4294901760, %v3094_v18  ;;  %8761 = vst [vmem:[#allocation16_spill] sm:$0xff] %v7144_v45 }
 0x316   : > { %8755 = vst [vmem:[#allocation67_spill] sm:$0xff] %v7121_v0  ;;  %v8760_v0 = vld [vmem:[#allocation25_spill] sm:$0xff] }
 0x317   : > { %2798 = vmatmul.f32.gmra.mxu2 %v8756_v62  ;;  %3136 = vmatpush.msrb.mxu0 %v7136_v27 }
 0x318   : > { %2955 = vmatmul.f32.gmra.mxu3 %v6574_v42  ;;  %v7141_v42 = vsub.f32 %v3094_v18, %v7136_v27 }
 0x319   : > { %3859 = vmatpush.msra.mxu3 %v7136_v27 }
 0x31a   : > { %v1979_v15 = vpop.f32.mrf.mxu2  ;;  %v8447_v23 = vand.u32 4294901760, %v7141_v42  ;;  %3663 = vmatpush.msra.mxu2 %v7141_v42 }
 0x31b   : > { %v2232_v20 = vpop.f32.mrf.mxu3  ;;  %v1980_v56 = vadd.f32 %v6780_v30, %v1979_v15 }
 0x31c   : > { %v7133_v54 = vadd.f32 %v2232_v20, %v1972_v16  ;;  %v3475_v18 = vsub.f32 %v7141_v42, %v8447_v23  ;;  %v7159_v44 = vpop.f32.mrf.mxu0 }
 0x31d   : > { %8765 = vst [vmem:[#allocation18_spill] sm:$0xff] %v7159_v44 }
 0x31e   : > { %8759 = vst [vmem:[#allocation15_spill] sm:$0xff] %v7133_v54  ;;  %v7149_v54 = vpop.f32.mrf.mxu1  ;;  %v3476_v10 = vand.u32 4294901760, %v3475_v18 }
 0x31f   : > { %2802 = vmatmul.f32.gmra.mxu2 %v8760_v0  ;;  %8762 = vst [vmem:[#allocation44_spill] sm:$0xff] %v7149_v54 }
 0x320   : > { %2959 = vmatmul.f32.gmra.mxu3 %v8756_v62  ;;  %3477 = vmatpush.msrb.mxu1 %v3476_v10 }
 0x322   : > { %v1987_v20 = vpop.f32.mrf.mxu2 }
 0x323   : > { %v2236_v16 = vpop.f32.mrf.mxu3  ;;  %v1988_v15 = vadd.f32 %v6780_v30, %v1987_v20 }
 0x324   : > { %v7151_v62 = vadd.f32 %v2236_v16, %v1980_v56  ;;  %v3093_v16 = vld [vmem:[#allocation8 + $0x10] sm:$0xff] }
 0x325   : > { %v7166_v23 = vand.u32 4294901760, %v3093_v16 }
 0x326   : > { %8763 = vst [vmem:[#allocation17_spill] sm:$0xff] %v7151_v62  ;;  %v7163_v56 = vpop.f32.mrf.mxu1  ;;  %v8768_v62 = vld [vmem:[#allocation35_spill] sm:$0xff] }
 0x327   : > { %2806 = vmatmul.f32.gmra.mxu2 %v8764_v31  ;;  %8767 = vst [vmem:[#allocation19_spill] sm:$0xff] %v7163_v56  ;;  %3138 = vmatpush.msrb.mxu0 %v7166_v23  ;;  %v7171_v10 = vsub.f32 %v3093_v16, %v7166_v23  ;;  %v8771_v16 = vld [vmem:[#allocation57_spill] sm:$0xff] }
 0x328   : > { %2963 = vmatmul.f32.gmra.mxu3 %v8760_v0 }
 0x329   : > { %3861 = vmatpush.msra.mxu3 %v7166_v23  ;;  %v8448_v18 = vand.u32 4294901760, %v7171_v10  ;;  %3666 = vmatpush.msra.mxu2 %v7171_v10 }
 0x32a   : > { %v1995_v21 = vpop.f32.mrf.mxu2 }
 0x32b   : > { %v2240_v34 = vpop.f32.mrf.mxu3  ;;  %v1996_v0 = vadd.f32 %v6780_v30, %v1995_v21 }
 0x32c   : > { %v7161_v45 = vadd.f32 %v2240_v34, %v1988_v15 }
 0x32e   : > { %8766 = vst [vmem:[#allocation45_spill] sm:$0xff] %v7161_v45  ;;  %v7182_v45 = vpop.f32.mrf.mxu0  ;;  %v7185_v54 = vpop.f32.mrf.mxu1 }
 0x32f   : > { %2810 = vmatmul.f32.gmra.mxu2 %v8768_v62  ;;  %8770 = vst [vmem:[#allocation48_spill] sm:$0xff] %v7182_v45 }
 0x330   : > { %2967 = vmatmul.f32.gmra.mxu3 %v8764_v31  ;;  %v3481_v31 = vsub.f32 %v7171_v10, %v8448_v18  ;;  %8772 = vst [vmem:[#allocation21_spill] sm:$0xff] %v7185_v54 }
 0x332   : > { %v2003_v34 = vpop.f32.mrf.mxu2  ;;  %v3482_v56 = vand.u32 4294901760, %v3481_v31 }
 0x333   : > { %v2244_v20 = vpop.f32.mrf.mxu3  ;;  %v2004_v21 = vadd.f32 %v6780_v30, %v2003_v34 }
 0x334   : > { %v7177_v15 = vadd.f32 %v2244_v20, %v1996_v0  ;;  %3483 = vmatpush.msrb.mxu1 %v3482_v56  ;;  %v3092_v20 = vld [vmem:[#allocation8 + $0x8] sm:$0xff] }
 0x335   : > { %v7192_v18 = vand.u32 4294901760, %v3092_v20 }
 0x336   : > { %8769 = vst [vmem:[#allocation20_spill] sm:$0xff] %v7177_v15  ;;  %v8774_v15 = vld [vmem:[#allocation39_spill] sm:$0xff]  ;;  %v7194_v45 = vpop.f32.mrf.mxu0  ;;  %v7202_v56 = vpop.f32.mrf.mxu1 }
 0x337   : > { %2814 = vmatmul.f32.gmra.mxu2 %v8771_v16  ;;  %8775 = vst [vmem:[#allocation52_spill] sm:$0xff] %v7194_v45  ;;  %3140 = vmatpush.msrb.mxu0 %v7192_v18 }
 0x338   : > { %2971 = vmatmul.f32.gmra.mxu3 %v8768_v62  ;;  %v7199_v62 = vsub.f32 %v3092_v20, %v7192_v18  ;;  %8776 = vst [vmem:[#allocation23_spill] sm:$0xff] %v7202_v56  ;;  %v8778_v20 = vld [vmem:[#allocation27_spill] sm:$0xff] }
 0x339   : > { %3863 = vmatpush.msra.mxu3 %v7192_v18 }
 0x33a   : > { %v2011_v44 = vpop.f32.mrf.mxu2  ;;  %3669 = vmatpush.msra.mxu2 %v7199_v62 }
 0x33b   : > { %v2248_v19 = vpop.f32.mrf.mxu3 }
 0x33c   : > { %v7189_v0 = vadd.f32 %v2248_v19, %v2004_v21  ;;  %v2012_v19 = vadd.f32 %v6780_v30, %v2011_v44  ;;  %v8451_v21 = vand.u32 4294901760, %v7199_v62 }
 0x33e   : > { %8773 = vst [vmem:[#allocation49_spill] sm:$0xff] %v7189_v0  ;;  %v7214_v56 = vpop.f32.mrf.mxu0  ;;  %v7217_v52 = vpop.f32.mrf.mxu1 }
 0x33f   : > { %2818 = vmatmul.f32.gmra.mxu2 %v8774_v15  ;;  %8779 = vst [vmem:[#allocation56_spill] sm:$0xff] %v7214_v56  ;;  %v8788_v56 = vld [vmem:[#allocation43_spill] sm:$0xff] }
 0x340   : > { %2975 = vmatmul.f32.gmra.mxu3 %v8771_v16  ;;  %v3487_v16 = vsub.f32 %v7199_v62, %v8451_v21  ;;  %8780 = vst [vmem:[#allocation58_spill] sm:$0xff] %v7217_v52 }
 0x342   : > { %v2019_v34 = vpop.f32.mrf.mxu2  ;;  %v3488_v54 = vand.u32 4294901760, %v3487_v16 }
 0x343   : > { %v2252_v31 = vpop.f32.mrf.mxu3  ;;  %v2020_v44 = vadd.f32 %v6780_v30, %v2019_v34 }
 0x344   : > { %v7207_v0 = vadd.f32 %v2252_v31, %v2012_v19  ;;  %3489 = vmatpush.msrb.mxu1 %v3488_v54  ;;  %v7221_v31 = vand.u32 4294901760, %v3091_v8  ;;  %v8782_v54 = vld [vmem:[#allocation26_spill] sm:$0xff] }
 0x346   : > { %8777 = vst [vmem:[#allocation53_spill] sm:$0xff] %v7207_v0  ;;  %3142 = vmatpush.msrb.mxu0 %v7221_v31  ;;  %v7225_v16 = vsub.f32 %v3091_v8, %v7221_v31  ;;  %3865 = vmatpush.msra.mxu3 %v7221_v31  ;;  %v4830_v8 = vld [vmem:[%s8288_s4] ss:$0 sm:$0xff] }
 0x347   : > { %2822 = vmatmul.f32.gmra.mxu2 %v8778_v20 }
 0x348   : > { %2979 = vmatmul.f32.gmra.mxu3 %v8774_v15  ;;  %v8783_v15 = vld [vmem:[#allocation33_spill] sm:$0xff]  ;;  %v3492_v34 = vand.u32 4294901760, %v7225_v16  ;;  %3672 = vmatpush.msra.mxu2 %v7225_v16 }
 0x349   : > { %v8784_v30 = vand.u32 4294901760, %v8783_v15  ;;  %v8786_v15 = vand.u32 4294901760, %v6850_v5  ;;  %v8790_v5 = vand.u32 4294901760, %v6934_v26  ;;  %v8793_v26 = vand.u32 4294901760, %v7022_v35 }
 0x34a   : > { %v2027_v45 = vpop.f32.mrf.mxu2 }
 0x34b   : > { %v2256_v60 = vpop.f32.mrf.mxu3  ;;  %4062 = vmatpush.msra.mxu0 %v8784_v30 }
 0x34c   : > { %v7219_v19 = vadd.f32 %v2256_v60, %v2020_v44  ;;  %v8785_v60 = vand.u32 4294901760, %v6808_v40  ;;  %v2028_v44 = vadd.f32 %v4830_v8, %v2027_v45  ;;  %v8787_v40 = vand.u32 4294901760, %v6892_v13  ;;  %v8789_v45 = vld [vmem:[#allocation47_spill] sm:$0xff] }
 0x34e   : > { %8781 = vst [vmem:[#allocation60_spill] sm:$0xff] %v7219_v19  ;;  %4066 = vmatpush.msra.mxu0 %v8785_v60  ;;  %v3493_v19 = vsub.f32 %v7225_v16, %v3492_v34  ;;  %v7248_v60 = vpop.f32.mrf.mxu1 }
 0x34f   : > { %2826 = vmatmul.f32.gmra.mxu2 %v8782_v54 }
 0x350   : > { %2983 = vmatmul.f32.gmra.mxu3 %v8778_v20  ;;  %4070 = vmatpush.msra.mxu0 %v8786_v15  ;;  %v7242_v20 = vpop.f32.mrf.mxu0  ;;  %v3494_v52 = vand.u32 4294901760, %v3493_v19  ;;  %v8791_v19 = vand.u32 4294901760, %v6970_v29 }
 0x352   : > { %v2035_v21 = vpop.f32.mrf.mxu2  ;;  %4074 = vmatpush.msra.mxu0 %v8787_v40  ;;  %3495 = vmatpush.msrb.mxu1 %v3494_v52  ;;  %v8802_v40 = vand.u32 4294901760, %v7199_v62 }
 0x353   : > { %v2260_v0 = vpop.f32.mrf.mxu3 }
 0x354   : > { %v7244_v30 = vadd.f32 %v2260_v0, %v2028_v44  ;;  %4253 = vmatpush.msra.mxu1 %v8789_v45  ;;  %4078 = vmatpush.msra.mxu0 %v8790_v5  ;;  %v2036_v0 = vadd.f32 %v4830_v8, %v2035_v21  ;;  %v8792_v44 = vand.u32 4294901760, %v6999_v55  ;;  %v8796_v21 = vand.u32 4294901760, %v7065_v49 }
 0x356   : > { %4255 = vmatpush.msra.mxu1 %v6796_v39  ;;  %4082 = vmatpush.msra.mxu0 %v8791_v19  ;;  %v8794_v39 = vld [vmem:[#allocation32_spill] sm:$0xff]  ;;  %v7270_v29 = vpop.f32.mrf.mxu1 }
 0x357   : > { %2830 = vmatmul.f32.gmra.mxu2 %v8788_v56 }
 0x358   : > { %2987 = vmatmul.f32.gmra.mxu3 %v8782_v54  ;;  %4257 = vmatpush.msra.mxu1 %v6838_v9  ;;  %v7264_v54 = vpop.f32.mrf.mxu0  ;;  %v8795_v9 = vand.u32 4294901760, %v7043_v1  ;;  %v8798_v1 = vand.u32 4294901760, %v7115_v53  ;;  %v8801_v53 = vand.u32 4294901760, %v7171_v10 }
 0x359   : > { %4086 = vmatpush.msra.mxu0 %v8792_v44 }
 0x35a   : > { %v2043_v16 = vpop.f32.mrf.mxu2  ;;  %4259 = vmatpush.msra.mxu1 %v6880_v7 }
 0x35b   : > { %v2264_v13 = vpop.f32.mrf.mxu3  ;;  %4090 = vmatpush.msra.mxu0 %v8793_v26  ;;  %v2044_v55 = vadd.f32 %v4830_v8, %v2043_v16 }
 0x35c   : > { %v7259_v52 = vadd.f32 %v2264_v13, %v2036_v0  ;;  %4261 = vmatpush.msra.mxu1 %v6922_v57  ;;  %v8797_v57 = vand.u32 4294901760, %v7087_v4  ;;  %v8800_v4 = vld [vmem:[#allocation51_spill] sm:$0xff] }
 0x35d   : > { %4094 = vmatpush.msra.mxu0 %v8795_v9 }
 0x35e   : > { %4263 = vmatpush.msra.mxu1 %v6963_v17  ;;  %v7294_v49 = vpop.f32.mrf.mxu1 }
 0x35f   : > { %2834 = vmatmul.f32.gmra.mxu2 %v8794_v39  ;;  %4098 = vmatpush.msra.mxu0 %v8796_v21 }
 0x360   : > { %2991 = vmatmul.f32.gmra.mxu3 %v8788_v56  ;;  %4265 = vmatpush.msra.mxu1 %v6993_v32  ;;  %v7288_v17 = vpop.f32.mrf.mxu0  ;;  %v8799_v32 = vand.u32 4294901760, %v7141_v42 }
 0x361   : > { %4102 = vmatpush.msra.mxu0 %v8797_v57 }
 0x362   : > { %v2771_v7 = vpop.f32.mrf.mxu2  ;;  %4267 = vmatpush.msra.mxu1 %v7017_v47 }
 0x363   : > { %v2268_v35 = vpop.f32.mrf.mxu3  ;;  %4106 = vmatpush.msra.mxu0 %v8798_v1  ;;  %v2772_v47 = vadd.f32 %v2771_v7, %v8800_v4 }
 0x364   : > { %v7279_v15 = vadd.f32 %v2268_v35, %v2044_v55  ;;  %4269 = vmatpush.msra.mxu1 %v7038_v61 }
 0x365   : > { %4110 = vmatpush.msra.mxu0 %v8799_v32 }
 0x366   : > { %4271 = vmatpush.msra.mxu1 %v7060_v11 }
 0x367   : > { %2838 = vmatmul.f32.gmra.mxu2 %v6728_v33  ;;  %4114 = vmatpush.msra.mxu0 %v8801_v53 }
 0x368   : > { %2995 = vmatmul.f32.gmra.mxu3 %v8794_v39  ;;  %4273 = vmatpush.msra.mxu1 %v7082_v58  ;;  %v7307_v11 = vpop.f32.mrf.mxu0 }
 0x369   : > { %4118 = vmatpush.msra.mxu0 %v8802_v40 }
 0x36a   : > { %v2775_v56 = vpop.f32.mrf.mxu2  ;;  %4275 = vmatpush.msra.mxu1 %v7108_v22  ;;  %v7311_v22 = vpop.f32.mrf.mxu1 }
 0x36b   : > { %v2932_v8 = vpop.f32.mrf.mxu3  ;;  %4122 = vmatpush.msra.mxu0 %v3492_v34  ;;  %v2776_v58 = vadd.f32 %v2775_v56, %v6825_v59 }
 0x36c   : > { %v2933_v61 = vadd.f32 %v2932_v8, %v2772_v47  ;;  %4277 = vmatpush.msra.mxu1 %v7136_v27 }
 0x36e   : > { %4765 = vtanh.f32 %v2933_v61  ;;  %4279 = vmatpush.msra.mxu1 %v7166_v23 }
 0x36f   : > { %2842 = vmatmul.f32.gmra.mxu2 %v6746_v2 }
 0x370   : > { %2999 = vmatmul.f32.gmra.mxu3 %v6728_v33  ;;  %4281 = vmatpush.msra.mxu1 %v7192_v18  ;;  %v7327_v0 = vpop.f32.mrf.mxu0 }
 0x372   : > { %v2779_v42 = vpop.f32.mrf.mxu2  ;;  %4283 = vmatpush.msra.mxu1 %v7221_v31  ;;  %v7331_v44 = vpop.f32.mrf.mxu1 }
 0x373   : > { %v2936_v10 = vpop.f32.mrf.mxu3  ;;  %v2780_v27 = vadd.f32 %v2779_v42, %v6842_v41 }
 0x374   : > { %v4766_v62 = vpop.eup %4765  ;;  %v2937_v34 = vadd.f32 %v2936_v10, %v2776_v58 }
 0x375   : > { %v7313_v45 = vand.u32 4294901760, %v4766_v62 }
 0x376   : > { %4767 = vtanh.f32 %v2937_v34 }
 0x377   : > { %v7317_v33 = vsub.f32 %v4766_v62, %v7313_v45  ;;  %3497 = vmatmul.f32.vlgmr.msrb.gmra.mxu1 %v7313_v45  ;;  %2846 = vmatmul.f32.gmra.mxu2 %v6771_v36 }
 0x378   : > { %3003 = vmatmul.f32.gmra.mxu3 %v6746_v2  ;;  %v7346_v1 = vpop.f32.mrf.mxu0 }
 0x379   : > { %v8461_v59 = vand.u32 4294901760, %v7317_v33 }
 0x37a   : > { %v2783_v23 = vpop.f32.mrf.mxu2 }
 0x37b   : > { %v2940_v18 = vpop.f32.mrf.mxu3  ;;  %v3146_v31 = vsub.f32 %v7317_v33, %v8461_v59  ;;  %v2784_v26 = vadd.f32 %v2783_v23, %v6867_v25  ;;  %v7352_v25 = vpop.f32.mrf.mxu1  ;;  %v8826_v59 = vld [vmem:[#allocation52_spill] sm:$0xff] }
 0x37c   : > { %v4768_v5 = vpop.eup %4767  ;;  %v2941_v16 = vadd.f32 %v2940_v18, %v2780_v27 }
 0x37d   : > { %v3147_v19 = vand.u32 4294901760, %v3146_v31  ;;  %v7329_v13 = vand.u32 4294901760, %v4768_v5 }
 0x37e   : > { %4769 = vtanh.f32 %v2941_v16 }
 0x37f   : > { %3148 = vmatmul.f32.vlgmr.msrb.gmra.mxu0 %v3147_v19  ;;  %3501 = vmatmul.f32.gmra.mxu1 %v7329_v13  ;;  %v7335_v2 = vsub.f32 %v4768_v5, %v7329_v13 }
 0x380   : > { %2850 = vmatmul.f32.gmra.mxu2 %v6792_v24  ;;  %3007 = vmatmul.f32.gmra.mxu3 %v6771_v36  ;;  %v7367_v42 = vpop.f32.mrf.mxu0 }
 0x381   : > { %v8459_v41 = vand.u32 4294901760, %v7335_v2 }
 0x382   : > { %v2787_v39 = vpop.f32.mrf.mxu2 }
 0x383   : > { %v2944_v9 = vpop.f32.mrf.mxu3  ;;  %v3154_v55 = vsub.f32 %v7335_v2, %v8459_v41  ;;  %v2788_v4 = vadd.f32 %v2787_v39, %v6884_v3  ;;  %v7372_v10 = vpop.f32.mrf.mxu1 }
 0x384   : > { %v4770_v7 = vpop.eup %4769  ;;  %v2945_v21 = vadd.f32 %v2944_v9, %v2784_v26 }
 0x385   : > { %v3155_v35 = vand.u32 4294901760, %v3154_v55  ;;  %v7344_v57 = vand.u32 4294901760, %v4770_v7 }
 0x386   : > { %4771 = vtanh.f32 %v2945_v21 }
 0x387   : > { %3156 = vmatmul.f32.gmra.mxu0 %v3155_v35  ;;  %3505 = vmatmul.f32.gmra.mxu1 %v7344_v57  ;;  %v7350_v36 = vsub.f32 %v4770_v7, %v7344_v57 }
 0x388   : > { %2854 = vmatmul.f32.gmra.mxu2 %v6816_v43  ;;  %3011 = vmatmul.f32.gmra.mxu3 %v6792_v24  ;;  %v7387_v19 = vpop.f32.mrf.mxu0 }
 0x389   : > { %v8458_v32 = vand.u32 4294901760, %v7350_v36 }
 0x38a   : > { %v2791_v47 = vpop.f32.mrf.mxu2 }
 0x38b   : > { %v2948_v56 = vpop.f32.mrf.mxu3  ;;  %v3162_v53 = vsub.f32 %v7350_v36, %v8458_v32  ;;  %v2792_v62 = vadd.f32 %v2791_v47, %v6909_v46  ;;  %v7393_v21 = vpop.f32.mrf.mxu1 }
 0x38c   : > { %v4772_v8 = vpop.eup %4771  ;;  %v2949_v61 = vadd.f32 %v2948_v56, %v2788_v4 }
 0x38d   : > { %v3163_v40 = vand.u32 4294901760, %v3162_v53  ;;  %v7361_v58 = vand.u32 4294901760, %v4772_v8 }
 0x38e   : > { %4773 = vtanh.f32 %v2949_v61 }
 0x38f   : > { %3164 = vmatmul.f32.gmra.mxu0 %v3163_v40  ;;  %3509 = vmatmul.f32.gmra.mxu1 %v7361_v58  ;;  %v7365_v24 = vsub.f32 %v4772_v8, %v7361_v58 }
 0x390   : > { %2858 = vmatmul.f32.gmra.mxu2 %v6834_v50  ;;  %3015 = vmatmul.f32.gmra.mxu3 %v6816_v43 }
 0x391   : > { %v8457_v3 = vand.u32 4294901760, %v7365_v24 }
 0x392   : > { %v2795_v34 = vpop.f32.mrf.mxu2 }
 0x393   : > { %v2952_v27 = vpop.f32.mrf.mxu3  ;;  %v3170_v23 = vsub.f32 %v7365_v24, %v8457_v3  ;;  %v2796_v26 = vadd.f32 %v2795_v34, %v6926_v48  ;;  %v7410_v34 = vpop.f32.mrf.mxu0 }
 0x394   : > { %v4774_v18 = vpop.eup %4773  ;;  %v2953_v31 = vadd.f32 %v2952_v27, %v2792_v62  ;;  %v2363_v62 = vadd.f32 %v7105_v51, %v6958_v28 }
 0x395   : > { %v3171_v5 = vand.u32 4294901760, %v3170_v23  ;;  %v7378_v16 = vand.u32 4294901760, %v4774_v18 }
 0x396   : > { %4775 = vtanh.f32 %v2953_v31  ;;  %v2565_v31 = vadd.f32 %v7098_v6, %v2363_v62 }
 0x397   : > { %8803 = vst [vmem:[#allocation61_spill] sm:$0xff] %v7378_v16  ;;  %3172 = vmatmul.f32.gmra.mxu0 %v3171_v5  ;;  %3513 = vmatmul.f32.gmra.mxu1 %v7378_v16  ;;  %v7382_v43 = vsub.f32 %v4774_v18, %v7378_v16 }
 0x398   : > { %2862 = vmatmul.f32.gmra.mxu2 %v6858_v14  ;;  %3019 = vmatmul.f32.gmra.mxu3 %v6834_v50 }
 0x399   : > { %v8455_v46 = vand.u32 4294901760, %v7382_v43 }
 0x39a   : > { %v2799_v39 = vpop.f32.mrf.mxu2 }
 0x39b   : > { %v2956_v9 = vpop.f32.mrf.mxu3  ;;  %v3178_v55 = vsub.f32 %v7382_v43, %v8455_v46  ;;  %v2800_v56 = vadd.f32 %v2799_v39, %v6951_v38  ;;  %v8819_v46 = vld [vmem:[#allocation28_spill] sm:$0xff] }
 0x39c   : > { %v4776_v7 = vpop.eup %4775  ;;  %v2957_v35 = vadd.f32 %v2956_v9, %v2796_v26 }
 0x39d   : > { %v3179_v4 = vand.u32 4294901760, %v3178_v55  ;;  %v7395_v47 = vand.u32 4294901760, %v4776_v7  ;;  %v8806_v55 = vld [vmem:[#allocation68_spill] sm:$0xff] }
 0x39e   : > { %4777 = vtanh.f32 %v2957_v35 }
 0x39f   : > { %8804 = vst [vmem:[#allocation63_spill] sm:$0xff] %v7395_v47  ;;  %3180 = vmatmul.f32.gmra.mxu0 %v3179_v4  ;;  %3517 = vmatmul.f32.gmra.mxu1 %v7395_v47  ;;  %v7399_v50 = vsub.f32 %v4776_v7, %v7395_v47  ;;  %v2368_v7 = vadd.f32 %v8806_v55, %v6978_v37  ;;  %v8834_v47 = vld [vmem:[#allocation31_spill] sm:$0xff] }
 0x3a0   : > { %2866 = vmatmul.f32.gmra.mxu2 %v6876_v12  ;;  %3023 = vmatmul.f32.gmra.mxu3 %v6858_v14  ;;  %v7414_v14 = vpop.f32.mrf.mxu1 }
 0x3a1   : > { %v8454_v48 = vand.u32 4294901760, %v7399_v50 }
 0x3a2   : > { %v2803_v53 = vpop.f32.mrf.mxu2 }
 0x3a3   : > { %v2960_v8 = vpop.f32.mrf.mxu3  ;;  %v3186_v61 = vsub.f32 %v7399_v50, %v8454_v48  ;;  %v2804_v51 = vadd.f32 %v2803_v53, %v2565_v31 }
 0x3a4   : > { %v4778_v40 = vpop.eup %4777  ;;  %v2961_v27 = vadd.f32 %v2960_v8, %v2800_v56  ;;  %v7431_v56 = vpop.f32.mrf.mxu0  ;;  %v8808_v8 = vld [vmem:[#allocation40_spill] sm:$0xff] }
 0x3a5   : > { %v3187_v23 = vand.u32 4294901760, %v3186_v61  ;;  %v7412_v18 = vand.u32 4294901760, %v4778_v40  ;;  %v2571_v61 = vadd.f32 %v8808_v8, %v2368_v7 }
 0x3a6   : > { %4779 = vtanh.f32 %v2961_v27 }
 0x3a7   : > { %8805 = vst [vmem:[#allocation66_spill] sm:$0xff] %v7412_v18  ;;  %3188 = vmatmul.f32.gmra.mxu0 %v3187_v23  ;;  %3521 = vmatmul.f32.gmra.mxu1 %v7412_v18  ;;  %v7418_v38 = vsub.f32 %v4778_v40, %v7412_v18  ;;  %v8809_v40 = vld [vmem:[#allocation34_spill] sm:$0xff] }
 0x3a8   : > { %2870 = vmatmul.f32.gmra.mxu2 %v6900_v63  ;;  %3027 = vmatmul.f32.gmra.mxu3 %v6876_v12  ;;  %v7437_v53 = vpop.f32.mrf.mxu1 }
 0x3a9   : > { %v8453_v28 = vand.u32 4294901760, %v7418_v38 }
 0x3aa   : > { %v2807_v5 = vpop.f32.mrf.mxu2 }
 0x3ab   : > { %v2964_v26 = vpop.f32.mrf.mxu3  ;;  %v3194_v39 = vsub.f32 %v7418_v38, %v8453_v28  ;;  %v2808_v62 = vadd.f32 %v2807_v5, %v2571_v61  ;;  %v8814_v61 = vld [vmem:[#allocation29_spill] sm:$0xff] }
 0x3ac   : > { %v4780_v9 = vpop.eup %4779  ;;  %v2965_v35 = vadd.f32 %v2964_v26, %v2804_v51  ;;  %v8810_v26 = vld [vmem:[#allocation55_spill] sm:$0xff]  ;;  %v7454_v5 = vpop.f32.mrf.mxu0 }
 0x3ad   : > { %v3195_v4 = vand.u32 4294901760, %v3194_v39  ;;  %v7429_v6 = vand.u32 4294901760, %v4780_v9  ;;  %v8811_v39 = vld [vmem:[#allocation16_spill] sm:$0xff] }
 0x3ae   : > { %4781 = vtanh.f32 %v2965_v35 }
 0x3af   : > { %8807 = vst [vmem:[#allocation22_spill] sm:$0xff] %v7429_v6  ;;  %3196 = vmatmul.f32.gmra.mxu0 %v3195_v4  ;;  %3525 = vmatmul.f32.gmra.mxu1 %v7429_v6  ;;  %v7435_v12 = vsub.f32 %v4780_v9, %v7429_v6  ;;  %v2373_v9 = vadd.f32 %v8811_v39, %v8810_v26  ;;  %v8813_v4 = vld [vmem:[#allocation41_spill] sm:$0xff]  ;;  %v8831_v6 = vld [vmem:[#allocation56_spill] sm:$0xff] }
 0x3b0   : > { %2874 = vmatmul.f32.gmra.mxu2 %v8809_v40  ;;  %3031 = vmatmul.f32.gmra.mxu3 %v6900_v63 }
 0x3b1   : > { %v8452_v37 = vand.u32 4294901760, %v7435_v12  ;;  %v2577_v8 = vadd.f32 %v8813_v4, %v2373_v9 }
 0x3b2   : > { %v2811_v27 = vpop.f32.mrf.mxu2 }
 0x3b3   : > { %v2968_v23 = vpop.f32.mrf.mxu3  ;;  %v3202_v31 = vsub.f32 %v7435_v12, %v8452_v37  ;;  %v8816_v37 = vld [vmem:[#allocation18_spill] sm:$0xff] }
 0x3b4   : > { %v4782_v51 = vpop.eup %4781  ;;  %v2969_v55 = vadd.f32 %v2968_v23, %v2808_v62  ;;  %v7460_v23 = vpop.f32.mrf.mxu1 }
 0x3b5   : > { %v3203_v35 = vand.u32 4294901760, %v3202_v31  ;;  %v7448_v7 = vand.u32 4294901760, %v4782_v51  ;;  %v2812_v31 = vadd.f32 %v2811_v27, %v2577_v8  ;;  %v8818_v27 = vld [vmem:[#allocation44_spill] sm:$0xff] }
 0x3b6   : > { %4783 = vtanh.f32 %v2969_v55 }
 0x3b7   : > { %8812 = vst [vmem:[#allocation25_spill] sm:$0xff] %v7448_v7  ;;  %3204 = vmatmul.f32.gmra.mxu0 %v3203_v35  ;;  %3529 = vmatmul.f32.gmra.mxu1 %v7448_v7  ;;  %v7452_v63 = vsub.f32 %v4782_v51, %v7448_v7  ;;  %v8815_v35 = vld [vmem:[#allocation46_spill] sm:$0xff] }
 0x3b8   : > { %2878 = vmatmul.f32.gmra.mxu2 %v8814_v61  ;;  %3035 = vmatmul.f32.gmra.mxu3 %v8809_v40  ;;  %v2378_v28 = vadd.f32 %v8816_v37, %v8815_v35  ;;  %v7477_v37 = vpop.f32.mrf.mxu0  ;;  %v8829_v7 = vld [vmem:[#allocation42_spill] sm:$0xff] }
 0x3b9   : > { %v8456_v62 = vand.u32 4294901760, %v7452_v63 }
 0x3ba   : > { %v2815_v26 = vpop.f32.mrf.mxu2  ;;  %v2583_v8 = vadd.f32 %v8818_v27, %v2378_v28 }
 0x3bb   : > { %v2972_v39 = vpop.f32.mrf.mxu3  ;;  %v3210_v51 = vsub.f32 %v7452_v63, %v8456_v62 }
 0x3bc   : > { %v4784_v55 = vpop.eup %4783  ;;  %v2973_v9 = vadd.f32 %v2972_v39, %v2812_v31  ;;  %v2816_v31 = vadd.f32 %v2815_v26, %v2583_v8  ;;  %v7484_v28 = vpop.f32.mrf.mxu1  ;;  %v8823_v8 = vld [vmem:[#allocation19_spill] sm:$0xff] }
 0x3bd   : > { %v3211_v4 = vand.u32 4294901760, %v3210_v51  ;;  %v7467_v48 = vand.u32 4294901760, %v4784_v55 }
 0x3be   : > { %4785 = vtanh.f32 %v2973_v9 }
 0x3bf   : > { %8817 = vst [vmem:[#allocation24_spill] sm:$0xff] %v7467_v48  ;;  %3212 = vmatmul.f32.gmra.mxu0 %v3211_v4  ;;  %3533 = vmatmul.f32.gmra.mxu1 %v7467_v48  ;;  %v7471_v40 = vsub.f32 %v4784_v55, %v7467_v48  ;;  %v8820_v55 = vld [vmem:[#allocation30_spill] sm:$0xff]  ;;  %v8821_v4 = vld [vmem:[#allocation48_spill] sm:$0xff] }
 0x3c0   : > { %2882 = vmatmul.f32.gmra.mxu2 %v8819_v46  ;;  %3039 = vmatmul.f32.gmra.mxu3 %v8814_v61  ;;  %v2383_v3 = vadd.f32 %v8821_v4, %v8820_v55 }
 0x3c1   : > { %v8460_v62 = vand.u32 4294901760, %v7471_v40 }
 0x3c2   : > { %v2819_v39 = vpop.f32.mrf.mxu2  ;;  %v2589_v41 = vadd.f32 %v8823_v8, %v2383_v3 }
 0x3c3   : > { %v2976_v51 = vpop.f32.mrf.mxu3  ;;  %v3218_v35 = vsub.f32 %v7471_v40, %v8460_v62  ;;  %v8824_v62 = vld [vmem:[#allocation38_spill] sm:$0xff] }
 0x3c4   : > { %v4786_v9 = vpop.eup %4785  ;;  %v2977_v27 = vadd.f32 %v2976_v51, %v2816_v31  ;;  %v2820_v4 = vadd.f32 %v2819_v39, %v2589_v41  ;;  %v8828_v39 = vld [vmem:[#allocation21_spill] sm:$0xff] }
 0x3c5   : > { %v3219_v32 = vand.u32 4294901760, %v3218_v35  ;;  %v7486_v61 = vand.u32 4294901760, %v4786_v9 }
 0x3c6   : > { %4787 = vtanh.f32 %v2977_v27  ;;  %v8825_v27 = vld [vmem:[#allocation50_spill] sm:$0xff] }
 0x3c7   : > { %8822 = vst [vmem:[#allocation35_spill] sm:$0xff] %v7486_v61  ;;  %3220 = vmatmul.f32.gmra.mxu0 %v3219_v32  ;;  %3537 = vmatmul.f32.gmra.mxu1 %v7486_v61  ;;  %v7490_v26 = vsub.f32 %v4786_v9, %v7486_v61  ;;  %v2388_v9 = vadd.f32 %v8826_v59, %v8825_v27  ;;  %v7501_v61 = vpop.f32.mrf.mxu0 }
 0x3c8   : > { %2886 = vmatmul.f32.gmra.mxu2 %v8824_v62  ;;  %3043 = vmatmul.f32.gmra.mxu3 %v8819_v46  ;;  %v7505_v46 = vpop.f32.mrf.mxu1 }
 0x3c9   : > { %v8466_v55 = vand.u32 4294901760, %v7490_v26 }
 0x3ca   : > { %v2823_v31 = vpop.f32.mrf.mxu2 }
 0x3cb   : > { %v2980_v51 = vpop.f32.mrf.mxu3  ;;  %v3226_v32 = vsub.f32 %v7490_v26, %v8466_v55  ;;  %v2595_v55 = vadd.f32 %v8828_v39, %v2388_v9 }
 0x3cc   : > { %v4788_v35 = vpop.eup %4787  ;;  %v2981_v3 = vadd.f32 %v2980_v51, %v2820_v4 }
 0x3cd   : > { %v3227_v8 = vand.u32 4294901760, %v3226_v32  ;;  %v7503_v48 = vand.u32 4294901760, %v4788_v35  ;;  %v2824_v4 = vadd.f32 %v2823_v31, %v2595_v55  ;;  %v8833_v31 = vld [vmem:[#allocation23_spill] sm:$0xff] }
 0x3ce   : > { %4789 = vtanh.f32 %v2981_v3 }
 0x3cf   : > { %8827 = vst [vmem:[#allocation57_spill] sm:$0xff] %v7503_v48  ;;  %3228 = vmatmul.f32.gmra.mxu0 %v3227_v8  ;;  %3541 = vmatmul.f32.gmra.mxu1 %v7503_v48  ;;  %v7509_v41 = vsub.f32 %v4788_v35, %v7503_v48  ;;  %v8830_v8 = vld [vmem:[#allocation54_spill] sm:$0xff]  ;;  %v7522_v39 = vpop.f32.mrf.mxu0 }
 0x3d0   : > { %2890 = vmatmul.f32.gmra.mxu2 %v8829_v7  ;;  %3047 = vmatmul.f32.gmra.mxu3 %v8824_v62  ;;  %v2393_v35 = vadd.f32 %v8831_v6, %v8830_v8  ;;  %v7528_v55 = vpop.f32.mrf.mxu1 }
 0x3d1   : > { %v8475_v59 = vand.u32 4294901760, %v7509_v41 }
 0x3d2   : > { %v2827_v51 = vpop.f32.mrf.mxu2 }
 0x3d3   : > { %v2984_v32 = vpop.f32.mrf.mxu3  ;;  %v3234_v27 = vsub.f32 %v7509_v41, %v8475_v59  ;;  %v2601_v59 = vadd.f32 %v8833_v31, %v2393_v35 }
 0x3d4   : > { %v4790_v3 = vpop.eup %4789  ;;  %v2985_v48 = vadd.f32 %v2984_v32, %v2824_v4 }
 0x3d5   : > { %v3235_v18 = vand.u32 4294901760, %v3234_v27  ;;  %v7520_v9 = vand.u32 4294901760, %v4790_v3  ;;  %v2828_v4 = vadd.f32 %v2827_v51, %v2601_v59  ;;  %v8836_v51 = vld [vmem:[#allocation58_spill] sm:$0xff] }
 0x3d6   : > { %4791 = vtanh.f32 %v2985_v48 }
 0x3d7   : > { %8832 = vst [vmem:[#allocation39_spill] sm:$0xff] %v7520_v9  ;;  %3236 = vmatmul.f32.gmra.mxu0 %v3235_v18  ;;  %3545 = vmatmul.f32.gmra.mxu1 %v7520_v9  ;;  %v7526_v62 = vsub.f32 %v4790_v3, %v7520_v9  ;;  %v8835_v3 = vld [vmem:[#allocation62_spill] sm:$0xff]  ;;  %v7545_v59 = vpop.f32.mrf.mxu0 }
 0x3d8   : > { %2894 = vmatmul.f32.gmra.mxu2 %v8834_v47  ;;  %3051 = vmatmul.f32.gmra.mxu3 %v8829_v7  ;;  %v2398_v8 = vadd.f32 %v7242_v20, %v8835_v3  ;;  %v8837_v3 = vld [vmem:[#allocation59_spill] sm:$0xff] }
 0x3d9   : > { %v8482_v6 = vand.u32 4294901760, %v7526_v62 }
 0x3da   : > { %v2831_v32 = vpop.f32.mrf.mxu2  ;;  %v2607_v31 = vadd.f32 %v8836_v51, %v2398_v8 }
 0x3db   : > { %v2988_v27 = vpop.f32.mrf.mxu3  ;;  %v3242_v48 = vsub.f32 %v7526_v62, %v8482_v6  ;;  %v2403_v6 = vadd.f32 %v7264_v54, %v8837_v3 }
 0x3dc   : > { %v4792_v18 = vpop.eup %4791  ;;  %v2989_v9 = vadd.f32 %v2988_v27, %v2828_v4  ;;  %v7551_v4 = vpop.f32.mrf.mxu1  ;;  %v2832_v27 = vadd.f32 %v2831_v32, %v2607_v31 }
 0x3dd   : > { %v3243_v16 = vand.u32 4294901760, %v3242_v48  ;;  %v7539_v35 = vand.u32 4294901760, %v4792_v18  ;;  %v2613_v31 = vadd.f32 %v7248_v60, %v2403_v6 }
 0x3de   : > { %4793 = vtanh.f32 %v2989_v9 }
 0x3df   : > { %3244 = vmatmul.f32.gmra.mxu0 %v3243_v16  ;;  %3549 = vmatmul.f32.gmra.mxu1 %v7539_v35  ;;  %v7543_v7 = vsub.f32 %v4792_v18, %v7539_v35 }
 0x3e0   : > { %3055 = vmatmul.f32.gmra.mxu3 %v8834_v47  ;;  %3675 = vmatmul.f32.vlgmr.msra.gmra.mxu2 %v7317_v33 }
 0x3e1   : > { %v8483_v20 = vand.u32 4294901760, %v7543_v7 }
 0x3e2   : > { %v2835_v9 = vpop.f32.mrf.mxu2 }
 0x3e3   : > { %v2992_v16 = vpop.f32.mrf.mxu3  ;;  %v3250_v48 = vsub.f32 %v7543_v7, %v8483_v20  ;;  %v8839_v20 = vand.u32 4294901760, %v7317_v33 }
 0x3e4   : > { %v4794_v18 = vpop.eup %4793  ;;  %v2993_v8 = vadd.f32 %v2992_v16, %v2832_v27  ;;  %v7569_v27 = vpop.f32.mrf.mxu0  ;;  %v2836_v16 = vadd.f32 %v2835_v9, %v2613_v31 }
 0x3e5   : > { %v3251_v51 = vand.u32 4294901760, %v3250_v48  ;;  %v7558_v47 = vand.u32 4294901760, %v4794_v18  ;;  %v7576_v6 = vpop.f32.mrf.mxu1 }
 0x3e6   : > { %4795 = vtanh.f32 %v2993_v8 }
 0x3e7   : > { %8838 = vst [vmem:[#allocation27_spill] sm:$0xff] %v7558_v47  ;;  %3252 = vmatmul.f32.gmra.mxu0 %v3251_v51  ;;  %3553 = vmatmul.f32.gmra.mxu1 %v7558_v47  ;;  %v7562_v32 = vsub.f32 %v4794_v18, %v7558_v47  ;;  %v8840_v51 = vld [vmem:[#allocation64_spill] sm:$0xff] }
 0x3e8   : > { %3680 = vmatmul.f32.gmra.mxu2 %v7335_v2  ;;  %3869 = vmatmul.f32.vlgmr.msra.gmra.mxu3 %v8839_v20  ;;  %v2408_v60 = vadd.f32 %v7288_v17, %v8840_v51 }
 0x3e9   : > { %v8486_v54 = vand.u32 4294901760, %v7562_v32 }
 0x3ea   : > { %v2839_v48 = vpop.f32.mrf.mxu2  ;;  %v2619_v31 = vadd.f32 %v7270_v29, %v2408_v60 }
 0x3eb   : > { %v2996_v3 = vpop.f32.mrf.mxu3  ;;  %v3258_v8 = vsub.f32 %v7562_v32, %v8486_v54  ;;  %v8842_v54 = vand.u32 4294901760, %v7335_v2 }
 0x3ec   : > { %v4796_v18 = vpop.eup %4795  ;;  %v2997_v47 = vadd.f32 %v2996_v3, %v2836_v16  ;;  %v2840_v16 = vadd.f32 %v2839_v48, %v2619_v31 }
 0x3ed   : > { %v3259_v33 = vand.u32 4294901760, %v3258_v8  ;;  %v7578_v20 = vand.u32 4294901760, %v4796_v18 }
 0x3ee   : > { %4797 = vtanh.f32 %v2997_v47 }
 0x3ef   : > { %8841 = vst [vmem:[#allocation26_spill] sm:$0xff] %v7578_v20  ;;  %3260 = vmatmul.f32.gmra.mxu0 %v3259_v33  ;;  %3557 = vmatmul.f32.gmra.mxu1 %v7578_v20  ;;  %v7582_v9 = vsub.f32 %v4796_v18, %v7578_v20  ;;  %v8843_v33 = vld [vmem:[#allocation65_spill] sm:$0xff]  ;;  %v7594_v20 = vpop.f32.mrf.mxu0 }
 0x3f0   : > { %3685 = vmatmul.f32.gmra.mxu2 %v7350_v36  ;;  %3875 = vmatmul.f32.gmra.mxu3 %v8842_v54  ;;  %v2413_v18 = vadd.f32 %v7307_v11, %v8843_v33  ;;  %v8845_v11 = vand.u32 4294901760, %v7350_v36 }
 0x3f1   : > { %v8489_v17 = vand.u32 4294901760, %v7582_v9 }
 0x3f2   : > { %v2843_v3 = vpop.f32.mrf.mxu2  ;;  %v2625_v31 = vadd.f32 %v7294_v49, %v2413_v18 }
 0x3f3   : > { %v3000_v8 = vpop.f32.mrf.mxu3  ;;  %v3266_v47 = vsub.f32 %v7582_v9, %v8489_v17  ;;  %v8846_v17 = vld [vmem:[#allocation36_spill] sm:$0xff] }
 0x3f4   : > { %v4798_v51 = vpop.eup %4797  ;;  %v3001_v29 = vadd.f32 %v3000_v8, %v2840_v16  ;;  %v7596_v60 = vpop.f32.mrf.mxu1  ;;  %v2844_v8 = vadd.f32 %v2843_v3, %v2625_v31 }
 0x3f5   : > { %v3267_v2 = vand.u32 4294901760, %v3266_v47  ;;  %v7598_v54 = vand.u32 4294901760, %v4798_v51 }
 0x3f6   : > { %4799 = vtanh.f32 %v3001_v29 }
 0x3f7   : > { %8844 = vst [vmem:[#allocation33_spill] sm:$0xff] %v7598_v54  ;;  %3268 = vmatmul.f32.gmra.mxu0 %v3267_v2  ;;  %3561 = vmatmul.f32.gmra.mxu1 %v7598_v54  ;;  %v7602_v48 = vsub.f32 %v4798_v51, %v7598_v54  ;;  %v2418_v51 = vadd.f32 %v7327_v0, %v8846_v17  ;;  %v8848_v0 = vand.u32 4294901760, %v7365_v24 }
 0x3f8   : > { %3690 = vmatmul.f32.gmra.mxu2 %v7365_v24  ;;  %3881 = vmatmul.f32.gmra.mxu3 %v8845_v11 }
 0x3f9   : > { %v8492_v16 = vand.u32 4294901760, %v7602_v48  ;;  %v2631_v31 = vadd.f32 %v7311_v22, %v2418_v51 }
 0x3fa   : > { %v2847_v47 = vpop.f32.mrf.mxu2 }
 0x3fb   : > { %v3004_v33 = vpop.f32.mrf.mxu3  ;;  %v3274_v29 = vsub.f32 %v7602_v48, %v8492_v16  ;;  %v8849_v16 = vld [vmem:[#allocation37_spill] sm:$0xff] }
 0x3fc   : > { %v4800_v2 = vpop.eup %4799  ;;  %v3005_v54 = vadd.f32 %v3004_v33, %v2844_v8  ;;  %v7614_v49 = vpop.f32.mrf.mxu0  ;;  %v2848_v8 = vadd.f32 %v2847_v47, %v2631_v31 }
 0x3fd   : > { %v7616_v18 = vpop.f32.mrf.mxu1  ;;  %v3275_v36 = vand.u32 4294901760, %v3274_v29  ;;  %v7618_v11 = vand.u32 4294901760, %v4800_v2 }
 0x3fe   : > { %4801 = vtanh.f32 %v3005_v54 }
 0x3ff   : > { %8847 = vst [vmem:[#allocation43_spill] sm:$0xff] %v7618_v11  ;;  %3276 = vmatmul.f32.gmra.mxu0 %v3275_v36  ;;  %3565 = vmatmul.f32.gmra.mxu1 %v7618_v11  ;;  %v7622_v3 = vsub.f32 %v4800_v2, %v7618_v11  ;;  %v2423_v2 = vadd.f32 %v7346_v1, %v8849_v16  ;;  %v8851_v1 = vand.u32 4294901760, %v7382_v43 }
 0x400   : > { %3695 = vmatmul.f32.gmra.mxu2 %v7382_v43  ;;  %3887 = vmatmul.f32.gmra.mxu3 %v8848_v0 }
 0x401   : > { %v8495_v17 = vand.u32 4294901760, %v7622_v3  ;;  %v2637_v31 = vadd.f32 %v7331_v44, %v2423_v2 }
 0x403   : > { %v2851_v33 = vpop.f32.mrf.mxu2  ;;  %v3008_v29 = vpop.f32.mrf.mxu3  ;;  %v3282_v54 = vsub.f32 %v7622_v3, %v8495_v17  ;;  %v8852_v17 = vld [vmem:[#allocation67_spill] sm:$0xff] }
 0x404   : > { %v4802_v36 = vpop.eup %4801  ;;  %v3009_v11 = vadd.f32 %v3008_v29, %v2848_v8  ;;  %v7634_v22 = vpop.f32.mrf.mxu0  ;;  %v2852_v8 = vadd.f32 %v2851_v33, %v2637_v31 }
 0x405   : > { %v7636_v51 = vpop.f32.mrf.mxu1  ;;  %v3283_v24 = vand.u32 4294901760, %v3282_v54  ;;  %v7638_v0 = vand.u32 4294901760, %v4802_v36 }
 0x406   : > { %4803 = vtanh.f32 %v3009_v11 }
 0x407   : > { %8850 = vst [vmem:[#allocation47_spill] sm:$0xff] %v7638_v0  ;;  %3284 = vmatmul.f32.gmra.mxu0 %v3283_v24  ;;  %3569 = vmatmul.f32.gmra.mxu1 %v7638_v0  ;;  %v7642_v47 = vsub.f32 %v4802_v36, %v7638_v0  ;;  %v2428_v36 = vadd.f32 %v7367_v42, %v8852_v17  ;;  %v8854_v42 = vand.u32 4294901760, %v7399_v50 }
 0x408   : > { %3700 = vmatmul.f32.gmra.mxu2 %v7399_v50  ;;  %3893 = vmatmul.f32.gmra.mxu3 %v8851_v1 }
 0x409   : > { %v8498_v16 = vand.u32 4294901760, %v7642_v47  ;;  %v2643_v31 = vadd.f32 %v7352_v25, %v2428_v36 }
 0x40b   : > { %v2855_v29 = vpop.f32.mrf.mxu2  ;;  %v3012_v54 = vpop.f32.mrf.mxu3  ;;  %v3290_v11 = vsub.f32 %v7642_v47, %v8498_v16  ;;  %v8855_v16 = vld [vmem:[#allocation15_spill] sm:$0xff] }
 0x40c   : > { %v4804_v24 = vpop.eup %4803  ;;  %v3013_v0 = vadd.f32 %v3012_v54, %v2852_v8  ;;  %v7654_v44 = vpop.f32.mrf.mxu0  ;;  %v2856_v8 = vadd.f32 %v2855_v29, %v2643_v31 }
 0x40d   : > { %v7656_v2 = vpop.f32.mrf.mxu1  ;;  %v3291_v43 = vand.u32 4294901760, %v3290_v11  ;;  %v7658_v1 = vand.u32 4294901760, %v4804_v24 }
 0x40e   : > { %4805 = vtanh.f32 %v3013_v0 }
 0x40f   : > { %8853 = vst [vmem:[#allocation32_spill] sm:$0xff] %v7658_v1  ;;  %3292 = vmatmul.f32.gmra.mxu0 %v3291_v43  ;;  %3573 = vmatmul.f32.gmra.mxu1 %v7658_v1  ;;  %v7662_v33 = vsub.f32 %v4804_v24, %v7658_v1  ;;  %v2433_v24 = vadd.f32 %v7387_v19, %v8855_v16  ;;  %v8857_v19 = vand.u32 4294901760, %v7418_v38 }
 0x410   : > { %3705 = vmatmul.f32.gmra.mxu2 %v7418_v38  ;;  %3899 = vmatmul.f32.gmra.mxu3 %v8854_v42 }
 0x411   : > { %v8501_v17 = vand.u32 4294901760, %v7662_v33  ;;  %v2649_v31 = vadd.f32 %v7372_v10, %v2433_v24 }
 0x413   : > { %v2859_v54 = vpop.f32.mrf.mxu2  ;;  %v3016_v11 = vpop.f32.mrf.mxu3  ;;  %v3298_v0 = vsub.f32 %v7662_v33, %v8501_v17  ;;  %v8858_v17 = vld [vmem:[#allocation17_spill] sm:$0xff] }
 0x414   : > { %v4806_v43 = vpop.eup %4805  ;;  %v3017_v1 = vadd.f32 %v3016_v11, %v2856_v8  ;;  %v7674_v25 = vpop.f32.mrf.mxu0  ;;  %v2860_v8 = vadd.f32 %v2859_v54, %v2649_v31 }
 0x415   : > { %v7676_v36 = vpop.f32.mrf.mxu1  ;;  %v3299_v50 = vand.u32 4294901760, %v3298_v0  ;;  %v7678_v42 = vand.u32 4294901760, %v4806_v43 }
 0x416   : > { %4807 = vtanh.f32 %v3017_v1 }
 0x417   : > { %8856 = vst [vmem:[#allocation51_spill] sm:$0xff] %v7678_v42  ;;  %3300 = vmatmul.f32.gmra.mxu0 %v3299_v50  ;;  %3577 = vmatmul.f32.gmra.mxu1 %v7678_v42  ;;  %v7682_v29 = vsub.f32 %v4806_v43, %v7678_v42  ;;  %v2438_v43 = vadd.f32 %v7410_v34, %v8858_v17  ;;  %v8860_v34 = vand.u32 4294901760, %v7435_v12 }
 0x418   : > { %3710 = vmatmul.f32.gmra.mxu2 %v7435_v12  ;;  %3905 = vmatmul.f32.gmra.mxu3 %v8857_v19 }
 0x419   : > { %v8504_v16 = vand.u32 4294901760, %v7682_v29  ;;  %v2655_v31 = vadd.f32 %v7393_v21, %v2438_v43 }
 0x41b   : > { %v2863_v11 = vpop.f32.mrf.mxu2  ;;  %v3020_v0 = vpop.f32.mrf.mxu3  ;;  %v3306_v1 = vsub.f32 %v7682_v29, %v8504_v16  ;;  %v8861_v16 = vld [vmem:[#allocation45_spill] sm:$0xff] }
 0x41c   : > { %v4808_v50 = vpop.eup %4807  ;;  %v3021_v42 = vadd.f32 %v3020_v0, %v2860_v8  ;;  %v7694_v10 = vpop.f32.mrf.mxu0  ;;  %v2864_v8 = vadd.f32 %v2863_v11, %v2655_v31 }
 0x41d   : > { %v7696_v24 = vpop.f32.mrf.mxu1  ;;  %v3307_v38 = vand.u32 4294901760, %v3306_v1  ;;  %v7698_v19 = vand.u32 4294901760, %v4808_v50 }
 0x41e   : > { %4809 = vtanh.f32 %v3021_v42 }
 0x41f   : > { %8859 = vst [vmem:[#allocation68_spill] sm:$0xff] %v7698_v19  ;;  %3308 = vmatmul.f32.gmra.mxu0 %v3307_v38  ;;  %3581 = vmatmul.f32.gmra.mxu1 %v7698_v19  ;;  %v7702_v54 = vsub.f32 %v4808_v50, %v7698_v19  ;;  %v2443_v50 = vadd.f32 %v7431_v56, %v8861_v16  ;;  %v8863_v56 = vand.u32 4294901760, %v7452_v63 }
 0x420   : > { %3715 = vmatmul.f32.gmra.mxu2 %v7452_v63  ;;  %3911 = vmatmul.f32.gmra.mxu3 %v8860_v34 }
 0x421   : > { %v8507_v17 = vand.u32 4294901760, %v7702_v54  ;;  %v2661_v31 = vadd.f32 %v7414_v14, %v2443_v50 }
 0x423   : > { %v2867_v0 = vpop.f32.mrf.mxu2  ;;  %v3024_v1 = vpop.f32.mrf.mxu3  ;;  %v3314_v42 = vsub.f32 %v7702_v54, %v8507_v17  ;;  %v8864_v17 = vld [vmem:[#allocation20_spill] sm:$0xff] }
 0x424   : > { %v4810_v38 = vpop.eup %4809  ;;  %v3025_v19 = vadd.f32 %v3024_v1, %v2864_v8  ;;  %v7714_v21 = vpop.f32.mrf.mxu0  ;;  %v2868_v8 = vadd.f32 %v2867_v0, %v2661_v31 }
 0x425   : > { %v7716_v43 = vpop.f32.mrf.mxu1  ;;  %v3315_v12 = vand.u32 4294901760, %v3314_v42  ;;  %v7718_v34 = vand.u32 4294901760, %v4810_v38 }
 0x426   : > { %4811 = vtanh.f32 %v3025_v19 }
 0x427   : > { %8862 = vst [vmem:[#allocation40_spill] sm:$0xff] %v7718_v34  ;;  %3316 = vmatmul.f32.gmra.mxu0 %v3315_v12  ;;  %3585 = vmatmul.f32.gmra.mxu1 %v7718_v34  ;;  %v7722_v11 = vsub.f32 %v4810_v38, %v7718_v34  ;;  %v2448_v38 = vadd.f32 %v7454_v5, %v8864_v17  ;;  %v8866_v5 = vand.u32 4294901760, %v7471_v40 }
 0x428   : > { %3720 = vmatmul.f32.gmra.mxu2 %v7471_v40  ;;  %3917 = vmatmul.f32.gmra.mxu3 %v8863_v56 }
 0x429   : > { %v8510_v16 = vand.u32 4294901760, %v7722_v11  ;;  %v2667_v31 = vadd.f32 %v7437_v53, %v2448_v38 }
 0x42b   : > { %v2871_v1 = vpop.f32.mrf.mxu2  ;;  %v3028_v42 = vpop.f32.mrf.mxu3  ;;  %v3322_v19 = vsub.f32 %v7722_v11, %v8510_v16  ;;  %v8867_v16 = vld [vmem:[#allocation49_spill] sm:$0xff] }
 0x42c   : > { %v4812_v12 = vpop.eup %4811  ;;  %v3029_v34 = vadd.f32 %v3028_v42, %v2868_v8  ;;  %v7734_v14 = vpop.f32.mrf.mxu0  ;;  %v2872_v8 = vadd.f32 %v2871_v1, %v2667_v31 }
 0x42d   : > { %v7736_v50 = vpop.f32.mrf.mxu1  ;;  %v3323_v63 = vand.u32 4294901760, %v3322_v19  ;;  %v7738_v56 = vand.u32 4294901760, %v4812_v12 }
 0x42e   : > { %4813 = vtanh.f32 %v3029_v34 }
 0x42f   : > { %8865 = vst [vmem:[#allocation34_spill] sm:$0xff] %v7738_v56  ;;  %3324 = vmatmul.f32.gmra.mxu0 %v3323_v63  ;;  %3589 = vmatmul.f32.gmra.mxu1 %v7738_v56  ;;  %v7742_v0 = vsub.f32 %v4812_v12, %v7738_v56  ;;  %v2453_v12 = vadd.f32 %v7477_v37, %v8867_v16  ;;  %v8869_v37 = vand.u32 4294901760, %v7490_v26 }
 0x430   : > { %3725 = vmatmul.f32.gmra.mxu2 %v7490_v26  ;;  %3923 = vmatmul.f32.gmra.mxu3 %v8866_v5 }
 0x431   : > { %v8513_v17 = vand.u32 4294901760, %v7742_v0  ;;  %v2673_v31 = vadd.f32 %v7460_v23, %v2453_v12 }
 0x433   : > { %v2875_v42 = vpop.f32.mrf.mxu2  ;;  %v3032_v19 = vpop.f32.mrf.mxu3  ;;  %v3330_v34 = vsub.f32 %v7742_v0, %v8513_v17  ;;  %v8870_v17 = vld [vmem:[#allocation53_spill] sm:$0xff] }
 0x434   : > { %v4814_v63 = vpop.eup %4813  ;;  %v3033_v56 = vadd.f32 %v3032_v19, %v2872_v8  ;;  %v7754_v53 = vpop.f32.mrf.mxu0  ;;  %v2876_v8 = vadd.f32 %v2875_v42, %v2673_v31 }
 0x435   : > { %v7756_v38 = vpop.f32.mrf.mxu1  ;;  %v3331_v40 = vand.u32 4294901760, %v3330_v34  ;;  %v7758_v5 = vand.u32 4294901760, %v4814_v63 }
 0x436   : > { %4815 = vtanh.f32 %v3033_v56 }
 0x437   : > { %8868 = vst [vmem:[#allocation55_spill] sm:$0xff] %v7758_v5  ;;  %3332 = vmatmul.f32.gmra.mxu0 %v3331_v40  ;;  %3593 = vmatmul.f32.gmra.mxu1 %v7758_v5  ;;  %v7762_v1 = vsub.f32 %v4814_v63, %v7758_v5  ;;  %v2458_v63 = vadd.f32 %v7501_v61, %v8870_v17  ;;  %v8872_v61 = vand.u32 4294901760, %v7509_v41 }
 0x438   : > { %3730 = vmatmul.f32.gmra.mxu2 %v7509_v41  ;;  %3929 = vmatmul.f32.gmra.mxu3 %v8869_v37 }
 0x439   : > { %v8516_v16 = vand.u32 4294901760, %v7762_v1  ;;  %v2679_v31 = vadd.f32 %v7484_v28, %v2458_v63 }
 0x43b   : > { %v2879_v19 = vpop.f32.mrf.mxu2  ;;  %v3036_v34 = vpop.f32.mrf.mxu3  ;;  %v3338_v56 = vsub.f32 %v7762_v1, %v8516_v16  ;;  %v8873_v16 = vld [vmem:[#allocation60_spill] sm:$0xff] }
 0x43c   : > { %v4816_v40 = vpop.eup %4815  ;;  %v3037_v5 = vadd.f32 %v3036_v34, %v2876_v8  ;;  %v7774_v23 = vpop.f32.mrf.mxu0  ;;  %v2880_v8 = vadd.f32 %v2879_v19, %v2679_v31 }
 0x43d   : > { %v7776_v12 = vpop.f32.mrf.mxu1  ;;  %v3339_v26 = vand.u32 4294901760, %v3338_v56  ;;  %v7778_v37 = vand.u32 4294901760, %v4816_v40 }
 0x43e   : > { %4817 = vtanh.f32 %v3037_v5 }
 0x43f   : > { %8871 = vst [vmem:[#allocation16_spill] sm:$0xff] %v7778_v37  ;;  %3340 = vmatmul.f32.gmra.mxu0 %v3339_v26  ;;  %3597 = vmatmul.f32.gmra.mxu1 %v7778_v37  ;;  %v7782_v42 = vsub.f32 %v4816_v40, %v7778_v37  ;;  %v2463_v40 = vadd.f32 %v7522_v39, %v8873_v16  ;;  %v8874_v39 = vand.u32 4294901760, %v7526_v62 }
 0x440   : > { %3735 = vmatmul.f32.gmra.mxu2 %v7526_v62  ;;  %3935 = vmatmul.f32.gmra.mxu3 %v8872_v61 }
 0x441   : > { %v8519_v17 = vand.u32 4294901760, %v7782_v42  ;;  %v2685_v31 = vadd.f32 %v7505_v46, %v2463_v40 }
 0x443   : > { %v2883_v34 = vpop.f32.mrf.mxu2  ;;  %v3040_v56 = vpop.f32.mrf.mxu3  ;;  %v3346_v5 = vsub.f32 %v7782_v42, %v8519_v17 }
 0x444   : > { %v4818_v26 = vpop.eup %4817  ;;  %v3041_v37 = vadd.f32 %v3040_v56, %v2880_v8  ;;  %v7794_v28 = vpop.f32.mrf.mxu0  ;;  %v2884_v8 = vadd.f32 %v2883_v34, %v2685_v31 }
 0x445   : > { %v7796_v63 = vpop.f32.mrf.mxu1  ;;  %v3347_v41 = vand.u32 4294901760, %v3346_v5  ;;  %v7798_v61 = vand.u32 4294901760, %v4818_v26 }
 0x446   : > { %4819 = vtanh.f32 %v3041_v37 }
 0x447   : > { %3348 = vmatmul.f32.gmra.mxu0 %v3347_v41  ;;  %3601 = vmatmul.f32.gmra.mxu1 %v7798_v61  ;;  %v7802_v19 = vsub.f32 %v4818_v26, %v7798_v61  ;;  %v2468_v26 = vadd.f32 %v7545_v59, %v7244_v30  ;;  %v8875_v30 = vand.u32 4294901760, %v7543_v7 }
 0x448   : > { %3740 = vmatmul.f32.gmra.mxu2 %v7543_v7  ;;  %3941 = vmatmul.f32.gmra.mxu3 %v8874_v39 }
 0x449   : > { %v8520_v16 = vand.u32 4294901760, %v7802_v19  ;;  %v2691_v31 = vadd.f32 %v7528_v55, %v2468_v26 }
 0x44b   : > { %v2887_v56 = vpop.f32.mrf.mxu2  ;;  %v3044_v5 = vpop.f32.mrf.mxu3  ;;  %v3354_v37 = vsub.f32 %v7802_v19, %v8520_v16 }
 0x44c   : > { %v4820_v41 = vpop.eup %4819  ;;  %v3045_v17 = vadd.f32 %v3044_v5, %v2884_v8  ;;  %v7814_v46 = vpop.f32.mrf.mxu0  ;;  %v2888_v8 = vadd.f32 %v2887_v56, %v2691_v31 }
 0x44d   : > { %v7816_v40 = vpop.f32.mrf.mxu1  ;;  %v3355_v62 = vand.u32 4294901760, %v3354_v37  ;;  %v7818_v39 = vand.u32 4294901760, %v4820_v41 }
 0x44e   : > { %4821 = vtanh.f32 %v3045_v17 }
 0x44f   : > { %3356 = vmatmul.f32.gmra.mxu0 %v3355_v62  ;;  %3605 = vmatmul.f32.gmra.mxu1 %v7818_v39  ;;  %v7822_v34 = vsub.f32 %v4820_v41, %v7818_v39  ;;  %v2473_v41 = vadd.f32 %v7569_v27, %v7259_v52  ;;  %v8877_v52 = vand.u32 4294901760, %v7562_v32 }
 0x450   : > { %3745 = vmatmul.f32.gmra.mxu2 %v7562_v32  ;;  %3947 = vmatmul.f32.gmra.mxu3 %v8875_v30 }
 0x451   : > { %v8521_v59 = vand.u32 4294901760, %v7822_v34  ;;  %v2697_v31 = vadd.f32 %v7551_v4, %v2473_v41  ;;  %v2478_v41 = vadd.f32 %v7594_v20, %v7279_v15  ;;  %v8879_v20 = vand.u32 4294901760, %v7582_v9 }
 0x453   : > { %v2891_v5 = vpop.f32.mrf.mxu2  ;;  %v3048_v37 = vpop.f32.mrf.mxu3  ;;  %v3362_v17 = vsub.f32 %v7822_v34, %v8521_v59  ;;  %v2703_v15 = vadd.f32 %v7576_v6, %v2478_v41 }
 0x454   : > { %v4822_v62 = vpop.eup %4821  ;;  %v3049_v16 = vadd.f32 %v3048_v37, %v2888_v8  ;;  %v7834_v55 = vpop.f32.mrf.mxu0  ;;  %v7852_v8 = vld [vmem:[%s8290_s6] ss:$0 sm:$0xff] }
 0x455   : > { %v7836_v26 = vpop.f32.mrf.mxu1  ;;  %v3363_v7 = vand.u32 4294901760, %v3362_v17  ;;  %v7838_v30 = vand.u32 4294901760, %v4822_v62 }
 0x456   : > { %4823 = vtanh.f32 %v3049_v16  ;;  %v2892_v16 = vadd.f32 %v2891_v5, %v2697_v31  ;;  %v3150_v5 = vadd.f32 %v7852_v8, %v7614_v49 }
 0x457   : > { %8876 = vst [vmem:[#allocation41_spill] sm:$0xff] %v7838_v30  ;;  %3364 = vmatmul.f32.gmra.mxu0 %v3363_v7  ;;  %3609 = vmatmul.f32.gmra.mxu1 %v7838_v30  ;;  %v7842_v56 = vsub.f32 %v4822_v62, %v7838_v30 }
 0x458   : > { %3750 = vmatmul.f32.gmra.mxu2 %v7582_v9  ;;  %3953 = vmatmul.f32.gmra.mxu3 %v8877_v52 }
 0x459   : > { %v8524_v27 = vand.u32 4294901760, %v7842_v56 }
 0x45b   : > { %v2895_v37 = vpop.f32.mrf.mxu2  ;;  %v3052_v17 = vpop.f32.mrf.mxu3  ;;  %v3370_v62 = vsub.f32 %v7842_v56, %v8524_v27 }
 0x45c   : > { %v4824_v4 = vpop.eup %4823  ;;  %v3053_v32 = vadd.f32 %v3052_v17, %v2892_v16  ;;  %v7859_v7 = vpop.f32.mrf.mxu0  ;;  %v2896_v17 = vadd.f32 %v2895_v37, %v2703_v15  ;;  %v3158_v37 = vadd.f32 %v7852_v8, %v7634_v22 }
 0x45d   : > { %v7861_v52 = vpop.f32.mrf.mxu1  ;;  %v3371_v59 = vand.u32 4294901760, %v3370_v62  ;;  %v7863_v30 = vand.u32 4294901760, %v4824_v4  ;;  %v3499_v62 = vadd.f32 %v7596_v60, %v3150_v5  ;;  %v8880_v5 = vand.u32 4294901760, %v7602_v48 }
 0x45e   : > { %4825 = vtanh.f32 %v3053_v32 }
 0x45f   : > { %8878 = vst [vmem:[#allocation29_spill] sm:$0xff] %v7863_v30  ;;  %3372 = vmatmul.f32.gmra.mxu0 %v3371_v59  ;;  %3613 = vmatmul.f32.gmra.mxu1 %v7863_v30  ;;  %v7869_v31 = vsub.f32 %v4824_v4, %v7863_v30 }
 0x460   : > { %3755 = vmatmul.f32.gmra.mxu2 %v7602_v48  ;;  %3959 = vmatmul.f32.gmra.mxu3 %v8879_v20 }
 0x461   : > { %v8528_v16 = vand.u32 4294901760, %v7869_v31 }
 0x463   : > { %v3056_v49 = vpop.f32.mrf.mxu3  ;;  %v3676_v32 = vpop.f32.mrf.mxu2  ;;  %v3378_v59 = vsub.f32 %v7869_v31, %v8528_v16 }
 0x464   : > { %v4826_v4 = vpop.eup %4825  ;;  %v3057_v27 = vadd.f32 %v3056_v49, %v2896_v17  ;;  %v3677_v30 = vadd.f32 %v3676_v32, %v3499_v62  ;;  %v7880_v6 = vpop.f32.mrf.mxu0  ;;  %v3503_v17 = vadd.f32 %v7616_v18, %v3158_v37  ;;  %v3166_v18 = vadd.f32 %v7852_v8, %v7654_v44 }
 0x465   : > { %v7882_v41 = vpop.f32.mrf.mxu1  ;;  %v3379_v9 = vand.u32 4294901760, %v3378_v59  ;;  %v7884_v20 = vand.u32 4294901760, %v4826_v4 }
 0x466   : > { %4827 = vtanh.f32 %v3057_v27 }
 0x467   : > { %3380 = vmatmul.f32.gmra.mxu0 %v3379_v9  ;;  %3617 = vmatmul.f32.gmra.mxu1 %v7884_v20  ;;  %v7890_v60 = vsub.f32 %v4826_v4, %v7884_v20 }
 0x468   : > { %3760 = vmatmul.f32.gmra.mxu2 %v7622_v3  ;;  %3965 = vmatmul.f32.gmra.mxu3 %v8880_v5 }
 0x469   : > { %v8527_v15 = vand.u32 4294901760, %v7890_v60 }
 0x46b   : > { %v3681_v62 = vpop.f32.mrf.mxu2  ;;  %v3870_v49 = vpop.f32.mrf.mxu3  ;;  %v3386_v22 = vsub.f32 %v7890_v60, %v8527_v15 }
 0x46c   : > { %v4828_v27 = vpop.eup %4827  ;;  %v3682_v32 = vadd.f32 %v3681_v62, %v3503_v17  ;;  %v7900_v59 = vadd.f32 %v3870_v49, %v3677_v30  ;;  %v7902_v4 = vpop.f32.mrf.mxu0  ;;  %v8882_v30 = vand.u32 4294901760, %v7622_v3  ;;  %v3507_v62 = vadd.f32 %v7636_v51, %v3166_v18 }
 0x46d   : > { %v7904_v9 = vpop.f32.mrf.mxu1  ;;  %v3387_v48 = vand.u32 4294901760, %v3386_v22  ;;  %v7906_v5 = vand.u32 4294901760, %v4828_v27  ;;  %v3174_v3 = vadd.f32 %v7852_v8, %v7674_v25  ;;  %v8883_v51 = vand.u32 4294901760, %v7642_v47 }
 0x46e   : > { %v3182_v25 = vadd.f32 %v7852_v8, %v7694_v10 }
 0x46f   : > { %8881 = vst [vmem:[#allocation46_spill] sm:$0xff] %v7906_v5  ;;  %3388 = vmatmul.f32.gmra.mxu0 %v3387_v48  ;;  %3621 = vmatmul.f32.gmra.mxu1 %v7906_v5  ;;  %v7912_v37 = vsub.f32 %v4828_v27, %v7906_v5  ;;  %v3511_v18 = vadd.f32 %v7656_v2, %v3174_v3 }
 0x470   : > { %3765 = vmatmul.f32.gmra.mxu2 %v7642_v47  ;;  %3971 = vmatmul.f32.gmra.mxu3 %v8882_v30  ;;  %v8884_v47 = vand.u32 4294901760, %v7662_v33  ;;  %v3515_v2 = vadd.f32 %v7676_v36, %v3182_v25 }
 0x471   : > { %v3393_v17 = vand.u32 4294901760, %v7912_v37 }
 0x473   : > { %v3686_v49 = vpop.f32.mrf.mxu2  ;;  %v3876_v22 = vpop.f32.mrf.mxu3  ;;  %v3394_v44 = vsub.f32 %v7912_v37, %v3393_v17 }
 0x474   : > { %v3687_v48 = vadd.f32 %v3686_v49, %v3507_v62  ;;  %v7922_v15 = vadd.f32 %v3876_v22, %v3682_v32  ;;  %v7924_v27 = vpop.f32.mrf.mxu0 }
 0x475   : > { %v7926_v16 = vpop.f32.mrf.mxu1  ;;  %v3395_v5 = vand.u32 4294901760, %v3394_v44 }
 0x477   : > { %3396 = vmatmul.f32.gmra.mxu0 %v3395_v5  ;;  %4285 = vmatmul.f32.vlgmr.msra.gmra.mxu1 %v7313_v45 }
 0x478   : > { %3770 = vmatmul.f32.gmra.mxu2 %v7662_v33  ;;  %3977 = vmatmul.f32.gmra.mxu3 %v8883_v51  ;;  %v8885_v33 = vand.u32 4294901760, %v7682_v29 }
 0x47b   : > { %v3691_v32 = vpop.f32.mrf.mxu2  ;;  %v3882_v30 = vpop.f32.mrf.mxu3 }
 0x47c   : > { %v3692_v62 = vadd.f32 %v3691_v32, %v3511_v18  ;;  %v7935_v49 = vadd.f32 %v3882_v30, %v3687_v48  ;;  %v7937_v22 = vpop.f32.mrf.mxu0 }
 0x47d   : > { %v7939_v44 = vpop.f32.mrf.mxu1 }
 0x47f   : > { %4124 = vmatmul.f32.vlgmr.msra.gmra.mxu0 %v7313_v45  ;;  %4289 = vmatmul.f32.gmra.mxu1 %v7329_v13  ;;  %v3190_v45 = vadd.f32 %v7852_v8, %v7714_v21 }
 0x480   : > { %3775 = vmatmul.f32.gmra.mxu2 %v7682_v29  ;;  %3983 = vmatmul.f32.gmra.mxu3 %v8884_v47  ;;  %v8886_v29 = vand.u32 4294901760, %v7702_v54 }
 0x481   : > { %v3519_v36 = vadd.f32 %v7696_v24, %v3190_v45 }
 0x483   : > { %v3696_v5 = vpop.f32.mrf.mxu2  ;;  %v3888_v48 = vpop.f32.mrf.mxu3 }
 0x484   : > { %v3697_v3 = vadd.f32 %v3696_v5, %v3515_v2  ;;  %v7949_v51 = vadd.f32 %v3888_v48, %v3692_v62  ;;  %v7951_v18 = vpop.f32.mrf.mxu0 }
 0x485   : > { %v7953_v32 = vpop.f32.mrf.mxu1 }
 0x487   : > { %4128 = vmatmul.f32.gmra.mxu0 %v7329_v13  ;;  %4293 = vmatmul.f32.gmra.mxu1 %v7344_v57  ;;  %v3198_v13 = vadd.f32 %v7852_v8, %v7734_v14  ;;  %v8887_v14 = vld [vmem:[#allocation61_spill] sm:$0xff] }
 0x488   : > { %3780 = vmatmul.f32.gmra.mxu2 %v7702_v54  ;;  %3989 = vmatmul.f32.gmra.mxu3 %v8885_v33  ;;  %v8888_v54 = vand.u32 4294901760, %v7722_v11 }
 0x489   : > { %v3523_v24 = vadd.f32 %v7716_v43, %v3198_v13 }
 0x48b   : > { %v3701_v10 = vpop.f32.mrf.mxu2  ;;  %v3894_v30 = vpop.f32.mrf.mxu3 }
 0x48c   : > { %v3702_v62 = vadd.f32 %v3701_v10, %v3519_v36  ;;  %v7963_v25 = vadd.f32 %v3894_v30, %v3697_v3  ;;  %v7965_v47 = vpop.f32.mrf.mxu0 }
 0x48d   : > { %v7967_v2 = vpop.f32.mrf.mxu1 }
 0x48f   : > { %4132 = vmatmul.f32.gmra.mxu0 %v7344_v57  ;;  %4297 = vmatmul.f32.gmra.mxu1 %v7361_v58  ;;  %v3206_v57 = vadd.f32 %v7852_v8, %v7754_v53 }
 0x490   : > { %3785 = vmatmul.f32.gmra.mxu2 %v7722_v11  ;;  %3995 = vmatmul.f32.gmra.mxu3 %v8886_v29  ;;  %v8890_v11 = vand.u32 4294901760, %v7742_v0 }
 0x491   : > { %v3527_v43 = vadd.f32 %v7736_v50, %v3206_v57 }
 0x493   : > { %v3706_v21 = vpop.f32.mrf.mxu2  ;;  %v3900_v5 = vpop.f32.mrf.mxu3 }
 0x494   : > { %v3707_v48 = vadd.f32 %v3706_v21, %v3523_v24  ;;  %v7977_v3 = vadd.f32 %v3900_v5, %v3702_v62  ;;  %v7979_v45 = vpop.f32.mrf.mxu0  ;;  %v8891_v5 = vld [vmem:[#allocation66_spill] sm:$0xff] }
 0x495   : > { %v7981_v33 = vpop.f32.mrf.mxu1 }
 0x497   : > { %4136 = vmatmul.f32.gmra.mxu0 %v7361_v58  ;;  %4301 = vmatmul.f32.gmra.mxu1 %v8887_v14  ;;  %v8889_v58 = vld [vmem:[#allocation63_spill] sm:$0xff] }
 0x498   : > { %3790 = vmatmul.f32.gmra.mxu2 %v7742_v0  ;;  %4001 = vmatmul.f32.gmra.mxu3 %v8888_v54  ;;  %v8894_v54 = vand.u32 4294901760, %v7782_v42 }
 0x49b   : > { %v3711_v36 = vpop.f32.mrf.mxu2  ;;  %v3906_v10 = vpop.f32.mrf.mxu3 }
 0x49c   : > { %v3712_v30 = vadd.f32 %v3711_v36, %v3527_v43  ;;  %v7991_v62 = vadd.f32 %v3906_v10, %v3707_v48  ;;  %v7993_v13 = vpop.f32.mrf.mxu0  ;;  %v8892_v48 = vand.u32 4294901760, %v7762_v1  ;;  %v8897_v10 = vand.u32 4294901760, %v7802_v19 }
 0x49d   : > { %v7995_v29 = vpop.f32.mrf.mxu1 }
 0x49f   : > { %4140 = vmatmul.f32.gmra.mxu0 %v8887_v14  ;;  %4305 = vmatmul.f32.gmra.mxu1 %v8889_v58  ;;  %v8893_v14 = vld [vmem:[#allocation22_spill] sm:$0xff] }
 0x4a0   : > { %3795 = vmatmul.f32.gmra.mxu2 %v7762_v1  ;;  %4007 = vmatmul.f32.gmra.mxu3 %v8890_v11  ;;  %v8896_v1 = vld [vmem:[#allocation25_spill] sm:$0xff]  ;;  %v8900_v11 = vand.u32 4294901760, %v7822_v34 }
 0x4a3   : > { %v3912_v53 = vpop.f32.mrf.mxu3 }
 0x4a4   : > { %v8002_v50 = vadd.f32 %v3912_v53, %v3712_v30  ;;  %v8004_v24 = vpop.f32.mrf.mxu0 }
 0x4a5   : > { %v8006_v21 = vpop.f32.mrf.mxu1 }
 0x4a7   : > { %4144 = vmatmul.f32.gmra.mxu0 %v8889_v58  ;;  %4309 = vmatmul.f32.gmra.mxu1 %v8891_v5 }
 0x4a8   : > { %3800 = vmatmul.f32.gmra.mxu2 %v7782_v42  ;;  %4013 = vmatmul.f32.gmra.mxu3 %v8892_v48  ;;  %v8899_v42 = vld [vmem:[#allocation24_spill] sm:$0xff]  ;;  %v8904_v48 = vand.u32 4294901760, %v7842_v56 }
 0x4ac   : > { %v8013_v57 = vpop.f32.mrf.mxu0 }
 0x4ad   : > { %v8015_v0 = vpop.f32.mrf.mxu1 }
 0x4af   : > { %4148 = vmatmul.f32.gmra.mxu0 %v8891_v5  ;;  %4313 = vmatmul.f32.gmra.mxu1 %v8893_v14 }
 0x4b0   : > { %3805 = vmatmul.f32.gmra.mxu2 %v7802_v19  ;;  %4019 = vmatmul.f32.gmra.mxu3 %v8894_v54  ;;  %v8903_v19 = vld [vmem:[#allocation35_spill] sm:$0xff] }
 0x4b4   : > { %v8022_v43 = vpop.f32.mrf.mxu0 }
 0x4b5   : > { %v8024_v36 = vpop.f32.mrf.mxu1 }
 0x4b6   : > { %8895 = vst [vmem:[#allocation18_spill] sm:$0xff] %v8024_v36 }
 0x4b7   : > { %4152 = vmatmul.f32.gmra.mxu0 %v8893_v14  ;;  %4317 = vmatmul.f32.gmra.mxu1 %v8896_v1 }
 0x4b8   : > { %3810 = vmatmul.f32.gmra.mxu2 %v7822_v34  ;;  %4025 = vmatmul.f32.gmra.mxu3 %v8897_v10  ;;  %v8907_v34 = vld [vmem:[#allocation57_spill] sm:$0xff] }
 0x4bc   : > { %v8031_v30 = vpop.f32.mrf.mxu0 }
 0x4bd   : > { %v8033_v58 = vpop.f32.mrf.mxu1 }
 0x4be   : > { %8898 = vst [vmem:[#allocation44_spill] sm:$0xff] %v8033_v58 }
 0x4bf   : > { %4156 = vmatmul.f32.gmra.mxu0 %v8896_v1  ;;  %4321 = vmatmul.f32.gmra.mxu1 %v8899_v42  ;;  %v8908_v1 = vand.u32 4294901760, %v7869_v31 }
 0x4c0   : > { %3815 = vmatmul.f32.gmra.mxu2 %v7842_v56  ;;  %4031 = vmatmul.f32.gmra.mxu3 %v8900_v11  ;;  %v8911_v56 = vld [vmem:[#allocation39_spill] sm:$0xff]  ;;  %v8912_v11 = vand.u32 4294901760, %v7890_v60 }
 0x4c4   : > { %v8040_v53 = vpop.f32.mrf.mxu0 }
 0x4c5   : > { %8901 = vst [vmem:[#allocation28_spill] sm:$0xff] %v8040_v53  ;;  %v8042_v5 = vpop.f32.mrf.mxu1 }
 0x4c6   : > { %8902 = vst [vmem:[#allocation30_spill] sm:$0xff] %v8042_v5  ;;  %v8927_v5 = vld [vmem:[#allocation68_spill] sm:$0xff] }
 0x4c7   : > { %4160 = vmatmul.f32.gmra.mxu0 %v8899_v42  ;;  %4325 = vmatmul.f32.gmra.mxu1 %v8903_v19 }
 0x4c8   : > { %3820 = vmatmul.f32.gmra.mxu2 %v7869_v31  ;;  %4037 = vmatmul.f32.gmra.mxu3 %v8904_v48 }
 0x4cc   : > { %v8049_v14 = vpop.f32.mrf.mxu0 }
 0x4cd   : > { %8905 = vst [vmem:[#allocation48_spill] sm:$0xff] %v8049_v14  ;;  %v8051_v54 = vpop.f32.mrf.mxu1  ;;  %v8928_v14 = vld [vmem:[#allocation40_spill] sm:$0xff] }
 0x4ce   : > { %8906 = vst [vmem:[#allocation19_spill] sm:$0xff] %v8051_v54 }
 0x4cf   : > { %4164 = vmatmul.f32.gmra.mxu0 %v8903_v19  ;;  %4329 = vmatmul.f32.gmra.mxu1 %v8907_v34 }
 0x4d0   : > { %3825 = vmatmul.f32.gmra.mxu2 %v7890_v60  ;;  %4043 = vmatmul.f32.gmra.mxu3 %v8908_v1  ;;  %v8917_v1 = vld [vmem:[#allocation27_spill] sm:$0xff] }
 0x4d4   : > { %v8058_v10 = vpop.f32.mrf.mxu0 }
 0x4d5   : > { %8909 = vst [vmem:[#allocation38_spill] sm:$0xff] %v8058_v10  ;;  %v8060_v42 = vpop.f32.mrf.mxu1 }
 0x4d6   : > { %8910 = vst [vmem:[#allocation50_spill] sm:$0xff] %v8060_v42 }
 0x4d7   : > { %4168 = vmatmul.f32.gmra.mxu0 %v8907_v34  ;;  %4333 = vmatmul.f32.gmra.mxu1 %v8911_v56 }
 0x4d8   : > { %3830 = vmatmul.f32.gmra.mxu2 %v7912_v37  ;;  %4049 = vmatmul.f32.gmra.mxu3 %v8912_v11 }
 0x4dc   : > { %v8067_v19 = vpop.f32.mrf.mxu0 }
 0x4dd   : > { %8913 = vst [vmem:[#allocation52_spill] sm:$0xff] %v8067_v19  ;;  %v8069_v48 = vpop.f32.mrf.mxu1 }
 0x4de   : > { %8914 = vst [vmem:[#allocation21_spill] sm:$0xff] %v8069_v48 }
 0x4df   : > { %4172 = vmatmul.f32.gmra.mxu0 %v8911_v56  ;;  %4337 = vmatmul.f32.gmra.mxu1 %v7539_v35  ;;  %v8920_v56 = vld [vmem:[#allocation26_spill] sm:$0xff] }
 0x4e0   : > { %4055 = vmatmul.f32.gmra.mxu3 %v3393_v17  ;;  %v8922_v17 = vld [vmem:[#allocation33_spill] sm:$0xff] }
 0x4e4   : > { %v8075_v31 = vpop.f32.mrf.mxu0 }
 0x4e5   : > { %8915 = vst [vmem:[#allocation42_spill] sm:$0xff] %v8075_v31  ;;  %v8077_v34 = vpop.f32.mrf.mxu1 }
 0x4e6   : > { %8916 = vst [vmem:[#allocation54_spill] sm:$0xff] %v8077_v34 }
 0x4e7   : > { %4176 = vmatmul.f32.gmra.mxu0 %v7539_v35  ;;  %4341 = vmatmul.f32.gmra.mxu1 %v8917_v1 }
 0x4ec   : > { %v8081_v60 = vpop.f32.mrf.mxu0 }
 0x4ed   : > { %8918 = vst [vmem:[#allocation56_spill] sm:$0xff] %v8081_v60  ;;  %v8083_v11 = vpop.f32.mrf.mxu1  ;;  %v8923_v60 = vld [vmem:[#allocation43_spill] sm:$0xff] }
 0x4ee   : > { %8919 = vst [vmem:[#allocation23_spill] sm:$0xff] %v8083_v11 }
 0x4ef   : > { %4180 = vmatmul.f32.gmra.mxu0 %v8917_v1  ;;  %4345 = vmatmul.f32.gmra.mxu1 %v8920_v56 }
 0x4f4   : > { %v8087_v48 = vpop.f32.mrf.mxu0 }
 0x4f5   : > { %8921 = vst [vmem:[#allocation31_spill] sm:$0xff] %v8087_v48  ;;  %v4286_v37 = vpop.f32.mrf.mxu1  ;;  %v3716_v48 = vpop.f32.mrf.mxu2 }
 0x4f7   : > { %4184 = vmatmul.f32.gmra.mxu0 %v8920_v56  ;;  %4349 = vmatmul.f32.gmra.mxu1 %v8922_v17 }
 0x4fc   : > { %v4125_v34 = vpop.f32.mrf.mxu0 }
 0x4fd   : > { %v4290_v35 = vpop.f32.mrf.mxu1  ;;  %v4126_v31 = vadd.f32 %v4125_v34, %v7900_v59  ;;  %v8924_v59 = vld [vmem:[#allocation47_spill] sm:$0xff]  ;;  %v3721_v10 = vpop.f32.mrf.mxu2 }
 0x4ff   : > { %v4287_v42 = vadd.f32 %v4286_v37, %v4126_v31  ;;  %4188 = vmatmul.f32.gmra.mxu0 %v8922_v17  ;;  %4353 = vmatmul.f32.gmra.mxu1 %v8923_v60  ;;  %v3918_v31 = vpop.f32.mrf.mxu3 }
 0x501   : > { %4413 = vst [vmem:[%s8096_s11] sm:$0xff] %v4287_v42  ;;  %v8925_v42 = vld [vmem:[#allocation32_spill] sm:$0xff] }
 0x504   : > { %v4129_v1 = vpop.f32.mrf.mxu0 }
 0x505   : > { %v4294_v56 = vpop.f32.mrf.mxu1  ;;  %v4130_v11 = vadd.f32 %v4129_v1, %v7922_v15 }
 0x507   : > { %v4291_v19 = vadd.f32 %v4290_v35, %v4130_v11  ;;  %4192 = vmatmul.f32.gmra.mxu0 %v8923_v60  ;;  %4357 = vmatmul.f32.gmra.mxu1 %v8924_v59  ;;  %v3924_v15 = vpop.f32.mrf.mxu3 }
 0x509   : > { %4414 = vst [vmem:[%s8096_s11 + $0x8] sm:$0xff] %v4291_v19  ;;  %v8926_v19 = vld [vmem:[#allocation51_spill] sm:$0xff] }
 0x50c   : > { %v4133_v34 = vpop.f32.mrf.mxu0 }
 0x50d   : > { %v4298_v37 = vpop.f32.mrf.mxu1  ;;  %v4134_v17 = vadd.f32 %v4133_v34, %v7935_v49  ;;  %v3726_v49 = vpop.f32.mrf.mxu2 }
 0x50f   : > { %v4295_v54 = vadd.f32 %v4294_v56, %v4134_v17  ;;  %4196 = vmatmul.f32.gmra.mxu0 %v8924_v59  ;;  %4361 = vmatmul.f32.gmra.mxu1 %v8925_v42  ;;  %v3930_v34 = vpop.f32.mrf.mxu3 }
 0x511   : > { %4415 = vst [vmem:[%s8096_s11 + $0x10] sm:$0xff] %v4295_v54 }
 0x514   : > { %v4137_v11 = vpop.f32.mrf.mxu0 }
 0x515   : > { %v4302_v60 = vpop.f32.mrf.mxu1  ;;  %v4138_v35 = vadd.f32 %v4137_v11, %v7949_v51 }
 0x517   : > { %v4299_v1 = vadd.f32 %v4298_v37, %v4138_v35  ;;  %4200 = vmatmul.f32.gmra.mxu0 %v8925_v42  ;;  %4365 = vmatmul.f32.gmra.mxu1 %v8926_v19  ;;  %v8115_v42 = vpop.f32.mrf.mxu2  ;;  %v8118_v35 = vpop.f32.mrf.mxu3 }
 0x519   : > { %4416 = vst [vmem:[%s8096_s11 + $0x18] sm:$0xff] %v4299_v1 }
 0x51c   : > { %v4141_v56 = vpop.f32.mrf.mxu0 }
 0x51d   : > { %v4306_v59 = vpop.f32.mrf.mxu1  ;;  %v4142_v17 = vadd.f32 %v4141_v56, %v7963_v25 }
 0x51f   : > { %v4303_v54 = vadd.f32 %v4302_v60, %v4142_v17  ;;  %4204 = vmatmul.f32.gmra.mxu0 %v8926_v19  ;;  %4369 = vmatmul.f32.gmra.mxu1 %v8927_v5  ;;  %v8124_v56 = vpop.f32.mrf.mxu2 }
 0x521   : > { %4417 = vst [vmem:[%s8096_s11 + $0x20] sm:$0xff] %v4303_v54  ;;  %v8929_v54 = vld [vmem:[#allocation34_spill] sm:$0xff] }
 0x524   : > { %v4145_v51 = vpop.f32.mrf.mxu0 }
 0x525   : > { %v4310_v37 = vpop.f32.mrf.mxu1  ;;  %v4146_v11 = vadd.f32 %v4145_v51, %v7977_v3  ;;  %v8128_v3 = vpop.f32.mrf.mxu3 }
 0x527   : > { %v4307_v1 = vadd.f32 %v4306_v59, %v4146_v11  ;;  %4208 = vmatmul.f32.gmra.mxu0 %v8927_v5  ;;  %4373 = vmatmul.f32.gmra.mxu1 %v8928_v14  ;;  %v3214_v5 = vadd.f32 %v7852_v8, %v7774_v23 }
 0x529   : > { %4418 = vst [vmem:[%s8096_s11 + $0x28] sm:$0xff] %v4307_v1 }
 0x52c   : > { %v4149_v25 = vpop.f32.mrf.mxu0 }
 0x52d   : > { %v4314_v60 = vpop.f32.mrf.mxu1  ;;  %v4150_v19 = vadd.f32 %v4149_v25, %v7991_v62  ;;  %v3531_v62 = vadd.f32 %v7756_v38, %v3214_v5  ;;  %v3741_v25 = vpop.f32.mrf.mxu2 }
 0x52e   : > { %v3948_v23 = vpop.f32.mrf.mxu3 }
 0x52f   : > { %v4311_v17 = vadd.f32 %v4310_v37, %v4150_v19  ;;  %4212 = vmatmul.f32.gmra.mxu0 %v8928_v14  ;;  %4377 = vmatmul.f32.gmra.mxu1 %v8929_v54  ;;  %v8930_v37 = vld [vmem:[#allocation55_spill] sm:$0xff]  ;;  %v3717_v14 = vadd.f32 %v3716_v48, %v3531_v62  ;;  %v3222_v19 = vadd.f32 %v7852_v8, %v7794_v28 }
 0x530   : > { %v3230_v48 = vadd.f32 %v7852_v8, %v7814_v46 }
 0x531   : > { %4419 = vst [vmem:[%s8096_s11 + $0x30] sm:$0xff] %v4311_v17  ;;  %v3919_v17 = vadd.f32 %v3918_v31, %v3717_v14 }
 0x534   : > { %v4153_v59 = vpop.f32.mrf.mxu0 }
 0x535   : > { %v4318_v51 = vpop.f32.mrf.mxu1  ;;  %v4154_v11 = vadd.f32 %v4153_v59, %v8002_v50  ;;  %v3535_v50 = vadd.f32 %v7776_v12, %v3222_v19  ;;  %v3746_v28 = vpop.f32.mrf.mxu2 }
 0x537   : > { %v4315_v1 = vadd.f32 %v4314_v60, %v4154_v11  ;;  %4216 = vmatmul.f32.gmra.mxu0 %v8929_v54  ;;  %4381 = vmatmul.f32.gmra.mxu1 %v8930_v37  ;;  %v8931_v60 = vld [vmem:[#allocation16_spill] sm:$0xff]  ;;  %v3722_v54 = vadd.f32 %v3721_v10, %v3535_v50  ;;  %v3954_v11 = vpop.f32.mrf.mxu3  ;;  %v3238_v10 = vadd.f32 %v7852_v8, %v7834_v55 }
 0x538   : > { %v3246_v55 = vadd.f32 %v7852_v8, %v7859_v7  ;;  %v3254_v7 = vadd.f32 %v7852_v8, %v7880_v6 }
 0x539   : > { %4420 = vst [vmem:[%s8096_s11 + $0x38] sm:$0xff] %v4315_v1  ;;  %v3925_v5 = vadd.f32 %v3924_v15, %v3722_v54  ;;  %v3543_v14 = vadd.f32 %v7816_v40, %v3238_v10 }
 0x53a   : > { %v3547_v40 = vadd.f32 %v7836_v26, %v3246_v55  ;;  %v3551_v26 = vadd.f32 %v7861_v52, %v3254_v7  ;;  %v8934_v55 = vld [vmem:[#allocation46_spill] sm:$0xff] }
 0x53c   : > { %v4157_v58 = vpop.f32.mrf.mxu0 }
 0x53d   : > { %v4322_v53 = vpop.f32.mrf.mxu1  ;;  %v4158_v36 = vadd.f32 %v4157_v58, %v3919_v17  ;;  %v3539_v58 = vadd.f32 %v7796_v63, %v3230_v48  ;;  %v3751_v1 = vpop.f32.mrf.mxu2 }
 0x53f   : > { %v4319_v38 = vadd.f32 %v4318_v51, %v4158_v36  ;;  %4220 = vmatmul.f32.gmra.mxu0 %v8930_v37  ;;  %4385 = vmatmul.f32.gmra.mxu1 %v8931_v60  ;;  %v3727_v36 = vadd.f32 %v3726_v49, %v3539_v58  ;;  %v3960_v19 = vpop.f32.mrf.mxu3  ;;  %v3262_v58 = vadd.f32 %v7852_v8, %v7902_v4 }
 0x541   : > { %4421 = vst [vmem:[%s8096_s11 + $0x40] sm:$0xff] %v4319_v38  ;;  %v3931_v46 = vadd.f32 %v3930_v34, %v3727_v36 }
 0x544   : > { %v4161_v31 = vpop.f32.mrf.mxu0 }
 0x545   : > { %v4326_v59 = vpop.f32.mrf.mxu1  ;;  %v4162_v62 = vadd.f32 %v4161_v31, %v3925_v5  ;;  %v3756_v38 = vpop.f32.mrf.mxu2 }
 0x547   : > { %v4323_v12 = vadd.f32 %v4322_v53, %v4162_v62  ;;  %4224 = vmatmul.f32.gmra.mxu0 %v8931_v60  ;;  %4389 = vmatmul.f32.gmra.mxu1 %v7798_v61  ;;  %v3732_v53 = vadd.f32 %v8115_v42, %v3543_v14  ;;  %v3737_v42 = vadd.f32 %v8124_v56, %v3547_v40  ;;  %v3966_v54 = vpop.f32.mrf.mxu3 }
 0x548   : > { %v3742_v62 = vadd.f32 %v3741_v25, %v3551_v26  ;;  %v3270_v25 = vadd.f32 %v7852_v8, %v7924_v27 }
 0x549   : > { %4422 = vst [vmem:[%s8096_s11 + $0x48] sm:$0xff] %v4323_v12  ;;  %v3937_v49 = vadd.f32 %v8118_v35, %v3732_v53  ;;  %v3943_v35 = vadd.f32 %v8128_v3, %v3737_v42 }
 0x54a   : > { %v3949_v6 = vadd.f32 %v3948_v23, %v3742_v62  ;;  %v3559_v53 = vadd.f32 %v7904_v9, %v3270_v25 }
 0x54c   : > { %v4165_v15 = vpop.f32.mrf.mxu0 }
 0x54d   : > { %v4330_v51 = vpop.f32.mrf.mxu1  ;;  %v4166_v37 = vadd.f32 %v4165_v15, %v3931_v46  ;;  %v3761_v56 = vpop.f32.mrf.mxu2  ;;  %v3555_v46 = vadd.f32 %v7882_v41, %v3262_v58 }
 0x54f   : > { %v4327_v63 = vadd.f32 %v4326_v59, %v4166_v37  ;;  %4228 = vmatmul.f32.gmra.mxu0 %v7798_v61  ;;  %4393 = vmatmul.f32.gmra.mxu1 %v7818_v39  ;;  %v8932_v61 = vld [vmem:[#allocation41_spill] sm:$0xff]  ;;  %v3972_v12 = vpop.f32.mrf.mxu3  ;;  %v3747_v15 = vadd.f32 %v3746_v28, %v3555_v46  ;;  %v3278_v28 = vadd.f32 %v7852_v8, %v7937_v22 }
 0x551   : > { %4423 = vst [vmem:[%s8096_s11 + $0x50] sm:$0xff] %v4327_v63  ;;  %v3563_v40 = vadd.f32 %v7926_v16, %v3278_v28 }
 0x554   : > { %v4169_v34 = vpop.f32.mrf.mxu0 }
 0x555   : > { %v4334_v17 = vpop.f32.mrf.mxu1  ;;  %v4170_v50 = vadd.f32 %v4169_v34, %v3937_v49  ;;  %v3766_v4 = vpop.f32.mrf.mxu2  ;;  %v3752_v49 = vadd.f32 %v3751_v1, %v3559_v53  ;;  %v3286_v1 = vadd.f32 %v7852_v8, %v7951_v18 }
 0x557   : > { %v4331_v60 = vadd.f32 %v4330_v51, %v4170_v50  ;;  %4232 = vmatmul.f32.gmra.mxu0 %v7818_v39  ;;  %4397 = vmatmul.f32.gmra.mxu1 %v8932_v61  ;;  %v8933_v39 = vld [vmem:[#allocation29_spill] sm:$0xff]  ;;  %v3955_v51 = vadd.f32 %v3954_v11, %v3747_v15  ;;  %v3978_v14 = vpop.f32.mrf.mxu3  ;;  %v3961_v27 = vadd.f32 %v3960_v19, %v3752_v49 }
 0x558   : > { %v3567_v7 = vadd.f32 %v7939_v44, %v3286_v1  ;;  %v3302_v44 = vadd.f32 %v7852_v8, %v7979_v45 }
 0x559   : > { %4424 = vst [vmem:[%s8096_s11 + $0x58] sm:$0xff] %v4331_v60 }
 0x55a   : > { %v3762_v16 = vadd.f32 %v3761_v56, %v3567_v7 }
 0x55c   : > { %v4173_v48 = vpop.f32.mrf.mxu0 }
 0x55d   : > { %v4338_v5 = vpop.f32.mrf.mxu1  ;;  %v4174_v31 = vadd.f32 %v4173_v48, %v3943_v35 }
 0x55f   : > { %v4335_v59 = vadd.f32 %v4334_v17, %v4174_v31  ;;  %4236 = vmatmul.f32.gmra.mxu0 %v8932_v61  ;;  %4401 = vmatmul.f32.gmra.mxu1 %v8933_v39  ;;  %v3771_v17 = vpop.f32.mrf.mxu2  ;;  %v3984_v9 = vpop.f32.mrf.mxu3  ;;  %v3294_v31 = vadd.f32 %v7852_v8, %v7965_v47 }
 0x561   : > { %4425 = vst [vmem:[%s8096_s11 + $0x60] sm:$0xff] %v4335_v59 }
 0x564   : > { %v4177_v3 = vpop.f32.mrf.mxu0 }
 0x565   : > { %v4342_v36 = vpop.f32.mrf.mxu1  ;;  %v4178_v10 = vadd.f32 %v4177_v3, %v3949_v6 }
 0x567   : > { %v4339_v52 = vadd.f32 %v4338_v5, %v4178_v10  ;;  %4240 = vmatmul.f32.gmra.mxu0 %v8933_v39  ;;  %4405 = vmatmul.f32.gmra.mxu1 %v7884_v20  ;;  %v3776_v35 = vpop.f32.mrf.mxu2  ;;  %v3990_v5 = vpop.f32.mrf.mxu3 }
 0x569   : > { %4426 = vst [vmem:[%s8096_s11 + $0x68] sm:$0xff] %v4339_v52 }
 0x56c   : > { %v4181_v23 = vpop.f32.mrf.mxu0 }
 0x56d   : > { %v4346_v37 = vpop.f32.mrf.mxu1  ;;  %v4182_v63 = vadd.f32 %v4181_v23, %v3955_v51 }
 0x56f   : > { %v4343_v41 = vadd.f32 %v4342_v36, %v4182_v63  ;;  %4244 = vmatmul.f32.gmra.mxu0 %v7884_v20  ;;  %4409 = vmatmul.f32.gmra.mxu1 %v8934_v55  ;;  %v3757_v20 = vadd.f32 %v3756_v38, %v3563_v40  ;;  %v3973_v38 = vadd.f32 %v3972_v12, %v3762_v16  ;;  %v3781_v58 = vpop.f32.mrf.mxu2  ;;  %v3996_v6 = vpop.f32.mrf.mxu3 }
 0x570   : > { %v3575_v12 = vadd.f32 %v7967_v2, %v3302_v44  ;;  %v3318_v2 = vadd.f32 %v7852_v8, %v8004_v24 }
 0x571   : > { %4427 = vst [vmem:[%s8096_s11 + $0x70] sm:$0xff] %v4343_v41  ;;  %v3967_v61 = vadd.f32 %v3966_v54, %v3757_v20  ;;  %v3571_v54 = vadd.f32 %v7953_v32, %v3294_v31  ;;  %v3310_v32 = vadd.f32 %v7852_v8, %v7993_v13 }
 0x572   : > { %v3772_v46 = vadd.f32 %v3771_v17, %v3575_v12  ;;  %v3583_v49 = vadd.f32 %v7995_v29, %v3318_v2  ;;  %v3334_v29 = vadd.f32 %v7852_v8, %v8022_v43  ;;  %v8940_v2 = vld [vmem:[#allocation38_spill] sm:$0xff] }
 0x573   : > { %v3767_v62 = vadd.f32 %v3766_v4, %v3571_v54  ;;  %v3579_v23 = vadd.f32 %v7981_v33, %v3310_v32  ;;  %v3326_v33 = vadd.f32 %v7852_v8, %v8013_v57 }
 0x574   : > { %v4185_v11 = vpop.f32.mrf.mxu0  ;;  %v3985_v52 = vadd.f32 %v3984_v9, %v3772_v46 }
 0x575   : > { %v4350_v34 = vpop.f32.mrf.mxu1  ;;  %v4186_v50 = vadd.f32 %v4185_v11, %v3961_v27  ;;  %v3979_v56 = vadd.f32 %v3978_v14, %v3767_v62  ;;  %v3777_v14 = vadd.f32 %v3776_v35, %v3579_v23  ;;  %v3782_v11 = vadd.f32 %v3781_v58, %v3583_v49  ;;  %v8941_v49 = vld [vmem:[#allocation19_spill] sm:$0xff] }
 0x576   : > { %v3587_v24 = vadd.f32 %v8006_v21, %v3326_v33  ;;  %v3342_v21 = vadd.f32 %v7852_v8, %v8031_v30 }
 0x577   : > { %v4347_v60 = vadd.f32 %v4346_v37, %v4186_v50  ;;  %4248 = vmatmul.f32.gmra.mxu0 %v8934_v55  ;;  %v3786_v15 = vpop.f32.mrf.mxu2  ;;  %v4002_v4 = vpop.f32.mrf.mxu3  ;;  %v3991_v63 = vadd.f32 %v3990_v5, %v3777_v14 }
 0x578   : > { %v3787_v20 = vadd.f32 %v3786_v15, %v3587_v24 }
 0x579   : > { %4428 = vst [vmem:[%s8096_s11 + $0x78] sm:$0xff] %v4347_v60 }
 0x57c   : > { %v4189_v42 = vpop.f32.mrf.mxu0 }
 0x57d   : > { %v4354_v22 = vpop.f32.mrf.mxu1  ;;  %v4190_v19 = vadd.f32 %v4189_v42, %v3967_v61  ;;  %v4003_v61 = vadd.f32 %v4002_v4, %v3787_v20  ;;  %v8939_v4 = vld [vmem:[#allocation30_spill] sm:$0xff] }
 0x57f   : > { %v4351_v48 = vadd.f32 %v4350_v34, %v4190_v19  ;;  %v3791_v55 = vpop.f32.mrf.mxu2  ;;  %v4008_v28 = vpop.f32.mrf.mxu3  ;;  %v3997_v34 = vadd.f32 %v3996_v6, %v3782_v11  ;;  %v3591_v19 = vadd.f32 %v8015_v0, %v3334_v29 }
 0x581   : > { %4429 = vst [vmem:[%s8096_s11 + $0x80] sm:$0xff] %v4351_v48  ;;  %v3792_v35 = vadd.f32 %v3791_v55, %v3591_v19 }
 0x583   : > { %v4009_v16 = vadd.f32 %v4008_v28, %v3792_v35 }
 0x584   : > { %v4193_v26 = vpop.f32.mrf.mxu0 }
 0x585   : > { %v4358_v59 = vpop.f32.mrf.mxu1  ;;  %v4194_v18 = vadd.f32 %v4193_v26, %v3973_v38  ;;  %v8935_v26 = vld [vmem:[#allocation18_spill] sm:$0xff] }
 0x587   : > { %v4355_v39 = vadd.f32 %v4354_v22, %v4194_v18  ;;  %v3796_v9 = vpop.f32.mrf.mxu2  ;;  %v4014_v1 = vpop.f32.mrf.mxu3 }
 0x589   : > { %4430 = vst [vmem:[%s8096_s11 + $0x88] sm:$0xff] %v4355_v39  ;;  %v8936_v39 = vld [vmem:[#allocation28_spill] sm:$0xff] }
 0x58a   : > { %v3350_v0 = vadd.f32 %v7852_v8, %v8936_v39 }
 0x58c   : > { %v4197_v3 = vpop.f32.mrf.mxu0 }
 0x58d   : > { %v4362_v36 = vpop.f32.mrf.mxu1  ;;  %v4198_v47 = vadd.f32 %v4197_v3, %v3979_v56  ;;  %v8937_v3 = vld [vmem:[#allocation44_spill] sm:$0xff] }
 0x58f   : > { %v4359_v10 = vadd.f32 %v4358_v59, %v4198_v47  ;;  %v3801_v48 = vpop.f32.mrf.mxu2  ;;  %v4020_v5 = vpop.f32.mrf.mxu3  ;;  %v3595_v59 = vadd.f32 %v8935_v26, %v3342_v21  ;;  %v8945_v21 = vld [vmem:[#allocation21_spill] sm:$0xff] }
 0x591   : > { %4431 = vst [vmem:[%s8096_s11 + $0x90] sm:$0xff] %v4359_v10  ;;  %v3797_v54 = vadd.f32 %v3796_v9, %v3595_v59  ;;  %v8938_v10 = vld [vmem:[#allocation48_spill] sm:$0xff] }
 0x592   : > { %v3358_v46 = vadd.f32 %v7852_v8, %v8938_v10 }
 0x593   : > { %v4015_v62 = vadd.f32 %v4014_v1, %v3797_v54 }
 0x594   : > { %v4201_v25 = vpop.f32.mrf.mxu0 }
 0x595   : > { %v4366_v51 = vpop.f32.mrf.mxu1  ;;  %v4202_v45 = vadd.f32 %v4201_v25, %v3985_v52 }
 0x597   : > { %v4363_v37 = vadd.f32 %v4362_v36, %v4202_v45  ;;  %v3806_v58 = vpop.f32.mrf.mxu2  ;;  %v4026_v30 = vpop.f32.mrf.mxu3  ;;  %v3599_v36 = vadd.f32 %v8937_v3, %v3350_v0  ;;  %v3603_v45 = vadd.f32 %v8939_v4, %v3358_v46  ;;  %v8949_v46 = vld [vmem:[#allocation23_spill] sm:$0xff] }
 0x599   : > { %4432 = vst [vmem:[%s8096_s11 + $0x98] sm:$0xff] %v4363_v37  ;;  %v3802_v12 = vadd.f32 %v3801_v48, %v3599_v36  ;;  %v3807_v14 = vadd.f32 %v3806_v58, %v3603_v45 }
 0x59b   : > { %v4021_v32 = vadd.f32 %v4020_v5, %v3802_v12 }
 0x59c   : > { %v4205_v53 = vpop.f32.mrf.mxu0 }
 0x59d   : > { %v4370_v41 = vpop.f32.mrf.mxu1  ;;  %v4206_v13 = vadd.f32 %v4205_v53, %v3991_v63  ;;  %v3366_v63 = vadd.f32 %v7852_v8, %v8940_v2  ;;  %v4027_v53 = vadd.f32 %v4026_v30, %v3807_v14 }
 0x59f   : > { %v4367_v27 = vadd.f32 %v4366_v51, %v4206_v13  ;;  %v3811_v51 = vpop.f32.mrf.mxu2  ;;  %v4032_v37 = vpop.f32.mrf.mxu3  ;;  %v3607_v28 = vadd.f32 %v8941_v49, %v3366_v63 }
 0x5a1   : > { %4433 = vst [vmem:[%s8096_s11 + $0xa0] sm:$0xff] %v4367_v27  ;;  %v3812_v33 = vadd.f32 %v3811_v51, %v3607_v28 }
 0x5a4   : > { %v4209_v17 = vpop.f32.mrf.mxu0 }
 0x5a5   : > { %v4374_v50 = vpop.f32.mrf.mxu1  ;;  %v4210_v40 = vadd.f32 %v4209_v17, %v3997_v34  ;;  %v8942_v17 = vld [vmem:[#allocation52_spill] sm:$0xff] }
 0x5a7   : > { %v4371_v60 = vadd.f32 %v4370_v41, %v4210_v40  ;;  %v3816_v11 = vpop.f32.mrf.mxu2  ;;  %v4038_v34 = vpop.f32.mrf.mxu3  ;;  %v4033_v40 = vadd.f32 %v4032_v37, %v3812_v33 }
 0x5a9   : > { %4434 = vst [vmem:[%s8096_s11 + $0xa8] sm:$0xff] %v4371_v60  ;;  %v8943_v60 = vld [vmem:[#allocation50_spill] sm:$0xff] }
 0x5ac   : > { %v4213_v42 = vpop.f32.mrf.mxu0 }
 0x5ad   : > { %v4378_v22 = vpop.f32.mrf.mxu1  ;;  %v4214_v57 = vadd.f32 %v4213_v42, %v4003_v61 }
 0x5af   : > { %v4375_v7 = vadd.f32 %v4374_v50, %v4214_v57  ;;  %v3374_v50 = vadd.f32 %v7852_v8, %v8942_v17  ;;  %v3821_v42 = vpop.f32.mrf.mxu2 }
 0x5b1   : > { %4435 = vst [vmem:[%s8096_s11 + $0xb0] sm:$0xff] %v4375_v7  ;;  %v3611_v20 = vadd.f32 %v8943_v60, %v3374_v50  ;;  %v4044_v7 = vpop.f32.mrf.mxu3 }
 0x5b3   : > { %v3817_v61 = vadd.f32 %v3816_v11, %v3611_v20 }
 0x5b4   : > { %v4217_v31 = vpop.f32.mrf.mxu0 }
 0x5b5   : > { %v4382_v38 = vpop.f32.mrf.mxu1  ;;  %v4218_v43 = vadd.f32 %v4217_v31, %v4009_v16  ;;  %v4039_v19 = vadd.f32 %v4038_v34, %v3817_v61 }
 0x5b7   : > { %v4379_v18 = vadd.f32 %v4378_v22, %v4218_v43  ;;  %v8944_v22 = vld [vmem:[#allocation42_spill] sm:$0xff]  ;;  %v8946_v43 = vld [vmem:[#allocation56_spill] sm:$0xff] }
 0x5b8   : > { %v3382_v57 = vadd.f32 %v7852_v8, %v8944_v22  ;;  %v3390_v26 = vadd.f32 %v7852_v8, %v8946_v43 }
 0x5b9   : > { %4436 = vst [vmem:[%s8096_s11 + $0xb8] sm:$0xff] %v4379_v18  ;;  %v3826_v18 = vpop.f32.mrf.mxu2  ;;  %v4050_v0 = vpop.f32.mrf.mxu3 }
 0x5ba   : > { %v3615_v16 = vadd.f32 %v8945_v21, %v3382_v57 }
 0x5bc   : > { %v4221_v44 = vpop.f32.mrf.mxu0  ;;  %v3822_v31 = vadd.f32 %v3821_v42, %v3615_v16 }
 0x5bd   : > { %v4386_v56 = vpop.f32.mrf.mxu1  ;;  %v4222_v6 = vadd.f32 %v4221_v44, %v4015_v62  ;;  %v8947_v62 = vld [vmem:[#allocation54_spill] sm:$0xff] }
 0x5be   : > { %v4045_v59 = vadd.f32 %v4044_v7, %v3822_v31  ;;  %v3619_v58 = vadd.f32 %v8947_v62, %v3390_v26 }
 0x5bf   : > { %v4383_v47 = vadd.f32 %v4382_v38, %v4222_v6  ;;  %v8948_v6 = vld [vmem:[#allocation31_spill] sm:$0xff] }
 0x5c0   : > { %v3398_v30 = vadd.f32 %v7852_v8, %v8948_v6 }
 0x5c1   : > { %4437 = vst [vmem:[%s8096_s11 + $0xc0] sm:$0xff] %v4383_v47  ;;  %v3831_v10 = vpop.f32.mrf.mxu2 }
 0x5c4   : > { %v4225_v52 = vpop.f32.mrf.mxu0 }
 0x5c5   : > { %v4390_v15 = vpop.f32.mrf.mxu1  ;;  %v4226_v25 = vadd.f32 %v4225_v52, %v4021_v32  ;;  %v3623_v32 = vadd.f32 %v8949_v46, %v3398_v30 }
 0x5c7   : > { %v4387_v23 = vadd.f32 %v4386_v56, %v4226_v25  ;;  %v3827_v56 = vadd.f32 %v3826_v18, %v3619_v58  ;;  %v3832_v25 = vadd.f32 %v3831_v10, %v3623_v32 }
 0x5c9   : > { %4438 = vst [vmem:[%s8096_s11 + $0xc8] sm:$0xff] %v4387_v23  ;;  %v4051_v3 = vadd.f32 %v4050_v0, %v3827_v56 }
 0x5cc   : > { %v4229_v41 = vpop.f32.mrf.mxu0 }
 0x5cd   : > { %v4230_v55 = vadd.f32 %v4229_v41, %v4027_v53  ;;  %v4394_v13 = vpop.f32.mrf.mxu1 }
 0x5cf   : > { %v4391_v27 = vadd.f32 %v4390_v15, %v4230_v55  ;;  %v4056_v15 = vpop.f32.mrf.mxu3 }
 0x5d0   : > { %v4057_v8 = vadd.f32 %v4056_v15, %v3832_v25 }
 0x5d1   : > { %4439 = vst [vmem:[%s8096_s11 + $0xd0] sm:$0xff] %v4391_v27 }
 0x5d4   : > { %v4233_v24 = vpop.f32.mrf.mxu0 }
 0x5d5   : > { %v4234_v9 = vadd.f32 %v4233_v24, %v4033_v40  ;;  %v4398_v29 = vpop.f32.mrf.mxu1 }
 0x5d7   : > { %v4395_v1 = vadd.f32 %v4394_v13, %v4234_v9 }
 0x5d9   : > { %4440 = vst [vmem:[%s8096_s11 + $0xd8] sm:$0xff] %v4395_v1 }
 0x5dc   : > { %v4237_v35 = vpop.f32.mrf.mxu0 }
 0x5dd   : > { %v4238_v48 = vadd.f32 %v4237_v35, %v4039_v19  ;;  %v4402_v38 = vpop.f32.mrf.mxu1 }
 0x5df   : > { %v4399_v5 = vadd.f32 %v4398_v29, %v4238_v48 }
 0x5e1   : > { %4441 = vst [vmem:[%s8096_s11 + $0xe0] sm:$0xff] %v4399_v5 }
 0x5e4   : > { %v4241_v54 = vpop.f32.mrf.mxu0 }
 0x5e5   : > { %v4242_v39 = vadd.f32 %v4241_v54, %v4045_v59  ;;  %v4406_v36 = vpop.f32.mrf.mxu1 }
 0x5e7   : > { %v4403_v44 = vadd.f32 %v4402_v38, %v4242_v39 }
 0x5e9   : > { %4442 = vst [vmem:[%s8096_s11 + $0xe8] sm:$0xff] %v4403_v44 }
 0x5ec   : > { %v4245_v47 = vpop.f32.mrf.mxu0 }
 0x5ed   : > { %v4246_v12 = vadd.f32 %v4245_v47, %v4051_v3  ;;  %v4410_v45 = vpop.f32.mrf.mxu1 }
 0x5ef   : > { %v4407_v52 = vadd.f32 %v4406_v36, %v4246_v12 }
 0x5f1   : > { %4443 = vst [vmem:[%s8096_s11 + $0xf0] sm:$0xff] %v4407_v52 }
 0x5f4   : > { %v4249_v51 = vpop.f32.mrf.mxu0 }
 0x5f5   : > { %v4250_v4 = vadd.f32 %v4249_v51, %v4057_v8 }
 0x5f7   : > { %v4411_v23 = vadd.f32 %v4410_v45, %v4250_v4 }
 0x5f9   : > { %4444 = vst [vmem:[%s8096_s11 + $0xf8] sm:$0xff] %v4411_v23 }
 0x5fa   : > { %4978 = shalt.err (!%p4975_p10)
}
 0x5fb   : > { %s5032_s15 = smov 128   ;;  %s5033_s11 = smov 8  }
 0x5fc   : > { %4631 = dma.vmem_to_hbm [thread:$0]  (%p5165_p3), %s4459_s12, 4096, %s4461_s19, %s4446_s28, %s5032_s15, %s5032_s15, %s5033_s11  }
 0x5fd PF: > { %s4475_s1 = sand.u32 1, %s5013_s24   ;;  %p8950_p12 = scmp.ge.s32.totalorder %s5025_s27, 2 }
 0x5fe   : > { %s4476_s20 = scalar_lea.sflag [#allocation4], %s4475_s1 }
 0x5ff   : > { %p4648_p13 = pnand %p8950_p12, %p5109_p6 }
 0x601   : > { %p4649_p0 = pneg %p4648_p13 }
 0x603   : > { %5008 = dma.done.wait (%p4649_p0), %s4476_s20, 4096  }
 0x604   : > { %5010 = vsyncadd (%p4649_p0), %s4476_s20, 4294963200  ;;  %p22_p5 = scmp.ge.s32.totalorder %s5147_s13, 4   ;;  %s8951_s24 = smov %s5017_s25 }
 0x605   : > { %s8952_s25 = smov %s5021_s26  ;;  %s8953_s26 = smov %s5161_s17 }
 0x606   : > { %s8954_s27 = smov %s5147_s13  ;;  %24 = sbr.rel (!%p22_p5) target bundleno = 9 (0x9), region = 105 }
 0x60b   :  { %4482 = vsyncpa [#allocation3], 1 }
 0x60c   :  { %4484 = vsyncpa [#allocation3 + $0x1], 1 }
 0x60d   :  { %4485 = vsyncpa [#allocation6], 1 }
 0x60e   :  { %4486 = vsyncpa [#allocation9], 1 }
 0x60f   :  { %4487 = vsyncpa [#allocation4], 1 }
 0x610   :  { %4489 = vsyncpa [#allocation4 + $0x1], 1 }

</bundles_post_ra>
